<compile_context>
chip_gen: v6e
topology: v6e:2x2x1
jax: 0.10.0
libtpu: 0.0.40
codegen_flags: <defaults>
</compile_context>

<pallas_src>
import functools

import jax
import jax.numpy as jnp
from jax.experimental import pallas as pl
from jax.experimental.pallas import tpu as pltpu


# ----------------------------------------------------------------------------
# Host-side packing: every parameter / constant goes into ONE f32 slab so the
# kernel pays a single DMA instead of ~40 tiny ones.
# ----------------------------------------------------------------------------
class _Slab:
    def __init__(self, width):
        self.width = width
        self.rows = 0
        self.chunks = []
        self.index = {}  # name -> (row_offset, (rows, cols)); all offsets are static ints

    def add(self, name, arr):
        arr = jnp.asarray(arr, jnp.float32)
        if arr.ndim == 1:
            arr = arr[None, :]
        r, c = arr.shape
        assert c <= self.width, (name, arr.shape)
        self.index[name] = (self.rows, (r, c))
        arr = jnp.pad(arr, ((0, (-r) % 8), (0, self.width - c)))  # keep every entry 8-row aligned
        self.chunks.append(arr)
        self.rows += arr.shape[0]

    def finish(self):
        return jnp.concatenate(self.chunks, axis=0), self.index


def _block_diag(a, b):
    a = jnp.asarray(a, jnp.float32)
    b = jnp.asarray(b, jnp.float32)
    r1, c1 = a.shape
    r2, c2 = b.shape
    top = jnp.concatenate([a, jnp.zeros((r1, c2), jnp.float32)], axis=1)
    bot = jnp.concatenate([jnp.zeros((r2, c1), jnp.float32), b], axis=1)
    return jnp.concatenate([top, bot], axis=0)


# ----------------------------------------------------------------------------
# Synthetic per-branch Mamba layer parameters (deterministic).
# ----------------------------------------------------------------------------
def _init_layer(key, d_model, d_out, d_state, d_conv, d_inner, dt_rank):
    ks = jax.random.split(key, 8)
    n = lambda k, s, sc: jax.random.normal(k, s, jnp.float32) * sc
    A = -jnp.tile(jnp.arange(1, d_state + 1, dtype=jnp.float32)[:, None], (1, d_inner))
    return dict(
        ln_w=jnp.ones((1, d_model), jnp.float32), ln_b=jnp.zeros((1, d_model), jnp.float32),
        w_in_x=n(ks[0], (d_model, d_inner), 0.05), b_in_x=jnp.zeros((1, d_inner), jnp.float32),
        w_in_z=n(ks[1], (d_model, d_inner), 0.05), b_in_z=jnp.zeros((1, d_inner), jnp.float32),
        conv_w=n(ks[2], (d_conv, d_inner), 0.1), conv_b=jnp.zeros((1, d_inner), jnp.float32),
        w_dtin=n(ks[3], (d_inner, dt_rank), 0.05),
        w_B=n(ks[4], (d_inner, d_state), 0.05),
        w_C=n(ks[5], (d_inner, d_state), 0.05),
        w_dt=n(ks[6], (dt_rank, d_inner), 0.05), b_dt=jnp.full((1, d_inner), 0.1, jnp.float32),
        A=A, D=jnp.ones((1, d_inner), jnp.float32),
        w_out=n(ks[7], (d_inner, d_out), 0.05), b_out=jnp.zeros((1, d_out), jnp.float32),
    )


def _pack_stage(slab, name, br0, br1, d_state, d_conv, dt_rank):
    """Fuse the two branches of one Mamba stage along the lane axis (block-diag weights)."""
    dm, dn = br0["w_in_x"].shape
    S, sdn = d_state, d_state * dn
    cat = lambda a, b: jnp.concatenate([a, b], axis=1)

    slab.add(f"{name}_avg", _block_diag(jnp.full((dm, dm), 1.0 / dm), jnp.full((dm, dm), 1.0 / dm)))
    slab.add(f"{name}_ln_w", cat(br0["ln_w"], br1["ln_w"]))
    slab.add(f"{name}_ln_b", cat(br0["ln_b"], br1["ln_b"]))
    # fused in-projection -> [xi_br0 | xi_br1 | z_br0 | z_br1]
    slab.add(f"{name}_w_in", cat(_block_diag(br0["w_in_x"], br1["w_in_x"]),
                                 _block_diag(br0["w_in_z"], br1["w_in_z"])))
    slab.add(f"{name}_b_in", jnp.concatenate(
        [br0["b_in_x"], br1["b_in_x"], br0["b_in_z"], br1["b_in_z"]], axis=1))
    slab.add(f"{name}_conv_w", cat(br0["conv_w"], br1["conv_w"]))
    slab.add(f"{name}_conv_b", cat(br0["conv_b"], br1["conv_b"]))
    # fused B / C / dt_in projection -> [B_br0 | B_br1 | C_br0 | C_br1 | dt_br0 | dt_br1]
    slab.add(f"{name}_w_bcd", jnp.concatenate(
        [_block_diag(br0["w_B"], br1["w_B"]),
         _block_diag(br0["w_C"], br1["w_C"]),
         _block_diag(br0["w_dtin"], br1["w_dtin"])], axis=1))
    slab.add(f"{name}_w_dt", _block_diag(br0["w_dt"], br1["w_dt"]))
    slab.add(f"{name}_b_dt", cat(br0["b_dt"], br1["b_dt"]))
    slab.add(f"{name}_A", cat(br0["A"].reshape(1, sdn), br1["A"].reshape(1, sdn)))
    slab.add(f"{name}_D", cat(br0["D"], br1["D"]))
    slab.add(f"{name}_w_out", _block_diag(br0["w_out"], br1["w_out"]))
    slab.add(f"{name}_b_out", cat(br0["b_out"], br1["b_out"]))
    # constant 0/1 maps between (state s, channel d) and flattened lane index s*dn + d
    j = jnp.arange(sdn)
    e = (j[None, :] // dn == jnp.arange(S)[:, None]).astype(jnp.float32)   # (S, sdn)
    t = (j[None, :] % dn == jnp.arange(dn)[:, None]).astype(jnp.float32)   # (dn, sdn)
    slab.add(f"{name}_exp_s", _block_diag(e, e))       # (2S, 2*sdn)
    slab.add(f"{name}_tile_d", _block_diag(t, t))      # (2dn, 2*sdn)
    slab.add(f"{name}_red", _block_diag(t.T, t.T))     # (2*sdn, 2dn)
    return dict(dm=dm, dn=dn, S=S, sdn=sdn, K=d_conv, dtr=dt_rank)


def build_model(key, *, batch, seq_len, in_dim, d_out, d_state, d_conv):
    assert in_dim == d_out, "gate multiply requires in_dim == d_out (as in the module's usage)"
    d_inner1, d_inner2, dt_rank = 2 * in_dim, 2 * d_out, 4
    B, L, BL = batch, seq_len, batch * seq_len
    ks = jax.random.split(key, 8)

    s1 = [_init_layer(ks[i], in_dim, d_out, d_state, d_conv, d_inner1, dt_rank) for i in (0, 1)]
    s2 = [_init_layer(ks[i], d_out, d_out, d_state, d_conv, d_inner2, dt_rank) for i in (2, 3)]

    # LatentGate / reverse LatentGate (Linear over the seq axis, std=0.01 weight init)
    bnd = 1.0 / (L ** 0.5)
    gate_w = [jax.random.normal(ks[4 + i], (L, L), jnp.float32) * 0.01 for i in range(2)]
    gate_b = [jax.random.uniform(ks[6 + i], (L,), jnp.float32, -bnd, bnd) for i in range(2)]
    # DyTanh (synthetic): scalar alpha, per-seq-position weight / bias
    dyt_alpha = [jnp.full((L,), 0.5, jnp.float32)] * 2
    dyt_w = [jnp.ones((L,), jnp.float32)] * 2
    dyt_b = [jnp.zeros((L,), jnp.float32)] * 2

    scan_shifts = []
    s = 1
    while s < L:
        scan_shifts.append(s)
        s *= 2
    conv_shifts = list(range(1, d_conv))
    all_shifts = sorted(set(scan_shifts) | set(conv_shifts))

    width = max(2 * d_state * max(d_inner1, d_inner2), BL, 128)
    slab = _Slab(width)

    eyeB = jnp.eye(B, dtype=jnp.float32)
    # per-batch "shift down by s along time" matrices (zero rows at each segment start)
    for sh in all_shifts:
        slab.add(f"M{sh}", jnp.kron(eyeB, jnp.eye(L, L, k=-sh, dtype=jnp.float32)))
    pos = jnp.tile(jnp.arange(L, dtype=jnp.float32), (B,))
    slab.add("scan_mask", jnp.stack([(pos < sh).astype(jnp.float32) for sh in scan_shifts], axis=1))
    slab.add("flip", jnp.kron(eyeB, jnp.fliplr(jnp.eye(L, dtype=jnp.float32))))
    slab.add("gate_w0", jnp.kron(eyeB, gate_w[0]))
    slab.add("gate_w1", jnp.kron(eyeB, gate_w[1]))
    bcast = lambda v, w: jnp.tile(v, (B,))[:, None] * jnp.ones((1, w), jnp.float32)
    slab.add("gate_b", jnp.concatenate([bcast(gate_b[0], in_dim), bcast(gate_b[1], in_dim)], axis=1))
    slab.add("dyt_a", jnp.concatenate([bcast(dyt_alpha[0], d_out), bcast(dyt_alpha[1], d_out)], axis=1))
    slab.add("dyt_w", jnp.concatenate([bcast(dyt_w[0], d_out), bcast(dyt_w[1], d_out)], axis=1))
    slab.add("dyt_b", jnp.concatenate([bcast(dyt_b[0], d_out), bcast(dyt_b[1], d_out)], axis=1))
    slab.add("pad_id", jnp.eye(d_out, 128, dtype=jnp.float32))   # lane-dense output padding

    dims1 = _pack_stage(slab, "s1", s1[0], s1[1], d_state, d_conv, dt_rank)
    dims2 = _pack_stage(slab, "s2", s2[0], s2[1], d_state, d_conv, dt_rank)

    slab_arr, index = slab.finish()
    meta = dict(B=B, L=L, BL=BL, C=in_dim, d_out=d_out,
                scan_shifts=tuple(scan_shifts), stage_dims=(dims1, dims2))
    return slab_arr, index, meta


# ----------------------------------------------------------------------------
# The single fused kernel.  Rows = B*L (batch folded into M), lanes carry both
# branches side by side.  No scratch, no grid, no serial loops.
# ----------------------------------------------------------------------------
def _make_kernel(index, meta):
    BL, C, d_out = meta["BL"], meta["C"], meta["d_out"]
    scan_shifts = meta["scan_shifts"]
    dims1, dims2 = meta["stage_dims"]

    def kernel(x_ref, slab_ref, o_ref):
        def g(name):
            off, (r, c) = index[name]
            return slab_ref[off:off + r, 0:c]          # static, 8-row-aligned sub-slice

        def mm(a, b):
            return jnp.dot(a, b, preferred_element_type=jnp.float32)

        x2 = x_ref[...]                                # (BL, 2C): lanes [x | flip(x)]
        xt = x2[:, 0:C]                                # un-flipped x, time-major

        # --- LatentGate / reverse LatentGate: both computed on un-flipped x ---
        gate_b = g("gate_b")
        g0 = jax.nn.sigmoid(mm(g("gate_w0"), xt) + gate_b[:, 0:C])
        g1 = jax.nn.sigmoid(mm(g("gate_w1"), xt) + gate_b[:, C:2 * C])

        def mamba_stage(xin, st, d):
            dn, S, K, dtr = d["dn"], d["S"], d["K"], d["dtr"]

            # per-branch LayerNorm over channels via block-diagonal averaging matmuls
            avg = g(f"{st}_avg")
            mu = mm(xin, avg)
            var = mm(xin * xin, avg) - mu * mu
            xn = (xin - mu) * jax.lax.rsqrt(var + 1e-5) * g(f"{st}_ln_w") + g(f"{st}_ln_b")

            # fused in-projection: [xi_br0 | xi_br1 | z_br0 | z_br1]
            xz = mm(xn, g(f"{st}_w_in")) + g(f"{st}_b_in")
            xi = xz[:, 0:2 * dn]
            z = xz[:, 2 * dn:4 * dn]

            # causal depthwise conv1d along time via per-batch shift matmuls
            cw = g(f"{st}_conv_w")                     # (K, 2dn)
            acc = g(f"{st}_conv_b") + xi * cw[K - 1:K, :]
            for j in range(1, K):
                acc = acc + mm(g(f"M{j}"), xi) * cw[K - 1 - j:K - j, :]
            xc = acc * jax.nn.sigmoid(acc)             # SiLU

            # fused B / C / delta projections
            bcd = mm(xc, g(f"{st}_w_bcd"))
            Bm = bcd[:, 0:2 * S]
            Cm = bcd[:, 2 * S:4 * S]
            dtin = bcd[:, 4 * S:4 * S + 2 * dtr]
            delta = jax.nn.softplus(mm(dtin, g(f"{st}_w_dt")) + g(f"{st}_b_dt"))

            # hoisted scan inputs, lane-flattened over (state, channel) per branch
            T = g(f"{st}_tile_d")
            E = g(f"{st}_exp_s")
            dA = jnp.exp(mm(delta, T) * g(f"{st}_A"))              # (BL, 2*S*dn)
            dBx = mm(Bm, E) * mm(delta * xc, T)                    # (BL, 2*S*dn)

            # log-depth (Hillis-Steele) scan of h_t = dA_t * h_{t-1} + dBx_t, in values.
            # Shift matrices zero the rows that would cross a batch/segment boundary;
            # the mask column restores the identity element there.
            a, b = dA, dBx
            msk = g("scan_mask")
            for i, sh in enumerate(scan_shifts):
                Ms = g(f"M{sh}")
                a_sh = mm(Ms, a)
                b_sh = mm(Ms, b)
                m = msk[:, i:i + 1]
                new_b = b + a * b_sh
                new_a = a * (a_sh + m)
                a, b = new_a, new_b
            h = b                                                   # all h_t, flattened lanes

            # y[t, d] = sum_s C[t, s] * h[t, s, d]  (per branch), then skip/gate/out-proj
            y = mm(mm(Cm, E) * h, g(f"{st}_red"))                   # (BL, 2dn)
            y = y + g(f"{st}_D") * xc
            y = y * (z * jax.nn.sigmoid(z))
            return mm(y, g(f"{st}_w_out")) + g(f"{st}_b_out")       # (BL, 2*d_out)

        h1 = mamba_stage(x2, "s1", dims1)
        h2 = mamba_stage(h1, "s2", dims2)

        # DyTanh over the seq axis (per-branch, params pre-broadcast host-side)
        yd = jnp.tanh(h2 * g("dyt_a")) * g("dyt_w") + g("dyt_b")
        y0 = yd[:, 0:d_out] * g0                       # forward branch, gated
        y1 = yd[:, d_out:2 * d_out] * g1               # reverse branch (reversed frame), gated
        total = y0 + mm(g("flip"), y1)                 # flip reverse branch back, per batch
        o_ref[...] = mm(total, g("pad_id"))            # lane-dense (BL, 128) store

    return kernel


def mamba_latent_bimap(x, slab, *, index, meta):
    """x: (B, in_dim, seq_len) -> (B, d_out, seq_len)."""
    B, C, L = x.shape
    assert (B, C, L) == (meta["B"], meta["C"], meta["L"])
    BL, d_out = meta["BL"], meta["d_out"]

    # boundary layout glue only (tiny): time-major + pre-flipped copy for branch 1
    xt = jnp.transpose(x, (0, 2, 1)).astype(jnp.float32)         # (B, L, C)
    x_fused = jnp.concatenate([xt, xt[:, ::-1, :]], axis=-1)     # lanes [x | flip(x)]
    x_fused = x_fused.reshape(BL, 2 * C)

    out = pl.pallas_call(
        _make_kernel(index, meta),
        out_shape=jax.ShapeDtypeStruct((BL, 128), jnp.float32),
        in_specs=[pl.BlockSpec(memory_space=pltpu.MemorySpace.VMEM),
                  pl.BlockSpec(memory_space=pltpu.MemorySpace.VMEM)],
        out_specs=pl.BlockSpec(memory_space=pltpu.MemorySpace.VMEM),
    )(x_fused, slab)

    out = out.reshape(B, L, 128)[:, :, :d_out]                   # drop lane padding
    return jnp.transpose(out, (0, 2, 1))                         # (B, d_out, L)


if __name__ == "__main__":
    key = jax.random.PRNGKey(0)
    kp, kx = jax.random.split(key)

    # small shapes: batch=2, in_dim=d_out=8, seq_len=16, d_state=8, d_conv=4
    B, in_dim, seq_len = 2, 8, 16
    d_out, d_state, d_conv = 8, 8, 4

    slab, index, meta = build_model(kp, batch=B, seq_len=seq_len, in_dim=in_dim,
                                    d_out=d_out, d_state=d_state, d_conv=d_conv)
    x = jax.random.normal(kx, (B, in_dim, seq_len), jnp.float32)

    fwd = jax.jit(functools.partial(mamba_latent_bimap, index=index, meta=meta))
    out = fwd(x, slab)
    jax.block_until_ready(out)
    assert out.shape == (B, d_out, seq_len)
    assert bool(jnp.all(jnp.isfinite(out)))
    print("KERNEL_OK")
</pallas_src>

<mosaic_0001>
module attributes {stable_mosaic.version = 11 : i64} {
  func.func @kernel(%arg0: memref<32x16xf32, #tpu.memory_space<vmem>>, %arg1: memref<1384x256xf32, #tpu.memory_space<vmem>>, %arg2: memref<32x128xf32, #tpu.memory_space<vmem>>) attributes {dimension_semantics = [], scalar_prefetch = 0 : i64, scratch_operands = 0 : i64, tpu.core_type = #tpu.core_type<tc>} {
    %c0 = arith.constant 0 : index
    %c0_0 = arith.constant 0 : index
    %0 = vector.load %arg0[%c0, %c0_0] : memref<32x16xf32, #tpu.memory_space<vmem>>, vector<32x16xf32>
    %1 = vector.extract_strided_slice %0 {offsets = [0, 0], sizes = [32, 8], strides = [1, 1]} : vector<32x16xf32> to vector<32x8xf32>
    %c288 = arith.constant 288 : index
    %c0_1 = arith.constant 0 : index
    %2 = vector.load %arg1[%c288, %c0_1] : memref<1384x256xf32, #tpu.memory_space<vmem>>, vector<32x16xf32>
    %c224 = arith.constant 224 : index
    %c0_2 = arith.constant 0 : index
    %3 = vector.load %arg1[%c224, %c0_2] : memref<1384x256xf32, #tpu.memory_space<vmem>>, vector<32x32xf32>
    %cst = arith.constant dense<0.000000e+00> : vector<32x8xf32>
    %4 = tpu.matmul %3, %1, %cst {dimension_numbers = #tpu.dot_dimension_numbers<[1], [0], [0], [1], [0, 0, 1, 1], [], []>} : vector<32x32xf32>, vector<32x8xf32>, vector<32x8xf32> -> vector<32x8xf32>
    %5 = vector.extract_strided_slice %2 {offsets = [0, 0], sizes = [32, 8], strides = [1, 1]} : vector<32x16xf32> to vector<32x8xf32>
    %6 = arith.addf %4, %5 : vector<32x8xf32>
    %7 = arith.negf %6 : vector<32x8xf32>
    %8 = math.exp %7 : vector<32x8xf32>
    %cst_3 = arith.constant 1.000000e+00 : f32
    %9 = vector.broadcast %cst_3 : f32 to vector<32x8xf32>
    %10 = arith.addf %9, %8 : vector<32x8xf32>
    %11 = arith.divf %9, %10 : vector<32x8xf32>
    %c256 = arith.constant 256 : index
    %c0_4 = arith.constant 0 : index
    %12 = vector.load %arg1[%c256, %c0_4] : memref<1384x256xf32, #tpu.memory_space<vmem>>, vector<32x32xf32>
    %cst_5 = arith.constant dense<0.000000e+00> : vector<32x8xf32>
    %13 = tpu.matmul %12, %1, %cst_5 {dimension_numbers = #tpu.dot_dimension_numbers<[1], [0], [0], [1], [0, 0, 1, 1], [], []>} : vector<32x32xf32>, vector<32x8xf32>, vector<32x8xf32> -> vector<32x8xf32>
    %14 = vector.extract_strided_slice %2 {offsets = [0, 8], sizes = [32, 8], strides = [1, 1]} : vector<32x16xf32> to vector<32x8xf32>
    %15 = arith.addf %13, %14 : vector<32x8xf32>
    %16 = arith.negf %15 : vector<32x8xf32>
    %17 = math.exp %16 : vector<32x8xf32>
    %cst_6 = arith.constant 1.000000e+00 : f32
    %18 = vector.broadcast %cst_6 : f32 to vector<32x8xf32>
    %19 = arith.addf %18, %17 : vector<32x8xf32>
    %20 = arith.divf %18, %19 : vector<32x8xf32>
    %c424 = arith.constant 424 : index
    %c0_7 = arith.constant 0 : index
    %21 = vector.load %arg1[%c424, %c0_7] : memref<1384x256xf32, #tpu.memory_space<vmem>>, vector<16x16xf32>
    %cst_8 = arith.constant dense<0.000000e+00> : vector<32x16xf32>
    %22 = tpu.matmul %0, %21, %cst_8 {dimension_numbers = #tpu.dot_dimension_numbers<[1], [0], [0], [1], [0, 0, 1, 1], [], []>} : vector<32x16xf32>, vector<16x16xf32>, vector<32x16xf32> -> vector<32x16xf32>
    %23 = arith.mulf %0, %0 : vector<32x16xf32>
    %cst_9 = arith.constant dense<0.000000e+00> : vector<32x16xf32>
    %24 = tpu.matmul %23, %21, %cst_9 {dimension_numbers = #tpu.dot_dimension_numbers<[1], [0], [0], [1], [0, 0, 1, 1], [], []>} : vector<32x16xf32>, vector<16x16xf32>, vector<32x16xf32> -> vector<32x16xf32>
    %25 = arith.mulf %22, %22 : vector<32x16xf32>
    %26 = arith.subf %24, %25 : vector<32x16xf32>
    %27 = arith.subf %0, %22 : vector<32x16xf32>
    %cst_10 = arith.constant 9.99999974E-6 : f32
    %28 = vector.broadcast %cst_10 : f32 to vector<32x16xf32>
    %29 = arith.addf %26, %28 : vector<32x16xf32>
    %30 = math.rsqrt %29 : vector<32x16xf32>
    %31 = arith.mulf %27, %30 : vector<32x16xf32>
    %c440 = arith.constant 440 : index
    %c0_11 = arith.constant 0 : index
    %32 = vector.load %arg1[%c440, %c0_11] : memref<1384x256xf32, #tpu.memory_space<vmem>>, vector<1x16xf32>
    %33 = vector.broadcast %32 : vector<1x16xf32> to vector<32x16xf32>
    %34 = arith.mulf %31, %33 : vector<32x16xf32>
    %c448 = arith.constant 448 : index
    %c0_12 = arith.constant 0 : index
    %35 = vector.load %arg1[%c448, %c0_12] : memref<1384x256xf32, #tpu.memory_space<vmem>>, vector<1x16xf32>
    %36 = vector.broadcast %35 : vector<1x16xf32> to vector<32x16xf32>
    %37 = arith.addf %34, %36 : vector<32x16xf32>
    %c456 = arith.constant 456 : index
    %c0_13 = arith.constant 0 : index
    %38 = vector.load %arg1[%c456, %c0_13] : memref<1384x256xf32, #tpu.memory_space<vmem>>, vector<16x64xf32>
    %cst_14 = arith.constant dense<0.000000e+00> : vector<32x64xf32>
    %39 = tpu.matmul %37, %38, %cst_14 {dimension_numbers = #tpu.dot_dimension_numbers<[1], [0], [0], [1], [0, 0, 1, 1], [], []>} : vector<32x16xf32>, vector<16x64xf32>, vector<32x64xf32> -> vector<32x64xf32>
    %c472 = arith.constant 472 : index
    %c0_15 = arith.constant 0 : index
    %40 = vector.load %arg1[%c472, %c0_15] : memref<1384x256xf32, #tpu.memory_space<vmem>>, vector<1x64xf32>
    %41 = vector.broadcast %40 : vector<1x64xf32> to vector<32x64xf32>
    %42 = arith.addf %39, %41 : vector<32x64xf32>
    %43 = vector.extract_strided_slice %42 {offsets = [0, 0], sizes = [32, 32], strides = [1, 1]} : vector<32x64xf32> to vector<32x32xf32>
    %44 = vector.extract_strided_slice %42 {offsets = [0, 32], sizes = [32, 32], strides = [1, 1]} : vector<32x64xf32> to vector<32x32xf32>
    %c480 = arith.constant 480 : index
    %c0_16 = arith.constant 0 : index
    %45 = vector.load %arg1[%c480, %c0_16] : memref<1384x256xf32, #tpu.memory_space<vmem>>, vector<4x32xf32>
    %c488 = arith.constant 488 : index
    %c0_17 = arith.constant 0 : index
    %46 = vector.load %arg1[%c488, %c0_17] : memref<1384x256xf32, #tpu.memory_space<vmem>>, vector<1x32xf32>
    %47 = vector.extract_strided_slice %45 {offsets = [3, 0], sizes = [1, 32], strides = [1, 1]} : vector<4x32xf32> to vector<1x32xf32>
    %48 = vector.broadcast %47 : vector<1x32xf32> to vector<32x32xf32>
    %49 = arith.mulf %43, %48 : vector<32x32xf32>
    %50 = vector.broadcast %46 : vector<1x32xf32> to vector<32x32xf32>
    %51 = arith.addf %50, %49 : vector<32x32xf32>
    %c0_18 = arith.constant 0 : index
    %c0_19 = arith.constant 0 : index
    %52 = vector.load %arg1[%c0_18, %c0_19] : memref<1384x256xf32, #tpu.memory_space<vmem>>, vector<32x32xf32>
    %cst_20 = arith.constant dense<0.000000e+00> : vector<32x32xf32>
    %53 = tpu.matmul %52, %43, %cst_20 {dimension_numbers = #tpu.dot_dimension_numbers<[1], [0], [0], [1], [0, 0, 1, 1], [], []>} : vector<32x32xf32>, vector<32x32xf32>, vector<32x32xf32> -> vector<32x32xf32>
    %54 = vector.extract_strided_slice %45 {offsets = [2, 0], sizes = [1, 32], strides = [1, 1]} : vector<4x32xf32> to vector<1x32xf32>
    %55 = vector.broadcast %54 : vector<1x32xf32> to vector<32x32xf32>
    %56 = arith.mulf %53, %55 : vector<32x32xf32>
    %57 = arith.addf %51, %56 : vector<32x32xf32>
    %c32 = arith.constant 32 : index
    %c0_21 = arith.constant 0 : index
    %58 = vector.load %arg1[%c32, %c0_21] : memref<1384x256xf32, #tpu.memory_space<vmem>>, vector<32x32xf32>
    %cst_22 = arith.constant dense<0.000000e+00> : vector<32x32xf32>
    %59 = tpu.matmul %58, %43, %cst_22 {dimension_numbers = #tpu.dot_dimension_numbers<[1], [0], [0], [1], [0, 0, 1, 1], [], []>} : vector<32x32xf32>, vector<32x32xf32>, vector<32x32xf32> -> vector<32x32xf32>
    %60 = vector.extract_strided_slice %45 {offsets = [1, 0], sizes = [1, 32], strides = [1, 1]} : vector<4x32xf32> to vector<1x32xf32>
    %61 = vector.broadcast %60 : vector<1x32xf32> to vector<32x32xf32>
    %62 = arith.mulf %59, %61 : vector<32x32xf32>
    %63 = arith.addf %57, %62 : vector<32x32xf32>
    %c64 = arith.constant 64 : index
    %c0_23 = arith.constant 0 : index
    %64 = vector.load %arg1[%c64, %c0_23] : memref<1384x256xf32, #tpu.memory_space<vmem>>, vector<32x32xf32>
    %cst_24 = arith.constant dense<0.000000e+00> : vector<32x32xf32>
    %65 = tpu.matmul %64, %43, %cst_24 {dimension_numbers = #tpu.dot_dimension_numbers<[1], [0], [0], [1], [0, 0, 1, 1], [], []>} : vector<32x32xf32>, vector<32x32xf32>, vector<32x32xf32> -> vector<32x32xf32>
    %66 = vector.extract_strided_slice %45 {offsets = [0, 0], sizes = [1, 32], strides = [1, 1]} : vector<4x32xf32> to vector<1x32xf32>
    %67 = vector.broadcast %66 : vector<1x32xf32> to vector<32x32xf32>
    %68 = arith.mulf %65, %67 : vector<32x32xf32>
    %69 = arith.addf %63, %68 : vector<32x32xf32>
    %70 = arith.negf %69 : vector<32x32xf32>
    %71 = math.exp %70 : vector<32x32xf32>
    %cst_25 = arith.constant 1.000000e+00 : f32
    %72 = vector.broadcast %cst_25 : f32 to vector<32x32xf32>
    %73 = arith.addf %72, %71 : vector<32x32xf32>
    %74 = arith.divf %72, %73 : vector<32x32xf32>
    %75 = arith.mulf %69, %74 : vector<32x32xf32>
    %c496 = arith.constant 496 : index
    %c0_26 = arith.constant 0 : index
    %76 = vector.load %arg1[%c496, %c0_26] : memref<1384x256xf32, #tpu.memory_space<vmem>>, vector<32x40xf32>
    %cst_27 = arith.constant dense<0.000000e+00> : vector<32x40xf32>
    %77 = tpu.matmul %75, %76, %cst_27 {dimension_numbers = #tpu.dot_dimension_numbers<[1], [0], [0], [1], [0, 0, 1, 1], [], []>} : vector<32x32xf32>, vector<32x40xf32>, vector<32x40xf32> -> vector<32x40xf32>
    %78 = vector.extract_strided_slice %77 {offsets = [0, 0], sizes = [32, 16], strides = [1, 1]} : vector<32x40xf32> to vector<32x16xf32>
    %79 = vector.extract_strided_slice %77 {offsets = [0, 16], sizes = [32, 16], strides = [1, 1]} : vector<32x40xf32> to vector<32x16xf32>
    %80 = vector.extract_strided_slice %77 {offsets = [0, 32], sizes = [32, 8], strides = [1, 1]} : vector<32x40xf32> to vector<32x8xf32>
    %c528 = arith.constant 528 : index
    %c0_28 = arith.constant 0 : index
    %81 = vector.load %arg1[%c528, %c0_28] : memref<1384x256xf32, #tpu.memory_space<vmem>>, vector<8x32xf32>
    %cst_29 = arith.constant dense<0.000000e+00> : vector<32x32xf32>
    %82 = tpu.matmul %80, %81, %cst_29 {dimension_numbers = #tpu.dot_dimension_numbers<[1], [0], [0], [1], [0, 0, 1, 1], [], []>} : vector<32x8xf32>, vector<8x32xf32>, vector<32x32xf32> -> vector<32x32xf32>
    %c536 = arith.constant 536 : index
    %c0_30 = arith.constant 0 : index
    %83 = vector.load %arg1[%c536, %c0_30] : memref<1384x256xf32, #tpu.memory_space<vmem>>, vector<1x32xf32>
    %84 = vector.broadcast %83 : vector<1x32xf32> to vector<32x32xf32>
    %85 = arith.addf %82, %84 : vector<32x32xf32>
    %cst_31 = arith.constant 0.000000e+00 : f32
    %86 = vector.broadcast %cst_31 : f32 to vector<32x32xf32>
    %87 = arith.maximumf %85, %86 : vector<32x32xf32>
    %88 = vector.broadcast %cst_31 : f32 to vector<32x32xf32>
    %89 = arith.subf %85, %88 : vector<32x32xf32>
    %90 = arith.cmpf one, %89, %89 : vector<32x32xf32>
    %91 = vector.broadcast %cst_31 : f32 to vector<32x32xf32>
    %92 = arith.addf %85, %91 : vector<32x32xf32>
    %93 = math.absf %89 : vector<32x32xf32>
    %cst_32 = arith.constant 0.000000e+00 : f32
    %94 = vector.broadcast %cst_32 : f32 to vector<32x32xf32>
    %95 = arith.subf %94, %93 : vector<32x32xf32>
    %96 = math.exp %95 : vector<32x32xf32>
    %97 = math.log1p %96 : vector<32x32xf32>
    %98 = arith.addf %87, %97 : vector<32x32xf32>
    %99 = arith.select %90, %92, %98 : vector<32x32xi1>, vector<32x32xf32>
    %c616 = arith.constant 616 : index
    %c0_33 = arith.constant 0 : index
    %100 = vector.load %arg1[%c616, %c0_33] : memref<1384x256xf32, #tpu.memory_space<vmem>>, vector<32x256xf32>
    %c600 = arith.constant 600 : index
    %c0_34 = arith.constant 0 : index
    %101 = vector.load %arg1[%c600, %c0_34] : memref<1384x256xf32, #tpu.memory_space<vmem>>, vector<16x256xf32>
    %cst_35 = arith.constant dense<0.000000e+00> : vector<32x256xf32>
    %102 = tpu.matmul %99, %100, %cst_35 {dimension_numbers = #tpu.dot_dimension_numbers<[1], [0], [0], [1], [0, 0, 1, 1], [], []>} : vector<32x32xf32>, vector<32x256xf32>, vector<32x256xf32> -> vector<32x256xf32>
    %c544 = arith.constant 544 : index
    %c0_36 = arith.constant 0 : index
    %103 = vector.load %arg1[%c544, %c0_36] : memref<1384x256xf32, #tpu.memory_space<vmem>>, vector<1x256xf32>
    %104 = vector.broadcast %103 : vector<1x256xf32> to vector<32x256xf32>
    %105 = arith.mulf %102, %104 : vector<32x256xf32>
    %106 = math.exp %105 : vector<32x256xf32>
    %cst_37 = arith.constant dense<0.000000e+00> : vector<32x256xf32>
    %107 = tpu.matmul %78, %101, %cst_37 {dimension_numbers = #tpu.dot_dimension_numbers<[1], [0], [0], [1], [0, 0, 1, 1], [], []>} : vector<32x16xf32>, vector<16x256xf32>, vector<32x256xf32> -> vector<32x256xf32>
    %108 = arith.mulf %99, %75 : vector<32x32xf32>
    %cst_38 = arith.constant dense<0.000000e+00> : vector<32x256xf32>
    %109 = tpu.matmul %108, %100, %cst_38 {dimension_numbers = #tpu.dot_dimension_numbers<[1], [0], [0], [1], [0, 0, 1, 1], [], []>} : vector<32x32xf32>, vector<32x256xf32>, vector<32x256xf32> -> vector<32x256xf32>
    %110 = arith.mulf %107, %109 : vector<32x256xf32>
    %c160 = arith.constant 160 : index
    %c0_39 = arith.constant 0 : index
    %111 = vector.load %arg1[%c160, %c0_39] : memref<1384x256xf32, #tpu.memory_space<vmem>>, vector<32x4xf32>
    %c0_40 = arith.constant 0 : index
    %c0_41 = arith.constant 0 : index
    %112 = vector.load %arg1[%c0_40, %c0_41] : memref<1384x256xf32, #tpu.memory_space<vmem>>, vector<32x32xf32>
    %cst_42 = arith.constant dense<0.000000e+00> : vector<32x256xf32>
    %113 = tpu.matmul %112, %106, %cst_42 {dimension_numbers = #tpu.dot_dimension_numbers<[1], [0], [0], [1], [0, 0, 1, 1], [], []>} : vector<32x32xf32>, vector<32x256xf32>, vector<32x256xf32> -> vector<32x256xf32>
    %cst_43 = arith.constant dense<0.000000e+00> : vector<32x256xf32>
    %114 = tpu.matmul %112, %110, %cst_43 {dimension_numbers = #tpu.dot_dimension_numbers<[1], [0], [0], [1], [0, 0, 1, 1], [], []>} : vector<32x32xf32>, vector<32x256xf32>, vector<32x256xf32> -> vector<32x256xf32>
    %115 = vector.extract_strided_slice %111 {offsets = [0, 0], sizes = [32, 1], strides = [1, 1]} : vector<32x4xf32> to vector<32x1xf32>
    %116 = arith.mulf %106, %114 : vector<32x256xf32>
    %117 = arith.addf %110, %116 : vector<32x256xf32>
    %118 = vector.broadcast %115 : vector<32x1xf32> to vector<32x256xf32>
    %119 = arith.addf %113, %118 : vector<32x256xf32>
    %120 = arith.mulf %106, %119 : vector<32x256xf32>
    %c32_44 = arith.constant 32 : index
    %c0_45 = arith.constant 0 : index
    %121 = vector.load %arg1[%c32_44, %c0_45] : memref<1384x256xf32, #tpu.memory_space<vmem>>, vector<32x32xf32>
    %cst_46 = arith.constant dense<0.000000e+00> : vector<32x256xf32>
    %122 = tpu.matmul %121, %120, %cst_46 {dimension_numbers = #tpu.dot_dimension_numbers<[1], [0], [0], [1], [0, 0, 1, 1], [], []>} : vector<32x32xf32>, vector<32x256xf32>, vector<32x256xf32> -> vector<32x256xf32>
    %cst_47 = arith.constant dense<0.000000e+00> : vector<32x256xf32>
    %123 = tpu.matmul %121, %117, %cst_47 {dimension_numbers = #tpu.dot_dimension_numbers<[1], [0], [0], [1], [0, 0, 1, 1], [], []>} : vector<32x32xf32>, vector<32x256xf32>, vector<32x256xf32> -> vector<32x256xf32>
    %124 = vector.extract_strided_slice %111 {offsets = [0, 1], sizes = [32, 1], strides = [1, 1]} : vector<32x4xf32> to vector<32x1xf32>
    %125 = arith.mulf %120, %123 : vector<32x256xf32>
    %126 = arith.addf %117, %125 : vector<32x256xf32>
    %127 = vector.broadcast %124 : vector<32x1xf32> to vector<32x256xf32>
    %128 = arith.addf %122, %127 : vector<32x256xf32>
    %129 = arith.mulf %120, %128 : vector<32x256xf32>
    %c96 = arith.constant 96 : index
    %c0_48 = arith.constant 0 : index
    %130 = vector.load %arg1[%c96, %c0_48] : memref<1384x256xf32, #tpu.memory_space<vmem>>, vector<32x32xf32>
    %cst_49 = arith.constant dense<0.000000e+00> : vector<32x256xf32>
    %131 = tpu.matmul %130, %129, %cst_49 {dimension_numbers = #tpu.dot_dimension_numbers<[1], [0], [0], [1], [0, 0, 1, 1], [], []>} : vector<32x32xf32>, vector<32x256xf32>, vector<32x256xf32> -> vector<32x256xf32>
    %cst_50 = arith.constant dense<0.000000e+00> : vector<32x256xf32>
    %132 = tpu.matmul %130, %126, %cst_50 {dimension_numbers = #tpu.dot_dimension_numbers<[1], [0], [0], [1], [0, 0, 1, 1], [], []>} : vector<32x32xf32>, vector<32x256xf32>, vector<32x256xf32> -> vector<32x256xf32>
    %133 = vector.extract_strided_slice %111 {offsets = [0, 2], sizes = [32, 1], strides = [1, 1]} : vector<32x4xf32> to vector<32x1xf32>
    %134 = arith.mulf %129, %132 : vector<32x256xf32>
    %135 = arith.addf %126, %134 : vector<32x256xf32>
    %136 = vector.broadcast %133 : vector<32x1xf32> to vector<32x256xf32>
    %137 = arith.addf %131, %136 : vector<32x256xf32>
    %138 = arith.mulf %129, %137 : vector<32x256xf32>
    %c128 = arith.constant 128 : index
    %c0_51 = arith.constant 0 : index
    %139 = vector.load %arg1[%c128, %c0_51] : memref<1384x256xf32, #tpu.memory_space<vmem>>, vector<32x32xf32>
    %cst_52 = arith.constant dense<0.000000e+00> : vector<32x256xf32>
    %140 = tpu.matmul %139, %135, %cst_52 {dimension_numbers = #tpu.dot_dimension_numbers<[1], [0], [0], [1], [0, 0, 1, 1], [], []>} : vector<32x32xf32>, vector<32x256xf32>, vector<32x256xf32> -> vector<32x256xf32>
    %141 = arith.mulf %138, %140 : vector<32x256xf32>
    %142 = arith.addf %135, %141 : vector<32x256xf32>
    %cst_53 = arith.constant dense<0.000000e+00> : vector<32x256xf32>
    %143 = tpu.matmul %79, %101, %cst_53 {dimension_numbers = #tpu.dot_dimension_numbers<[1], [0], [0], [1], [0, 0, 1, 1], [], []>} : vector<32x16xf32>, vector<16x256xf32>, vector<32x256xf32> -> vector<32x256xf32>
    %144 = arith.mulf %143, %142 : vector<32x256xf32>
    %c648 = arith.constant 648 : index
    %c0_54 = arith.constant 0 : index
    %145 = vector.load %arg1[%c648, %c0_54] : memref<1384x256xf32, #tpu.memory_space<vmem>>, vector<256x32xf32>
    %cst_55 = arith.constant dense<0.000000e+00> : vector<32x32xf32>
    %146 = tpu.matmul %144, %145, %cst_55 {dimension_numbers = #tpu.dot_dimension_numbers<[1], [0], [0], [1], [0, 0, 1, 1], [], []>} : vector<32x256xf32>, vector<256x32xf32>, vector<32x32xf32> -> vector<32x32xf32>
    %c552 = arith.constant 552 : index
    %c0_56 = arith.constant 0 : index
    %147 = vector.load %arg1[%c552, %c0_56] : memref<1384x256xf32, #tpu.memory_space<vmem>>, vector<1x32xf32>
    %148 = vector.broadcast %147 : vector<1x32xf32> to vector<32x32xf32>
    %149 = arith.mulf %148, %75 : vector<32x32xf32>
    %150 = arith.addf %146, %149 : vector<32x32xf32>
    %151 = arith.negf %44 : vector<32x32xf32>
    %152 = math.exp %151 : vector<32x32xf32>
    %cst_57 = arith.constant 1.000000e+00 : f32
    %153 = vector.broadcast %cst_57 : f32 to vector<32x32xf32>
    %154 = arith.addf %153, %152 : vector<32x32xf32>
    %155 = arith.divf %153, %154 : vector<32x32xf32>
    %156 = arith.mulf %44, %155 : vector<32x32xf32>
    %157 = arith.mulf %150, %156 : vector<32x32xf32>
    %c560 = arith.constant 560 : index
    %c0_58 = arith.constant 0 : index
    %158 = vector.load %arg1[%c560, %c0_58] : memref<1384x256xf32, #tpu.memory_space<vmem>>, vector<32x16xf32>
    %cst_59 = arith.constant dense<0.000000e+00> : vector<32x16xf32>
    %159 = tpu.matmul %157, %158, %cst_59 {dimension_numbers = #tpu.dot_dimension_numbers<[1], [0], [0], [1], [0, 0, 1, 1], [], []>} : vector<32x32xf32>, vector<32x16xf32>, vector<32x16xf32> -> vector<32x16xf32>
    %c592 = arith.constant 592 : index
    %c0_60 = arith.constant 0 : index
    %160 = vector.load %arg1[%c592, %c0_60] : memref<1384x256xf32, #tpu.memory_space<vmem>>, vector<1x16xf32>
    %161 = vector.broadcast %160 : vector<1x16xf32> to vector<32x16xf32>
    %162 = arith.addf %159, %161 : vector<32x16xf32>
    %c904 = arith.constant 904 : index
    %c0_61 = arith.constant 0 : index
    %163 = vector.load %arg1[%c904, %c0_61] : memref<1384x256xf32, #tpu.memory_space<vmem>>, vector<16x16xf32>
    %cst_62 = arith.constant dense<0.000000e+00> : vector<32x16xf32>
    %164 = tpu.matmul %162, %163, %cst_62 {dimension_numbers = #tpu.dot_dimension_numbers<[1], [0], [0], [1], [0, 0, 1, 1], [], []>} : vector<32x16xf32>, vector<16x16xf32>, vector<32x16xf32> -> vector<32x16xf32>
    %165 = arith.mulf %162, %162 : vector<32x16xf32>
    %cst_63 = arith.constant dense<0.000000e+00> : vector<32x16xf32>
    %166 = tpu.matmul %165, %163, %cst_63 {dimension_numbers = #tpu.dot_dimension_numbers<[1], [0], [0], [1], [0, 0, 1, 1], [], []>} : vector<32x16xf32>, vector<16x16xf32>, vector<32x16xf32> -> vector<32x16xf32>
    %167 = arith.mulf %164, %164 : vector<32x16xf32>
    %168 = arith.subf %166, %167 : vector<32x16xf32>
    %169 = arith.subf %162, %164 : vector<32x16xf32>
    %cst_64 = arith.constant 9.99999974E-6 : f32
    %170 = vector.broadcast %cst_64 : f32 to vector<32x16xf32>
    %171 = arith.addf %168, %170 : vector<32x16xf32>
    %172 = math.rsqrt %171 : vector<32x16xf32>
    %173 = arith.mulf %169, %172 : vector<32x16xf32>
    %c920 = arith.constant 920 : index
    %c0_65 = arith.constant 0 : index
    %174 = vector.load %arg1[%c920, %c0_65] : memref<1384x256xf32, #tpu.memory_space<vmem>>, vector<1x16xf32>
    %175 = vector.broadcast %174 : vector<1x16xf32> to vector<32x16xf32>
    %176 = arith.mulf %173, %175 : vector<32x16xf32>
    %c928 = arith.constant 928 : index
    %c0_66 = arith.constant 0 : index
    %177 = vector.load %arg1[%c928, %c0_66] : memref<1384x256xf32, #tpu.memory_space<vmem>>, vector<1x16xf32>
    %178 = vector.broadcast %177 : vector<1x16xf32> to vector<32x16xf32>
    %179 = arith.addf %176, %178 : vector<32x16xf32>
    %c936 = arith.constant 936 : index
    %c0_67 = arith.constant 0 : index
    %180 = vector.load %arg1[%c936, %c0_67] : memref<1384x256xf32, #tpu.memory_space<vmem>>, vector<16x64xf32>
    %cst_68 = arith.constant dense<0.000000e+00> : vector<32x64xf32>
    %181 = tpu.matmul %179, %180, %cst_68 {dimension_numbers = #tpu.dot_dimension_numbers<[1], [0], [0], [1], [0, 0, 1, 1], [], []>} : vector<32x16xf32>, vector<16x64xf32>, vector<32x64xf32> -> vector<32x64xf32>
    %c952 = arith.constant 952 : index
    %c0_69 = arith.constant 0 : index
    %182 = vector.load %arg1[%c952, %c0_69] : memref<1384x256xf32, #tpu.memory_space<vmem>>, vector<1x64xf32>
    %183 = vector.broadcast %182 : vector<1x64xf32> to vector<32x64xf32>
    %184 = arith.addf %181, %183 : vector<32x64xf32>
    %185 = vector.extract_strided_slice %184 {offsets = [0, 0], sizes = [32, 32], strides = [1, 1]} : vector<32x64xf32> to vector<32x32xf32>
    %186 = vector.extract_strided_slice %184 {offsets = [0, 32], sizes = [32, 32], strides = [1, 1]} : vector<32x64xf32> to vector<32x32xf32>
    %c960 = arith.constant 960 : index
    %c0_70 = arith.constant 0 : index
    %187 = vector.load %arg1[%c960, %c0_70] : memref<1384x256xf32, #tpu.memory_space<vmem>>, vector<4x32xf32>
    %c968 = arith.constant 968 : index
    %c0_71 = arith.constant 0 : index
    %188 = vector.load %arg1[%c968, %c0_71] : memref<1384x256xf32, #tpu.memory_space<vmem>>, vector<1x32xf32>
    %189 = vector.extract_strided_slice %187 {offsets = [3, 0], sizes = [1, 32], strides = [1, 1]} : vector<4x32xf32> to vector<1x32xf32>
    %190 = vector.broadcast %189 : vector<1x32xf32> to vector<32x32xf32>
    %191 = arith.mulf %185, %190 : vector<32x32xf32>
    %192 = vector.broadcast %188 : vector<1x32xf32> to vector<32x32xf32>
    %193 = arith.addf %192, %191 : vector<32x32xf32>
    %c0_72 = arith.constant 0 : index
    %c0_73 = arith.constant 0 : index
    %194 = vector.load %arg1[%c0_72, %c0_73] : memref<1384x256xf32, #tpu.memory_space<vmem>>, vector<32x32xf32>
    %cst_74 = arith.constant dense<0.000000e+00> : vector<32x32xf32>
    %195 = tpu.matmul %194, %185, %cst_74 {dimension_numbers = #tpu.dot_dimension_numbers<[1], [0], [0], [1], [0, 0, 1, 1], [], []>} : vector<32x32xf32>, vector<32x32xf32>, vector<32x32xf32> -> vector<32x32xf32>
    %196 = vector.extract_strided_slice %187 {offsets = [2, 0], sizes = [1, 32], strides = [1, 1]} : vector<4x32xf32> to vector<1x32xf32>
    %197 = vector.broadcast %196 : vector<1x32xf32> to vector<32x32xf32>
    %198 = arith.mulf %195, %197 : vector<32x32xf32>
    %199 = arith.addf %193, %198 : vector<32x32xf32>
    %c32_75 = arith.constant 32 : index
    %c0_76 = arith.constant 0 : index
    %200 = vector.load %arg1[%c32_75, %c0_76] : memref<1384x256xf32, #tpu.memory_space<vmem>>, vector<32x32xf32>
    %cst_77 = arith.constant dense<0.000000e+00> : vector<32x32xf32>
    %201 = tpu.matmul %200, %185, %cst_77 {dimension_numbers = #tpu.dot_dimension_numbers<[1], [0], [0], [1], [0, 0, 1, 1], [], []>} : vector<32x32xf32>, vector<32x32xf32>, vector<32x32xf32> -> vector<32x32xf32>
    %202 = vector.extract_strided_slice %187 {offsets = [1, 0], sizes = [1, 32], strides = [1, 1]} : vector<4x32xf32> to vector<1x32xf32>
    %203 = vector.broadcast %202 : vector<1x32xf32> to vector<32x32xf32>
    %204 = arith.mulf %201, %203 : vector<32x32xf32>
    %205 = arith.addf %199, %204 : vector<32x32xf32>
    %c64_78 = arith.constant 64 : index
    %c0_79 = arith.constant 0 : index
    %206 = vector.load %arg1[%c64_78, %c0_79] : memref<1384x256xf32, #tpu.memory_space<vmem>>, vector<32x32xf32>
    %cst_80 = arith.constant dense<0.000000e+00> : vector<32x32xf32>
    %207 = tpu.matmul %206, %185, %cst_80 {dimension_numbers = #tpu.dot_dimension_numbers<[1], [0], [0], [1], [0, 0, 1, 1], [], []>} : vector<32x32xf32>, vector<32x32xf32>, vector<32x32xf32> -> vector<32x32xf32>
    %208 = vector.extract_strided_slice %187 {offsets = [0, 0], sizes = [1, 32], strides = [1, 1]} : vector<4x32xf32> to vector<1x32xf32>
    %209 = vector.broadcast %208 : vector<1x32xf32> to vector<32x32xf32>
    %210 = arith.mulf %207, %209 : vector<32x32xf32>
    %211 = arith.addf %205, %210 : vector<32x32xf32>
    %212 = arith.negf %211 : vector<32x32xf32>
    %213 = math.exp %212 : vector<32x32xf32>
    %cst_81 = arith.constant 1.000000e+00 : f32
    %214 = vector.broadcast %cst_81 : f32 to vector<32x32xf32>
    %215 = arith.addf %214, %213 : vector<32x32xf32>
    %216 = arith.divf %214, %215 : vector<32x32xf32>
    %217 = arith.mulf %211, %216 : vector<32x32xf32>
    %c976 = arith.constant 976 : index
    %c0_82 = arith.constant 0 : index
    %218 = vector.load %arg1[%c976, %c0_82] : memref<1384x256xf32, #tpu.memory_space<vmem>>, vector<32x40xf32>
    %cst_83 = arith.constant dense<0.000000e+00> : vector<32x40xf32>
    %219 = tpu.matmul %217, %218, %cst_83 {dimension_numbers = #tpu.dot_dimension_numbers<[1], [0], [0], [1], [0, 0, 1, 1], [], []>} : vector<32x32xf32>, vector<32x40xf32>, vector<32x40xf32> -> vector<32x40xf32>
    %220 = vector.extract_strided_slice %219 {offsets = [0, 0], sizes = [32, 16], strides = [1, 1]} : vector<32x40xf32> to vector<32x16xf32>
    %221 = vector.extract_strided_slice %219 {offsets = [0, 16], sizes = [32, 16], strides = [1, 1]} : vector<32x40xf32> to vector<32x16xf32>
    %222 = vector.extract_strided_slice %219 {offsets = [0, 32], sizes = [32, 8], strides = [1, 1]} : vector<32x40xf32> to vector<32x8xf32>
    %c1008 = arith.constant 1008 : index
    %c0_84 = arith.constant 0 : index
    %223 = vector.load %arg1[%c1008, %c0_84] : memref<1384x256xf32, #tpu.memory_space<vmem>>, vector<8x32xf32>
    %cst_85 = arith.constant dense<0.000000e+00> : vector<32x32xf32>
    %224 = tpu.matmul %222, %223, %cst_85 {dimension_numbers = #tpu.dot_dimension_numbers<[1], [0], [0], [1], [0, 0, 1, 1], [], []>} : vector<32x8xf32>, vector<8x32xf32>, vector<32x32xf32> -> vector<32x32xf32>
    %c1016 = arith.constant 1016 : index
    %c0_86 = arith.constant 0 : index
    %225 = vector.load %arg1[%c1016, %c0_86] : memref<1384x256xf32, #tpu.memory_space<vmem>>, vector<1x32xf32>
    %226 = vector.broadcast %225 : vector<1x32xf32> to vector<32x32xf32>
    %227 = arith.addf %224, %226 : vector<32x32xf32>
    %cst_87 = arith.constant 0.000000e+00 : f32
    %228 = vector.broadcast %cst_87 : f32 to vector<32x32xf32>
    %229 = arith.maximumf %227, %228 : vector<32x32xf32>
    %230 = vector.broadcast %cst_87 : f32 to vector<32x32xf32>
    %231 = arith.subf %227, %230 : vector<32x32xf32>
    %232 = arith.cmpf one, %231, %231 : vector<32x32xf32>
    %233 = vector.broadcast %cst_87 : f32 to vector<32x32xf32>
    %234 = arith.addf %227, %233 : vector<32x32xf32>
    %235 = math.absf %231 : vector<32x32xf32>
    %cst_88 = arith.constant 0.000000e+00 : f32
    %236 = vector.broadcast %cst_88 : f32 to vector<32x32xf32>
    %237 = arith.subf %236, %235 : vector<32x32xf32>
    %238 = math.exp %237 : vector<32x32xf32>
    %239 = math.log1p %238 : vector<32x32xf32>
    %240 = arith.addf %229, %239 : vector<32x32xf32>
    %241 = arith.select %232, %234, %240 : vector<32x32xi1>, vector<32x32xf32>
    %c1096 = arith.constant 1096 : index
    %c0_89 = arith.constant 0 : index
    %242 = vector.load %arg1[%c1096, %c0_89] : memref<1384x256xf32, #tpu.memory_space<vmem>>, vector<32x256xf32>
    %c1080 = arith.constant 1080 : index
    %c0_90 = arith.constant 0 : index
    %243 = vector.load %arg1[%c1080, %c0_90] : memref<1384x256xf32, #tpu.memory_space<vmem>>, vector<16x256xf32>
    %cst_91 = arith.constant dense<0.000000e+00> : vector<32x256xf32>
    %244 = tpu.matmul %241, %242, %cst_91 {dimension_numbers = #tpu.dot_dimension_numbers<[1], [0], [0], [1], [0, 0, 1, 1], [], []>} : vector<32x32xf32>, vector<32x256xf32>, vector<32x256xf32> -> vector<32x256xf32>
    %c1024 = arith.constant 1024 : index
    %c0_92 = arith.constant 0 : index
    %245 = vector.load %arg1[%c1024, %c0_92] : memref<1384x256xf32, #tpu.memory_space<vmem>>, vector<1x256xf32>
    %246 = vector.broadcast %245 : vector<1x256xf32> to vector<32x256xf32>
    %247 = arith.mulf %244, %246 : vector<32x256xf32>
    %248 = math.exp %247 : vector<32x256xf32>
    %cst_93 = arith.constant dense<0.000000e+00> : vector<32x256xf32>
    %249 = tpu.matmul %220, %243, %cst_93 {dimension_numbers = #tpu.dot_dimension_numbers<[1], [0], [0], [1], [0, 0, 1, 1], [], []>} : vector<32x16xf32>, vector<16x256xf32>, vector<32x256xf32> -> vector<32x256xf32>
    %250 = arith.mulf %241, %217 : vector<32x32xf32>
    %cst_94 = arith.constant dense<0.000000e+00> : vector<32x256xf32>
    %251 = tpu.matmul %250, %242, %cst_94 {dimension_numbers = #tpu.dot_dimension_numbers<[1], [0], [0], [1], [0, 0, 1, 1], [], []>} : vector<32x32xf32>, vector<32x256xf32>, vector<32x256xf32> -> vector<32x256xf32>
    %252 = arith.mulf %249, %251 : vector<32x256xf32>
    %c160_95 = arith.constant 160 : index
    %c0_96 = arith.constant 0 : index
    %253 = vector.load %arg1[%c160_95, %c0_96] : memref<1384x256xf32, #tpu.memory_space<vmem>>, vector<32x4xf32>
    %c0_97 = arith.constant 0 : index
    %c0_98 = arith.constant 0 : index
    %254 = vector.load %arg1[%c0_97, %c0_98] : memref<1384x256xf32, #tpu.memory_space<vmem>>, vector<32x32xf32>
    %cst_99 = arith.constant dense<0.000000e+00> : vector<32x256xf32>
    %255 = tpu.matmul %254, %248, %cst_99 {dimension_numbers = #tpu.dot_dimension_numbers<[1], [0], [0], [1], [0, 0, 1, 1], [], []>} : vector<32x32xf32>, vector<32x256xf32>, vector<32x256xf32> -> vector<32x256xf32>
    %cst_100 = arith.constant dense<0.000000e+00> : vector<32x256xf32>
    %256 = tpu.matmul %254, %252, %cst_100 {dimension_numbers = #tpu.dot_dimension_numbers<[1], [0], [0], [1], [0, 0, 1, 1], [], []>} : vector<32x32xf32>, vector<32x256xf32>, vector<32x256xf32> -> vector<32x256xf32>
    %257 = vector.extract_strided_slice %253 {offsets = [0, 0], sizes = [32, 1], strides = [1, 1]} : vector<32x4xf32> to vector<32x1xf32>
    %258 = arith.mulf %248, %256 : vector<32x256xf32>
    %259 = arith.addf %252, %258 : vector<32x256xf32>
    %260 = vector.broadcast %257 : vector<32x1xf32> to vector<32x256xf32>
    %261 = arith.addf %255, %260 : vector<32x256xf32>
    %262 = arith.mulf %248, %261 : vector<32x256xf32>
    %c32_101 = arith.constant 32 : index
    %c0_102 = arith.constant 0 : index
    %263 = vector.load %arg1[%c32_101, %c0_102] : memref<1384x256xf32, #tpu.memory_space<vmem>>, vector<32x32xf32>
    %cst_103 = arith.constant dense<0.000000e+00> : vector<32x256xf32>
    %264 = tpu.matmul %263, %262, %cst_103 {dimension_numbers = #tpu.dot_dimension_numbers<[1], [0], [0], [1], [0, 0, 1, 1], [], []>} : vector<32x32xf32>, vector<32x256xf32>, vector<32x256xf32> -> vector<32x256xf32>
    %cst_104 = arith.constant dense<0.000000e+00> : vector<32x256xf32>
    %265 = tpu.matmul %263, %259, %cst_104 {dimension_numbers = #tpu.dot_dimension_numbers<[1], [0], [0], [1], [0, 0, 1, 1], [], []>} : vector<32x32xf32>, vector<32x256xf32>, vector<32x256xf32> -> vector<32x256xf32>
    %266 = vector.extract_strided_slice %253 {offsets = [0, 1], sizes = [32, 1], strides = [1, 1]} : vector<32x4xf32> to vector<32x1xf32>
    %267 = arith.mulf %262, %265 : vector<32x256xf32>
    %268 = arith.addf %259, %267 : vector<32x256xf32>
    %269 = vector.broadcast %266 : vector<32x1xf32> to vector<32x256xf32>
    %270 = arith.addf %264, %269 : vector<32x256xf32>
    %271 = arith.mulf %262, %270 : vector<32x256xf32>
    %c96_105 = arith.constant 96 : index
    %c0_106 = arith.constant 0 : index
    %272 = vector.load %arg1[%c96_105, %c0_106] : memref<1384x256xf32, #tpu.memory_space<vmem>>, vector<32x32xf32>
    %cst_107 = arith.constant dense<0.000000e+00> : vector<32x256xf32>
    %273 = tpu.matmul %272, %271, %cst_107 {dimension_numbers = #tpu.dot_dimension_numbers<[1], [0], [0], [1], [0, 0, 1, 1], [], []>} : vector<32x32xf32>, vector<32x256xf32>, vector<32x256xf32> -> vector<32x256xf32>
    %cst_108 = arith.constant dense<0.000000e+00> : vector<32x256xf32>
    %274 = tpu.matmul %272, %268, %cst_108 {dimension_numbers = #tpu.dot_dimension_numbers<[1], [0], [0], [1], [0, 0, 1, 1], [], []>} : vector<32x32xf32>, vector<32x256xf32>, vector<32x256xf32> -> vector<32x256xf32>
    %275 = vector.extract_strided_slice %253 {offsets = [0, 2], sizes = [32, 1], strides = [1, 1]} : vector<32x4xf32> to vector<32x1xf32>
    %276 = arith.mulf %271, %274 : vector<32x256xf32>
    %277 = arith.addf %268, %276 : vector<32x256xf32>
    %278 = vector.broadcast %275 : vector<32x1xf32> to vector<32x256xf32>
    %279 = arith.addf %273, %278 : vector<32x256xf32>
    %280 = arith.mulf %271, %279 : vector<32x256xf32>
    %c128_109 = arith.constant 128 : index
    %c0_110 = arith.constant 0 : index
    %281 = vector.load %arg1[%c128_109, %c0_110] : memref<1384x256xf32, #tpu.memory_space<vmem>>, vector<32x32xf32>
    %cst_111 = arith.constant dense<0.000000e+00> : vector<32x256xf32>
    %282 = tpu.matmul %281, %277, %cst_111 {dimension_numbers = #tpu.dot_dimension_numbers<[1], [0], [0], [1], [0, 0, 1, 1], [], []>} : vector<32x32xf32>, vector<32x256xf32>, vector<32x256xf32> -> vector<32x256xf32>
    %283 = arith.mulf %280, %282 : vector<32x256xf32>
    %284 = arith.addf %277, %283 : vector<32x256xf32>
    %cst_112 = arith.constant dense<0.000000e+00> : vector<32x256xf32>
    %285 = tpu.matmul %221, %243, %cst_112 {dimension_numbers = #tpu.dot_dimension_numbers<[1], [0], [0], [1], [0, 0, 1, 1], [], []>} : vector<32x16xf32>, vector<16x256xf32>, vector<32x256xf32> -> vector<32x256xf32>
    %286 = arith.mulf %285, %284 : vector<32x256xf32>
    %c1128 = arith.constant 1128 : index
    %c0_113 = arith.constant 0 : index
    %287 = vector.load %arg1[%c1128, %c0_113] : memref<1384x256xf32, #tpu.memory_space<vmem>>, vector<256x32xf32>
    %cst_114 = arith.constant dense<0.000000e+00> : vector<32x32xf32>
    %288 = tpu.matmul %286, %287, %cst_114 {dimension_numbers = #tpu.dot_dimension_numbers<[1], [0], [0], [1], [0, 0, 1, 1], [], []>} : vector<32x256xf32>, vector<256x32xf32>, vector<32x32xf32> -> vector<32x32xf32>
    %c1032 = arith.constant 1032 : index
    %c0_115 = arith.constant 0 : index
    %289 = vector.load %arg1[%c1032, %c0_115] : memref<1384x256xf32, #tpu.memory_space<vmem>>, vector<1x32xf32>
    %290 = vector.broadcast %289 : vector<1x32xf32> to vector<32x32xf32>
    %291 = arith.mulf %290, %217 : vector<32x32xf32>
    %292 = arith.addf %288, %291 : vector<32x32xf32>
    %293 = arith.negf %186 : vector<32x32xf32>
    %294 = math.exp %293 : vector<32x32xf32>
    %cst_116 = arith.constant 1.000000e+00 : f32
    %295 = vector.broadcast %cst_116 : f32 to vector<32x32xf32>
    %296 = arith.addf %295, %294 : vector<32x32xf32>
    %297 = arith.divf %295, %296 : vector<32x32xf32>
    %298 = arith.mulf %186, %297 : vector<32x32xf32>
    %299 = arith.mulf %292, %298 : vector<32x32xf32>
    %c1040 = arith.constant 1040 : index
    %c0_117 = arith.constant 0 : index
    %300 = vector.load %arg1[%c1040, %c0_117] : memref<1384x256xf32, #tpu.memory_space<vmem>>, vector<32x16xf32>
    %cst_118 = arith.constant dense<0.000000e+00> : vector<32x16xf32>
    %301 = tpu.matmul %299, %300, %cst_118 {dimension_numbers = #tpu.dot_dimension_numbers<[1], [0], [0], [1], [0, 0, 1, 1], [], []>} : vector<32x32xf32>, vector<32x16xf32>, vector<32x16xf32> -> vector<32x16xf32>
    %c1072 = arith.constant 1072 : index
    %c0_119 = arith.constant 0 : index
    %302 = vector.load %arg1[%c1072, %c0_119] : memref<1384x256xf32, #tpu.memory_space<vmem>>, vector<1x16xf32>
    %303 = vector.broadcast %302 : vector<1x16xf32> to vector<32x16xf32>
    %304 = arith.addf %301, %303 : vector<32x16xf32>
    %c320 = arith.constant 320 : index
    %c0_120 = arith.constant 0 : index
    %305 = vector.load %arg1[%c320, %c0_120] : memref<1384x256xf32, #tpu.memory_space<vmem>>, vector<32x16xf32>
    %306 = arith.mulf %304, %305 : vector<32x16xf32>
    %307 = math.tanh %306 : vector<32x16xf32>
    %c352 = arith.constant 352 : index
    %c0_121 = arith.constant 0 : index
    %308 = vector.load %arg1[%c352, %c0_121] : memref<1384x256xf32, #tpu.memory_space<vmem>>, vector<32x16xf32>
    %309 = arith.mulf %307, %308 : vector<32x16xf32>
    %c384 = arith.constant 384 : index
    %c0_122 = arith.constant 0 : index
    %310 = vector.load %arg1[%c384, %c0_122] : memref<1384x256xf32, #tpu.memory_space<vmem>>, vector<32x16xf32>
    %311 = arith.addf %309, %310 : vector<32x16xf32>
    %312 = vector.extract_strided_slice %311 {offsets = [0, 0], sizes = [32, 8], strides = [1, 1]} : vector<32x16xf32> to vector<32x8xf32>
    %313 = arith.mulf %312, %11 : vector<32x8xf32>
    %314 = vector.extract_strided_slice %311 {offsets = [0, 8], sizes = [32, 8], strides = [1, 1]} : vector<32x16xf32> to vector<32x8xf32>
    %315 = arith.mulf %314, %20 : vector<32x8xf32>
    %c192 = arith.constant 192 : index
    %c0_123 = arith.constant 0 : index
    %316 = vector.load %arg1[%c192, %c0_123] : memref<1384x256xf32, #tpu.memory_space<vmem>>, vector<32x32xf32>
    %cst_124 = arith.constant dense<0.000000e+00> : vector<32x8xf32>
    %317 = tpu.matmul %316, %315, %cst_124 {dimension_numbers = #tpu.dot_dimension_numbers<[1], [0], [0], [1], [0, 0, 1, 1], [], []>} : vector<32x32xf32>, vector<32x8xf32>, vector<32x8xf32> -> vector<32x8xf32>
    %318 = arith.addf %313, %317 : vector<32x8xf32>
    %c416 = arith.constant 416 : index
    %c0_125 = arith.constant 0 : index
    %319 = vector.load %arg1[%c416, %c0_125] : memref<1384x256xf32, #tpu.memory_space<vmem>>, vector<8x128xf32>
    %cst_126 = arith.constant dense<0.000000e+00> : vector<32x128xf32>
    %320 = tpu.matmul %318, %319, %cst_126 {dimension_numbers = #tpu.dot_dimension_numbers<[1], [0], [0], [1], [0, 0, 1, 1], [], []>} : vector<32x8xf32>, vector<8x128xf32>, vector<32x128xf32> -> vector<32x128xf32>
    %c0_127 = arith.constant 0 : index
    %c0_128 = arith.constant 0 : index
    %321 = vector.load %arg2[%c0_127, %c0_128] : memref<32x128xf32, #tpu.memory_space<vmem>>, vector<32x128xf32>
    tpu.vector_store %arg2[%c0_127, %c0_128], %320 {strides = array<i32>} : memref<32x128xf32, #tpu.memory_space<vmem>>, vector<32x128xf32>,
    return
  }
}

</mosaic_0001>

<bundles_post_ra>
// kernel: mamba_latent_bimap.1
= control target key start
LH: loop header
LB: loop body
LE: loop exit
PB: predicated region body
PF: predicated region fallthrough
CT: control target
= control target key end

     0   :  { %7 = vsyncpa [#allocation3], 0  ;;  %s6485_s9 = smov [#allocation2]   ;;  %s7864_s0 = inlined_call_operand.vmem [shape: f32[32,16], index: 0, kind: input, shape index: {}]   ;;  %s7865_s1 = inlined_call_operand.hbm [shape: f32[1384,256], index: 1, kind: input, shape index: {}]   ;;  %s7866_s2 = inlined_call_operand.vmem [shape: f32[32,128], index: 2, kind: output, shape index: {}]  }
   0x1   :  { %s15_s10 = sshll.u32 %s6485_s9, 4  ;;  %s16_s10 = int_to_ptr.vmem [resolvable:$true] %s15_s10 }
   0x2   :  { %s6471_s11 = scalar_lea.vmem %s16_s10, 44288  ;;  %p6476_p1 = scmp.lt.s32.totalorder %s16_s10, %s16_s10 }
   0x3   :  { %p6472_p0 = scmp.ne.s32.totalorder %s16_s10, %s6471_s11  ;;  %p6477_p2 = scmp.lt.s32.totalorder %s6471_s11, %s6471_s11 }
   0x5   :  { %p6478_p3 = por %p6477_p2, %p6476_p1 }
   0x7   :  { %p6479_p4 = pnand %p6478_p3, %p6472_p0 }
   0x9   :  { %6482 = shalt.err (!%p6479_p4)
}
   0xa   :  { %s6486_s12 = smov 256   ;;  %s6487_s13 = smov 16  }
   0xb   :  { %21 = dma.hbm_to_vmem [thread:$0]  %s7865_s1, 44288, %s16_s10, [#allocation3], %s6486_s12, %s6486_s12, %s6487_s13  }
   0xc   :  { %6483 = dma.done.wait [#allocation3], 44288  }
   0xd   :  { %6484 = vsyncadd [#allocation3], 4294923008  ;;  %v6517_v0 = vld [vmem:[%s7864_s0 + $0x18] sm:$0xff]  ;;  %v6522_v1 = vld [vmem:[%s7864_s0 + $0x10] sm:$0xff]  ;;  %vm37_vm0 = vcmask 261120   ;;  %vm302_vm1 = vcmask 130048  }
   0xe   :  { %5967 = vmatprep.subr.mxu0 %v6517_v0  ;;  %5981 = vmatprep.subr.mxu1 %v6517_v0  ;;  %v6531_v2 = vld [vmem:[%s7864_s0 + $0x8] sm:$0xff]  ;;  %v6540_v3 = vld [vmem:[%s7864_s0] sm:$0xff]  ;;  %v34_v6 = vld [vmem:[#allocation2 + $0x1d0] sm:$0xff]  ;;  %v402_v16 = vmul.f32 %v6522_v1, %v6522_v1  ;;  %v403_v17 = vmul.f32 %v6517_v0, %v6517_v0  ;;  %s6490_s0 = smov 96   ;;  %s6492_s23 = smov 112   ;;  %vm1131_vm2 = vcmask 64512  }
   0xf   :  { %5968 = vmatpush3.msra.mxu0 %v6517_v0  ;;  %5982 = vmatpush3.msra.mxu1 %v6517_v0  ;;  %v33_v4 = vld [vmem:[#allocation2 + $0x1c0] sm:$0xff]  ;;  %v160_v7 = vld [vmem:[#allocation2 + $0x210] sm:$0xff]  ;;  %v400_v14 = vmul.f32 %v6540_v3, %v6540_v3  ;;  %v401_v15 = vmul.f32 %v6531_v2, %v6531_v2  ;;  %s6494_s24 = smov 120   ;;  %s6495_s25 = smov 8  }
  0x10   :  { %5969 = vmatprep.subr.mxu0 %v6522_v1  ;;  %5983 = vmatprep.subr.mxu1 %v6522_v1  ;;  %v159_v5 = vld [vmem:[#allocation2 + $0x200] sm:$0xff]  ;;  %v36_v11 = vld [vmem:[#allocation2 + $0x1f0] sm:$0xff] }
  0x11   :  { %5970 = vmatpush3.msra.mxu0 %v6522_v1  ;;  %5984 = vmatpush3.msra.mxu1 %v6522_v1  ;;  %v35_v8 = vld [vmem:[#allocation2 + $0x1e0] sm:$0xff]  ;;  %v162_v12 = vld [vmem:[#allocation2 + $0x230] sm:$0xff] }
  0x12   :  { %5971 = vmatprep.subr.mxu0 %v6531_v2  ;;  %5985 = vmatprep.subr.mxu1 %v6531_v2  ;;  %v161_v9 = vld [vmem:[#allocation2 + $0x220] sm:$0xff]  ;;  %v300_v13 = vld [vmem:[#allocation2 + $0x350] sm:$0xff] }
  0x13   :  { %5972 = vmatpush3.msra.mxu0 %v6531_v2  ;;  %5986 = vmatpush3.msra.mxu1 %v6531_v2  ;;  %v301_v10 = vld [vmem:[#allocation2 + $0x360] sm:$0xff]  ;;  %v535_v19 = vld [vmem:[#allocation2 + $0x390] sm:$0xff] }
  0x14   :  { %5973 = vmatprep.subr.mxu0 %v6540_v3  ;;  %5987 = vmatprep.subr.mxu1 %v6540_v3  ;;  %v536_v18 = vld [vmem:[#allocation2 + $0x3a0] sm:$0xff]  ;;  %v525_v52 = vld [vmem:[#allocation2 + $0x370] ss:$0 sm:$0xff] }
  0x15   :  { %5974 = vmatpush3.msra.mxu0 %v6540_v3  ;;  %5975 = vmatprep.mubr.msk.f32.mxu0 %vm37_vm0, %v33_v4  ;;  %v530_v59 = vld [vmem:[#allocation2 + $0x380] ss:$0 sm:$0xff] }
  0x16   :  { %5988 = vmatpush3.msra.mxu1 %v6540_v3  ;;  %5989 = vmatprep.mubr.msk.f32.mxu1 %vm37_vm0, %v159_v5 }
  0x17   :  { %5976 = vmatmul.mubr.msk.f32.vlgmr.msra.gmra.mxu0 %vm37_vm0, %v34_v6  ;;  %5990 = vmatmul.mubr.msk.f32.vlgmr.msra.gmra.mxu1 %vm37_vm0, %v160_v7  ;;  %v6602_v7 = vld [vmem:[#allocation2] sm:$0xff] }
  0x18   :  { %5978 = vmatprep.mubr.msk.f32.mxu0 %vm37_vm0, %v35_v8  ;;  %5992 = vmatprep.mubr.msk.f32.mxu1 %vm37_vm0, %v161_v9 }
  0x19   :  { %5995 = vmatprep.subr.mxu0 %v301_v10  ;;  %6005 = vmatprep.subr.mxu1 %v301_v10 }
  0x1a   :  { %5996 = vmatpush3.msra.mxu0 %v301_v10  ;;  %6006 = vmatpush3.msra.mxu1 %v301_v10  ;;  %v537_v10 = vld [vmem:[#allocation2 + $0x3b0] ss:$0 sm:$0xff] }
  0x1b   :  { %5979 = vmatmul.mubr.msk.f32.gmra.mxu0 %vm37_vm0, %v36_v11  ;;  %5993 = vmatmul.mubr.msk.f32.gmra.mxu1 %vm37_vm0, %v162_v12 }
  0x1c   :  { %5997 = vmatprep.subr.mxu0 %v300_v13  ;;  %6007 = vmatprep.subr.mxu1 %v300_v13 }
  0x1d   :  { %5998 = vmatpush3.msra.mxu0 %v300_v13  ;;  %5999 = vmatprep.mubr.msk.f32.mxu0 %vm302_vm1, %v6540_v3 }
  0x1e   :  { %6008 = vmatpush3.msra.mxu1 %v300_v13  ;;  %6009 = vmatprep.mubr.msk.f32.mxu1 %vm302_vm1, %v400_v14 }
  0x1f   :  { %6000 = vmatmul.mubr.msk.f32.vlgmr.msra.gmra.mxu0 %vm302_vm1, %v6531_v2  ;;  %6010 = vmatmul.mubr.msk.f32.vlgmr.msra.gmra.mxu1 %vm302_vm1, %v401_v15 }
  0x20   :  { %6002 = vmatprep.mubr.msk.f32.mxu0 %vm302_vm1, %v6522_v1  ;;  %6012 = vmatprep.mubr.msk.f32.mxu1 %vm302_vm1, %v402_v16 }
  0x21   :  { %6015 = vmatprep.subr.mxu0 %v536_v18 }
  0x22   :  { %6016 = vmatpush3.msra.mxu0 %v536_v18  ;;  %v763_v18 = vld [vmem:[#allocation2 + $0x50] sm:$0xff] }
  0x23   :  { %6003 = vmatmul.mubr.msk.f32.gmra.mxu0 %vm302_vm1, %v6517_v0  ;;  %6013 = vmatmul.mubr.msk.f32.gmra.mxu1 %vm302_vm1, %v403_v17  ;;  %v6627_v17 = vld [vmem:[#allocation2 + $0x10] sm:$0xff] }
  0x24   :  { %6017 = vmatprep.subr.mxu0 %v535_v19  ;;  %6033 = vmatprep.mubr.msk.f32.mxu1 %vm37_vm0, %v6602_v7 }
  0x25   :  { %6018 = vmatpush3.msra.mxu0 %v535_v19  ;;  %v6633_v19 = vld [vmem:[#allocation2 + $0x20] sm:$0xff] }
  0xd7   :  { %v6578_v20 = vpop.f32.mrf.mxu0  ;;  %v6580_v21 = vpop.f32.mrf.mxu1 }
  0xd8   :  { %7882 = vst [vmem:[#allocation5_spill] sm:$0xff] %v6578_v20 }
  0xd9   :  { %v6582_v22 = vpop.f32.mrf.mxu0  ;;  %v6584_v23 = vpop.f32.mrf.mxu1 }
  0xda   :  { %7883 = vst [vmem:[#allocation6_spill] sm:$0xff] %v6582_v22 }
  0xdb   :  { %v6586_v24 = vpop.f32.mrf.mxu0  ;;  %v6588_v25 = vpop.f32.mrf.mxu1 }
  0xdc   :  { %7884 = vst [vmem:[#allocation7_spill] sm:$0xff] %v6586_v24 }
  0xdd   :  { %v6590_v26 = vpop.f32.mrf.mxu0  ;;  %v6592_v27 = vpop.f32.mrf.mxu1 }
  0xde   :  { %7885 = vst [vmem:[#allocation8_spill] sm:$0xff] %v6590_v26 }
  0xdf   :  { %v6001_v28 = vpop.f32.mrf.mxu0  ;;  %v6011_v29 = vpop.f32.mrf.mxu1 }
  0xe0   :  { %v502_v30 = vmul.f32 %v6001_v28, %v6001_v28  ;;  %v510_v48 = vsub.f32 %v6531_v2, %v6001_v28  ;;  %v764_v28 = vld [vmem:[#allocation2 + $0x60] sm:$0xff] }
  0xe1   :  { %v381_v31 = vpop.f32.mrf.mxu0  ;;  %v482_v32 = vpop.f32.mrf.mxu1 }
  0xe2   :  { %v506_v33 = vsub.f32 %v6011_v29, %v502_v30  ;;  %v501_v34 = vmul.f32 %v381_v31, %v381_v31  ;;  %v509_v51 = vsub.f32 %v6540_v3, %v381_v31  ;;  %v6640_v29 = vld [vmem:[#allocation2 + $0x30] sm:$0xff]  ;;  %v875_v31 = vld [vmem:[#allocation2 + $0x80] sm:$0xff] }
  0xe3   :  { %v6004_v35 = vpop.f32.mrf.mxu0  ;;  %v6014_v36 = vpop.f32.mrf.mxu1  ;;  %v765_v30 = vld [vmem:[#allocation2 + $0x70] sm:$0xff] }
  0xe4   :  { %v514_v37 = vadd.f32 1e-05, %v506_v33  ;;  %v505_v38 = vsub.f32 %v482_v32, %v501_v34  ;;  %v504_v39 = vmul.f32 %v6004_v35, %v6004_v35  ;;  %v512_v54 = vsub.f32 %v6517_v0, %v6004_v35  ;;  %v876_v32 = vld [vmem:[#allocation2 + $0x90] sm:$0xff]  ;;  %v877_v33 = vld [vmem:[#allocation2 + $0xa0] sm:$0xff] }
  0xe5   :  { %v391_v40 = vpop.f32.mrf.mxu0  ;;  %v492_v44 = vpop.f32.mrf.mxu1  ;;  %v878_v34 = vld [vmem:[#allocation2 + $0xb0] sm:$0xff] }
  0xe6   :  { %6250 = vrsqrt.f32 %v514_v37  ;;  %v513_v41 = vadd.f32 1e-05, %v505_v38  ;;  %v508_v42 = vsub.f32 %v6014_v36, %v504_v39  ;;  %v503_v43 = vmul.f32 %v391_v40, %v391_v40  ;;  %v1019_v35 = vld [vmem:[#allocation2 + $0x410] sm:$0xff]  ;;  %v1018_v36 = vld [vmem:[#allocation2 + $0x400] sm:$0xff] }
  0xe7   :  { %v511_v61 = vsub.f32 %v6522_v1, %v391_v40  ;;  %v762_v1 = vld [vmem:[#allocation2 + $0x40] sm:$0xff]  ;;  %v1017_v37 = vld [vmem:[#allocation2 + $0x3f0] sm:$0xff]  ;;  %v637_v39 = vlaneseq }
  0xe8   :  { %6252 = vrsqrt.f32 %v513_v41  ;;  %v516_v45 = vadd.f32 1e-05, %v508_v42  ;;  %v507_v46 = vsub.f32 %v492_v44, %v503_v43  ;;  %v1016_v38 = vld [vmem:[#allocation2 + $0x3e0] sm:$0xff] }
  0xe9   :  { %v6658_v40 = vshrl.u32 %v637_v39, 7  ;;  %v635_v42 = vld [vmem:[#allocation2 + $0x3c0] sm:$0xf] }
  0xea   :  { %6254 = vrsqrt.f32 %v516_v45  ;;  %v515_v47 = vadd.f32 1e-05, %v507_v46 }
  0xeb   :  { %v7868_v41 = vsub.s32 3, %v6658_v40  ;;  %v7867_v43 = vsub.s32 2, %v6658_v40  ;;  %v6667_v46 = vsub.s32 1, %v6658_v40 }
  0xec   :  { %6256 = vrsqrt.f32 %v515_v47 }
  0xed   :  { %v640_v44 = vrot.slane %v635_v42, %v7868_v41  ;;  %v753_v45 = vrot.slane %v635_v42, %v7867_v43 }
  0xf3   :  { %v6251_v49 = vpop.eup %6250 }
  0xf4   :  { %v522_v50 = vmul.f32 %v6251_v49, %v510_v48  ;;  %v636_v48 = vld [vmem:[#allocation2 + $0x3d0] ss:$0 sm:$0xff] }
  0xf5   :  { %v6253_v53 = vpop.eup %6252 }
  0xf6   :  { %v521_v55 = vmul.f32 %v6253_v53, %v509_v51  ;;  %v527_v57 = vmul.f32 %v525_v52, %v522_v50  ;;  %v866_v53 = vrot.slane %v635_v42, %v6667_v46 }
  0xf7   :  { %v6255_v56 = vpop.eup %6254 }
  0xf8   :  { %v526_v58 = vmul.f32 %v525_v52, %v521_v55  ;;  %v524_v60 = vmul.f32 %v6255_v56, %v512_v54  ;;  %v532_v4 = vadd.f32 %v530_v59, %v527_v57  ;;  %v6673_v54 = vsub.s32 0, %v6658_v40 }
  0xf9   :  { %v6257_v62 = vpop.eup %6256 }
  0xfa   :  { %v531_v63 = vadd.f32 %v530_v59, %v526_v58  ;;  %v523_v2 = vmul.f32 %v6257_v62, %v511_v61  ;;  %v529_v5 = vmul.f32 %v525_v52, %v524_v60 }
  0xfc   :  { %6019 = vmatprep.mubr.msk.f32.mxu0 %vm302_vm1, %v531_v63  ;;  %v528_v3 = vmul.f32 %v525_v52, %v523_v2  ;;  %v534_v0 = vadd.f32 %v530_v59, %v529_v5 }
  0xfd   :  { %6020 = vmatmul.mubr.msk.f32.vlgmr.msra.gmra.mxu0 %vm302_vm1, %v532_v4 }
  0xfe   :  { %v533_v6 = vadd.f32 %v530_v59, %v528_v3  ;;  %v979_v3 = vrot.slane %v635_v42, %v6673_v54 }
 0x100   :  { %6022 = vmatprep.mubr.msk.f32.mxu0 %vm302_vm1, %v533_v6 }
 0x101   :  { %6023 = vmatmul.mubr.msk.f32.gmra.mxu0 %vm302_vm1, %v534_v0 }
 0x102   :  { %6047 = vmatprep.mubr.msk.f32.mxu0 %vm37_vm0, %v762_v1 }
 0x1bd   :  { %v6021_v8 = vpop.f32.mrf.mxu0 }
 0x1be   :  { %v6615_v15 = vadd.f32 %v6021_v8, %v537_v10 }
 0x1bf   :  { %v616_v9 = vpop.f32.mrf.mxu0 }
 0x1c0   :  { %v6621_v16 = vadd.f32 %v616_v9, %v537_v10  ;;  %v642_v47 = vmul.f32 %v640_v44, %v6615_v15 }
 0x1c1   :  { %v6024_v11 = vpop.f32.mrf.mxu0 }
 0x1c2   :  { %v6607_v12 = vadd.f32 %v6024_v11, %v537_v10  ;;  %v641_v50 = vmul.f32 %v640_v44, %v6621_v16  ;;  %v646_v56 = vadd.f32 %v642_v47, %v636_v48 }
 0x1c3   :  { %v626_v13 = vpop.f32.mrf.mxu0 }
 0x1c4   :  { %v6609_v14 = vadd.f32 %v626_v13, %v537_v10  ;;  %6025 = vmatprep.subr.mxu1 %v6607_v12  ;;  %6039 = vmatprep.subr.mxu0 %v6607_v12  ;;  %v644_v58 = vmul.f32 %v640_v44, %v6607_v12  ;;  %v645_v60 = vadd.f32 %v641_v50, %v636_v48 }
 0x1c5   :  { %6026 = vmatpush3.msra.mxu1 %v6607_v12  ;;  %6040 = vmatpush3.msra.mxu0 %v6607_v12 }
 0x1c6   :  { %6027 = vmatprep.subr.mxu1 %v6609_v14  ;;  %6041 = vmatprep.subr.mxu0 %v6609_v14  ;;  %v643_v62 = vmul.f32 %v640_v44, %v6609_v14  ;;  %v648_v1 = vadd.f32 %v644_v58, %v636_v48 }
 0x1c7   :  { %6028 = vmatpush3.msra.mxu1 %v6609_v14  ;;  %6042 = vmatpush3.msra.mxu0 %v6609_v14 }
 0x1c8   :  { %6029 = vmatprep.subr.mxu1 %v6615_v15  ;;  %6043 = vmatprep.subr.mxu0 %v6615_v15  ;;  %v647_v11 = vadd.f32 %v643_v62, %v636_v48 }
 0x1c9   :  { %6030 = vmatpush3.msra.mxu1 %v6615_v15  ;;  %6044 = vmatpush3.msra.mxu0 %v6615_v15 }
 0x1ca   :  { %6031 = vmatprep.subr.mxu1 %v6621_v16  ;;  %6045 = vmatprep.subr.mxu0 %v6621_v16 }
 0x1cb   :  { %6032 = vmatpush3.msra.mxu1 %v6621_v16  ;;  %6046 = vmatpush3.msra.mxu0 %v6621_v16 }
 0x1cc   :  { %6034 = vmatmul.mubr.msk.f32.vlgmr.msra.gmra.mxu1 %vm37_vm0, %v6627_v17  ;;  %6053 = vmatprep.subr.mxu1 %v6607_v12 }
 0x1cd   :  { %6054 = vmatpush3.msra.mxu1 %v6607_v12  ;;  %6048 = vmatmul.mubr.msk.f32.vlgmr.msra.gmra.mxu0 %vm37_vm0, %v763_v18 }
 0x1ce   :  { %6055 = vmatprep.subr.mxu1 %v6609_v14  ;;  %6036 = vmatprep.mubr.msk.f32.mxu1 %vm37_vm0, %v6633_v19 }
 0x1cf   :  { %6056 = vmatpush3.msra.mxu1 %v6609_v14  ;;  %6050 = vmatprep.mubr.msk.f32.mxu0 %vm37_vm0, %v764_v28 }
 0x1d0   :  { %6037 = vmatmul.mubr.msk.f32.gmra.mxu1 %vm37_vm0, %v6640_v29  ;;  %6057 = vmatprep.subr.mxu1 %v6615_v15 }
 0x1d1   :  { %6058 = vmatpush3.msra.mxu1 %v6615_v15  ;;  %6051 = vmatmul.mubr.msk.f32.gmra.mxu0 %vm37_vm0, %v765_v30 }
 0x1d2   :  { %6059 = vmatprep.subr.mxu1 %v6621_v16  ;;  %6061 = vmatprep.mubr.msk.f32.mxu1 %vm37_vm0, %v875_v31 }
 0x1d3   :  { %6060 = vmatpush3.msra.mxu1 %v6621_v16  ;;  %6067 = vmatprep.subr.mxu0 %v1019_v35 }
 0x1d4   :  { %6062 = vmatmul.mubr.msk.f32.vlgmr.msra.gmra.mxu1 %vm37_vm0, %v876_v32  ;;  %6068 = vmatpush3.msra.mxu0 %v1019_v35 }
 0x1d5   :  { %6064 = vmatprep.mubr.msk.f32.mxu1 %vm37_vm0, %v877_v33  ;;  %6069 = vmatprep.subr.mxu0 %v1018_v36 }
 0x1d6   :  { %6070 = vmatpush3.msra.mxu0 %v1018_v36 }
 0x1d7   :  { %6071 = vmatprep.subr.mxu0 %v1017_v37 }
 0x1d8   :  { %6065 = vmatmul.mubr.msk.f32.gmra.mxu1 %vm37_vm0, %v878_v34  ;;  %6072 = vmatpush3.msra.mxu0 %v1017_v37 }
 0x1d9   :  { %6073 = vmatprep.subr.mxu0 %v1016_v38 }
 0x1da   :  { %6074 = vmatpush3.msra.mxu0 %v1016_v38 }
 0x28c   :  { %v6035_v49 = vpop.f32.mrf.mxu1 }
 0x28d   :  { %v755_v51 = vmul.f32 %v6035_v49, %v753_v45  ;;  %v6049_v52 = vpop.f32.mrf.mxu0 }
 0x28e   :  { %v731_v55 = vpop.f32.mrf.mxu1  ;;  %v868_v4 = vmul.f32 %v6049_v52, %v866_v53 }
 0x28f   :  { %v754_v57 = vmul.f32 %v753_v45, %v731_v55  ;;  %v844_v59 = vpop.f32.mrf.mxu0  ;;  %v759_v63 = vadd.f32 %v755_v51, %v646_v56 }
 0x290   :  { %v6038_v61 = vpop.f32.mrf.mxu1  ;;  %v867_v8 = vmul.f32 %v866_v53, %v844_v59 }
 0x291   :  { %v757_v2 = vmul.f32 %v6038_v61, %v753_v45  ;;  %v6052_v5 = vpop.f32.mrf.mxu0  ;;  %v758_v0 = vadd.f32 %v754_v57, %v645_v60  ;;  %v872_v18 = vadd.f32 %v868_v4, %v759_v63 }
 0x292   :  { %v741_v6 = vpop.f32.mrf.mxu1  ;;  %v870_v30 = vmul.f32 %v6052_v5, %v866_v53 }
 0x293   :  { %v756_v9 = vmul.f32 %v753_v45, %v741_v6  ;;  %v854_v10 = vpop.f32.mrf.mxu0  ;;  %v761_v28 = vadd.f32 %v757_v2, %v648_v1  ;;  %v871_v35 = vadd.f32 %v867_v8, %v758_v0 }
 0x294   :  { %v6063_v13 = vpop.f32.mrf.mxu1  ;;  %v869_v33 = vmul.f32 %v866_v53, %v854_v10  ;;  %v1117_v10 = vld [vmem:[#allocation2 + $0x420] sm:$0xff] }
 0x295   :  { %v981_v31 = vmul.f32 %v6063_v13, %v979_v3  ;;  %v760_v32 = vadd.f32 %v756_v9, %v647_v11  ;;  %v874_v39 = vadd.f32 %v870_v30, %v761_v28  ;;  %v6488_v9 = vmov 0   ;;  %6081 = vmatprep.subr.mxu1 %v1117_v10  ;;  %v6694_v11 = vld [vmem:[#allocation2 + $0x4c8] sm:$0xff] }
 0x296   :  { %v957_v34 = vpop.f32.mrf.mxu1  ;;  %6244 = vset.pattern.permute.xlu0 %v6488_v9  ;;  %6245 = vset.pattern.permute.xlu1 %v6488_v9  ;;  %v5621_v13 = vmul.f32 -1.442695, %v6615_v15  ;;  %v6763_v9 = vld [vmem:[#allocation2 + $0x4f8] sm:$0xff] }
 0x297   :  { %v985_v36 = vadd.f32 %v981_v31, %v872_v18  ;;  %v980_v37 = vmul.f32 %v979_v3, %v957_v34  ;;  %v873_v49 = vadd.f32 %v869_v33, %v760_v32  ;;  %6082 = vmatpush3.msra.mxu1 %v1117_v10  ;;  %v7869_v18 = vmov 0.0   ;;  %v1660_v34 = vld [vmem:[#allocation2 + $0x170] sm:$0xff] }
 0x298   :  { %v6066_v38 = vpop.f32.mrf.mxu1  ;;  %1483 = vmatprep.subr.mxu1 %v6694_v11  ;;  %v5623_v31 = vmul.f32 -1.442695, %v6607_v12  ;;  %v6766_v10 = vld [vmem:[#allocation2 + $0x4f0] sm:$0xff] }
 0x299   :  { %v5565_v42 = vmul.f32 -1.442695, %v985_v36  ;;  %v984_v44 = vadd.f32 %v980_v37, %v871_v35  ;;  %v983_v47 = vmul.f32 %v6066_v38, %v979_v3  ;;  %v5620_v35 = vmul.f32 -1.442695, %v6621_v16  ;;  %v1659_v37 = vld [vmem:[#allocation2 + $0x160] sm:$0xff] }
 0x29a   :  { %v967_v45 = vpop.f32.mrf.mxu1  ;;  %v5622_v38 = vmul.f32 -1.442695, %v6609_v14 }
 0x29b   :  { %6258 = vpow2.f32 %v5565_v42  ;;  %v5564_v48 = vmul.f32 -1.442695, %v984_v44  ;;  %v987_v50 = vadd.f32 %v983_v47, %v874_v39  ;;  %v982_v51 = vmul.f32 %v979_v3, %v967_v45  ;;  %v1658_v42 = vld [vmem:[#allocation2 + $0x150] sm:$0xff] }
 0x29d   :  { %6260 = vpow2.f32 %v5564_v48  ;;  %v5567_v52 = vmul.f32 -1.442695, %v987_v50  ;;  %v986_v55 = vadd.f32 %v982_v51, %v873_v49  ;;  %v6491_v49 = vmov 1  }
 0x29e   :  { %v6493_v48 = vmov 2  }
 0x29f   :  { %6262 = vpow2.f32 %v5567_v52  ;;  %v5566_v53 = vmul.f32 -1.442695, %v986_v55 }
 0x2a1   :  { %6264 = vpow2.f32 %v5566_v53 }
 0x2a8   :  { %v6259_v56 = vpop.eup %6258 }
 0x2a9   :  { %v1001_v57 = vadd.f32 1.0, %v6259_v56 }
 0x2aa   :  { %v6261_v58 = vpop.eup %6260 }
 0x2ab   :  { %v1000_v59 = vadd.f32 1.0, %v6261_v58  ;;  %6266 = vrcp.f32 %v1001_v57 }
 0x2ac   :  { %v6263_v60 = vpop.eup %6262 }
 0x2ad   :  { %6268 = vrcp.f32 %v1000_v59  ;;  %v1003_v61 = vadd.f32 1.0, %v6263_v60 }
 0x2ae   :  { %v6265_v62 = vpop.eup %6264 }
 0x2af   :  { %v1002_v63 = vadd.f32 1.0, %v6265_v62  ;;  %6270 = vrcp.f32 %v1003_v61 }
 0x2b1   :  { %6272 = vrcp.f32 %v1002_v63  ;;  %v6735_v63 = vld [vmem:[#allocation2 + $0x4c0] sm:$0xff] }
 0x2b2   :  { %6274 = vpow2.f32 %v5621_v13  ;;  %v6769_v13 = vld [vmem:[#allocation2 + $0x4e8] sm:$0xff] }
 0x2b3   :  { %6276 = vpow2.f32 %v5623_v31  ;;  %v6776_v31 = vld [vmem:[#allocation2 + $0x4d0] sm:$0xff] }
 0x2b4   :  { %6278 = vpow2.f32 %v5620_v35 }
 0x2b5   :  { %6280 = vpow2.f32 %v5622_v38 }
 0x2b8   :  { %v6267_v4 = vpop.eup %6266 }
 0x2b9   :  { %v6680_v3 = vmul.f32 %v6267_v4, %v985_v36  ;;  %v1657_v36 = vld [vmem:[#allocation2 + $0x140] sm:$0xff] }
 0x2ba   :  { %v6269_v2 = vpop.eup %6268 }
 0x2bb   :  { %v6678_v5 = vmul.f32 %v6269_v2, %v984_v44  ;;  %v6737_v2 = vld [vmem:[#allocation2 + $0x4b8] sm:$0xff] }
 0x2bc   :  { %v6271_v6 = vpop.eup %6270 }
 0x2bd   :  { %6075 = vmatprep.mubr.msk.f32.mxu0 %vm37_vm0, %v6678_v5  ;;  %v6688_v8 = vmul.f32 %v6271_v6, %v987_v50  ;;  %v1304_v6 = vld [vmem:[#allocation2 + $0x508] sm:$0xff] }
 0x2be   :  { %v6273_v0 = vpop.eup %6272  ;;  %6076 = vmatmul.mubr.msk.f32.vlgmr.msra.gmra.mxu0 %vm37_vm0, %v6680_v3  ;;  %1345 = vmatprep.subr.mxu0 %v1304_v6 }
 0x2bf   :  { %v6686_v1 = vmul.f32 %v6273_v0, %v986_v55  ;;  %v6275_v39 = vpop.eup %6274  ;;  %v6760_v0 = vld [vmem:[#allocation2 + $0x500] sm:$0xff] }
 0x2c0   :  { %v2704_v44 = vadd.f32 1.0, %v6275_v39  ;;  %v6277_v47 = vpop.eup %6276  ;;  %1346 = vmatpush1.msra.mxu0 %v6760_v0 }
 0x2c1   :  { %6078 = vmatprep.mubr.msk.f32.mxu0 %vm37_vm0, %v6686_v1  ;;  %v2706_v45 = vadd.f32 1.0, %v6277_v47  ;;  %v6279_v50 = vpop.eup %6278  ;;  %1347 = vmatprep.subr.mxu0 %v6763_v9 }
 0x2c2   :  { %6079 = vmatmul.mubr.msk.f32.gmra.mxu0 %vm37_vm0, %v6688_v8  ;;  %6282 = vrcp.f32 %v2704_v44  ;;  %v2703_v51 = vadd.f32 1.0, %v6279_v50  ;;  %v6281_v52 = vpop.eup %6280 }
 0x2c3   :  { %1385 = vmatprep.mubr.f32.mxu0 %v7869_v18  ;;  %6284 = vrcp.f32 %v2706_v45  ;;  %v2705_v55 = vadd.f32 1.0, %v6281_v52  ;;  %1348 = vmatpush1.msra.mxu0 %v6766_v10 }
 0x2c4   :  { %6286 = vrcp.f32 %v2703_v51  ;;  %1349 = vmatprep.subr.mxu0 %v6769_v13 }
 0x2c5   :  { %6288 = vrcp.f32 %v2705_v55 }
 0x2cf   :  { %v6283_v53 = vpop.eup %6282 }
 0x2d0   :  { %v2716_v56 = vmul.f32 %v6283_v53, %v6615_v15  ;;  %v6285_v57 = vpop.eup %6284 }
 0x2d1   :  { %v2718_v58 = vmul.f32 %v6285_v57, %v6607_v12  ;;  %v6287_v59 = vpop.eup %6286 }
 0x2d2   :  { %v2715_v60 = vmul.f32 %v6287_v59, %v6621_v16  ;;  %v6289_v61 = vpop.eup %6288  ;;  %v6740_v16 = vld [vmem:[#allocation2 + $0x4b0] sm:$0xff] }
 0x2d3   :  { %v2717_v15 = vmul.f32 %v6289_v61, %v6609_v14 }
 0x37e   :  { %v6699_v28 = vpop.f32.mrf.mxu0 }
 0x380   :  { %v6701_v30 = vpop.f32.mrf.mxu0 }
 0x381   :  { %1123 = vrot.lane.b32.xlu0 %v6701_v30, %s6490_s0 }
 0x382   :  { %v6706_v32 = vpop.f32.mrf.mxu0 }
 0x384   :  { %v6708_v33 = vpop.f32.mrf.mxu0 }
 0x385   :  { %1125 = vrot.lane.b32.xlu0 %v6699_v28, %s6490_s0  ;;  %1127 = vrot.lane.b32.xlu1 %v6708_v33, %s6490_s0 }
 0x389   :  { %1783 = vperm.xlu0 %6244, %v1660_v34   ;;  %1129 = vrot.lane.b32.xlu1 %v6706_v32, %s6490_s0 }
 0x38d   :  { %1768 = vperm.xlu0 %6244, %v1657_v36   ;;  %1778 = vperm.xlu1 %6245, %v1659_v37  }
 0x391   :  { %6247 = vset.pattern.permute.xlu0 %v6491_v49  ;;  %1773 = vperm.xlu1 %6245, %v1658_v42  }
 0x392   :  { %1997 = vperm.xlu0 %6247, %v1659_v37  }
 0x395   :  { %6246 = vset.pattern.permute.xlu1 %v6491_v49 }
 0x396   :  { %2456 = vrot.lane.b32.xlu0 %v6701_v30, %s6492_s23  ;;  %2001 = vperm.xlu1 %6246, %v1660_v34  }
 0x397   :  { %6248 = vset.pattern.permute.xlu0 %v6493_v48 }
 0x39a   :  { %2460 = vrot.lane.b32.xlu0 %v6708_v33, %s6492_s23  ;;  %1993 = vperm.xlu1 %6246, %v1658_v42  }
 0x39e   :  { %2223 = vperm.xlu0 %6248, %v1657_v36   ;;  %1989 = vperm.xlu1 %6246, %v1657_v36  }
 0x3a2   :  { %2235 = vperm.xlu0 %6248, %v1660_v34   ;;  %2458 = vrot.lane.b32.xlu1 %v6699_v28, %s6492_s23 }
 0x3a3   :  { %6249 = vset.pattern.permute.xlu1 %v6493_v48 }
 0x3a6   :  { %2725 = vrot.lane.b32.xlu0 %v2716_v56, %s6490_s0  ;;  %2462 = vrot.lane.b32.xlu1 %v6706_v32, %s6492_s23 }
 0x3aa   :  { %2729 = vrot.lane.b32.xlu0 %v2718_v58, %s6490_s0  ;;  %2227 = vperm.xlu1 %6249, %v1658_v42  }
 0x3ae   :  { %2231 = vperm.xlu1 %6249, %v1659_v37  }
 0x3b2   :  { %2723 = vrot.lane.b32.xlu1 %v2715_v60, %s6490_s0 }
 0x3b6   :  { %2727 = vrot.lane.b32.xlu1 %v2717_v15, %s6490_s0 }
 0x3f3   :  { %v1124_v62 = vpop.permute.xlu0 %1123 }
 0x3f4   :  { %6083 = vmatprep.mubr.msk.f32.mxu1 %vm1131_vm2, %v1124_v62 }
 0x3f7   :  { %v1126_v12 = vpop.permute.xlu0 %1125  ;;  %v1128_v4 = vpop.permute.xlu1 %1127 }
 0x3f8   :  { %6084 = vmatmul.mubr.msk.f32.vlgmr.msra.gmra.mxu1 %vm1131_vm2, %v1126_v12 }
 0x3f9   :  { %6086 = vmatprep.mubr.msk.f32.mxu1 %vm1131_vm2, %v1128_v4  ;;  %1484 = vmatpush1.msra.mxu1 %v6735_v63 }
 0x3fa   :  { %1485 = vmatprep.subr.mxu1 %v6737_v2 }
 0x3fb   :  { %v1130_v14 = vpop.permute.xlu1 %1129  ;;  %1486 = vmatpush1.msra.mxu1 %v6740_v16 }
 0x3fc   :  { %6087 = vmatmul.mubr.msk.f32.gmra.mxu1 %vm1131_vm2, %v1130_v14 }
 0x3fd   :  { %1519 = vmatprep.mubr.f32.mxu1 %v7869_v18 }
 0x400   :  { %5580 = vmatmul.mubr.msk.f32.vlgmr.msra.gmra.mxu1 %vm302_vm1, %v6701_v30  ;;  %v6774_v30 = vld [vmem:[#allocation2 + $0x4d8] sm:$0xff] }
 0x401   :  { %1525 = vmatprep.mubr.f32.mxu1 %v7869_v18 }
 0x404   :  { %5581 = vmatmul.mubr.msk.f32.gmra.mxu1 %vm302_vm1, %v6699_v28  ;;  %v6772_v28 = vld [vmem:[#allocation2 + $0x4e0] sm:$0xff] }
 0x405   :  { %1531 = vmatprep.mubr.f32.mxu1 %v7869_v18  ;;  %1350 = vmatpush1.msra.mxu0 %v6772_v28 }
 0x406   :  { %1351 = vmatprep.subr.mxu0 %v6774_v30 }
 0x407   :  { %1352 = vmatpush1.msra.mxu0 %v6776_v31 }
 0x408   :  { %5582 = vmatmul.mubr.msk.f32.gmra.mxu1 %vm302_vm1, %v6708_v33  ;;  %1584 = vmatprep.subr.mxu0 %v1304_v6 }
 0x409   :  { %1537 = vmatprep.mubr.f32.mxu1 %v7869_v18 }
 0x40c   :  { %5583 = vmatmul.mubr.msk.f32.gmra.mxu1 %vm302_vm1, %v6706_v32  ;;  %v1118_v32 = vld [vmem:[#allocation2 + $0x430] ss:$0 sm:$0xff] }
 0x40d   :  { %1725 = vmatprep.mubr.f32.mxu1 %v7869_v18 }
 0x4b8   :  { %v6085_v33 = vpop.f32.mrf.mxu1 }
 0x4b9   :  { %v6781_v34 = vadd.f32 %v6085_v33, %v1118_v32 }
 0x4ba   :  { %v1206_v35 = vpop.f32.mrf.mxu1 }
 0x4bb   :  { %v1238_v36 = vand.u32 2147483647, %v6781_v34  ;;  %v1207_v37 = vadd.f32 %v1206_v35, %v1118_v32  ;;  %vm1230_vm7 = vcmp.ne.f32.partialorder %v6781_v34, %v6781_v34 }
 0x4bc   :  { %v6088_v38 = vpop.f32.mrf.mxu1 }
 0x4bd   :  { %v1242_v39 = vsub.f32 0.0, %v1238_v36  ;;  %v1237_v42 = vand.u32 2147483647, %v1207_v37  ;;  %v6784_v44 = vadd.f32 %v6088_v38, %v1118_v32  ;;  %vm1229_vm5 = vcmp.ne.f32.partialorder %v1207_v37, %v1207_v37 }
 0x4be   :  { %v1216_v47 = vpop.f32.mrf.mxu1 }
 0x4bf   :  { %v1247_v49 = vmul.f32 1.442695, %v1242_v39  ;;  %v1241_v45 = vsub.f32 0.0, %v1237_v42  ;;  %v6786_v48 = vadd.f32 %v1216_v47, %v1118_v32  ;;  %v1240_v50 = vand.u32 2147483647, %v6784_v44 }
 0x4c0   :  { %vm1232_vm10 = vcmp.ne.f32.partialorder %v6784_v44, %v6784_v44 }
 0x4c1   :  { %6290 = vpow2.f32 %v1247_v49  ;;  %v1245_v51 = vmul.f32 1.442695, %v1241_v45  ;;  %v1239_v52 = vand.u32 2147483647, %v6786_v48  ;;  %v1244_v55 = vsub.f32 0.0, %v1240_v50 }
 0x4c2   :  { %v1225_v49 = vmax.f32 %v1207_v37, 0.0  ;;  %vm1231_vm9 = vcmp.ne.f32.partialorder %v6786_v48, %v6786_v48 }
 0x4c3   :  { %6292 = vpow2.f32 %v1245_v51  ;;  %v1243_v53 = vsub.f32 0.0, %v1239_v52  ;;  %v1251_v56 = vmul.f32 1.442695, %v1244_v55 }
 0x4c5   :  { %v1249_v57 = vmul.f32 1.442695, %v1243_v53  ;;  %6294 = vpow2.f32 %v1251_v56 }
 0x4c7   :  { %6296 = vpow2.f32 %v1249_v57 }
 0x4ce   :  { %v6291_v58 = vpop.eup %6290 }
 0x4cf   :  { %v1262_v59 = vadd.f32 1.0, %v6291_v58  ;;  %v1265_v14 = vmul.f32 -0.5, %v6291_v58  ;;  %v1268_v39 = vand.u32 2147483647, %v6291_v58 }
 0x4d0   :  { %v6293_v60 = vpop.eup %6292 }
 0x4d1   :  { %v1253_v61 = vadd.f32 1.0, %v6293_v60  ;;  %6298 = vlog2.f32 %v1262_v59  ;;  %v1256_v6 = vmul.f32 -0.5, %v6293_v60  ;;  %v1266_v32 = vadd.f32 1.0, %v1265_v14 }
 0x4d2   :  { %v6295_v15 = vpop.eup %6294  ;;  %v1259_v38 = vand.u32 2147483647, %v6293_v60  ;;  %vm1269_vm4 = vcmp.lt.f32.partialorder %v1268_v39, 0.0004427343 }
 0x4d3   :  { %6300 = vlog2.f32 %v1253_v61  ;;  %v1280_v12 = vadd.f32 1.0, %v6295_v15  ;;  %v1257_v33 = vadd.f32 1.0, %v1256_v6  ;;  %v1267_v45 = vmul.f32 %v6291_v58, %v1266_v32 }
 0x4d4   :  { %v6297_v62 = vpop.eup %6296  ;;  %v1283_v55 = vmul.f32 -0.5, %v6295_v15  ;;  %vm1260_vm3 = vcmp.lt.f32.partialorder %v1259_v38, 0.0004427343 }
 0x4d5   :  { %v1271_v4 = vadd.f32 1.0, %v6297_v62  ;;  %6302 = vlog2.f32 %v1280_v12  ;;  %v1274_v35 = vmul.f32 -0.5, %v6297_v62  ;;  %v1258_v51 = vmul.f32 %v6293_v60, %v1257_v33 }
 0x4d6   :  { %v1277_v53 = vand.u32 2147483647, %v6297_v62  ;;  %v1226_v12 = vmax.f32 %v6781_v34, 0.0  ;;  %v1286_v60 = vand.u32 2147483647, %v6295_v15 }
 0x4d7   :  { %6304 = vlog2.f32 %v1271_v4  ;;  %v1275_v52 = vadd.f32 1.0, %v1274_v35  ;;  %v1227_v35 = vmax.f32 %v6786_v48, 0.0 }
 0x4d8   :  { %vm1278_vm6 = vcmp.lt.f32.partialorder %v1277_v53, 0.0004427343  ;;  %vm1287_vm8 = vcmp.lt.f32.partialorder %v1286_v60, 0.0004427343 }
 0x4d9   :  { %v1276_v6 = vmul.f32 %v6297_v62, %v1275_v52 }
 0x4de   :  { %v6299_v36 = vpop.eup %6298 }
 0x4df   :  { %v1264_v42 = vmul.f32 0.6931472, %v6299_v36  ;;  %v1284_v36 = vadd.f32 1.0, %v1283_v55 }
 0x4e0   :  { %v6301_v47 = vpop.eup %6300 }
 0x4e1   :  { %v1255_v50 = vmul.f32 0.6931472, %v6301_v47  ;;  %v1270_v59 = vsel %vm1269_vm4, %v1267_v45, %v1264_v42  ;;  %v1285_v62 = vmul.f32 %v6295_v15, %v1284_v36  ;;  %v1228_v42 = vmax.f32 %v6784_v44, 0.0 }
 0x4e2   :  { %v6303_v56 = vpop.eup %6302  ;;  %v1290_v58 = vadd.f32 %v1270_v59, %v1226_v12 }
 0x4e3   :  { %v1261_v57 = vsel %vm1260_vm3, %v1258_v51, %v1255_v50  ;;  %v1282_v33 = vmul.f32 0.6931472, %v6303_v56 }
 0x4e4   :  { %v6305_v61 = vpop.eup %6304  ;;  %v1289_v4 = vadd.f32 %v1261_v57, %v1225_v49  ;;  %v1411_v49 = vld [vmem:[#allocation2 + $0x440] ss:$8 sm:$0x3] }
 0x4e5   :  { %v1273_v14 = vmul.f32 0.6931472, %v6305_v61  ;;  %v1288_v39 = vsel %vm1287_vm8, %v1285_v62, %v1282_v33  ;;  %v1416_v52 = vrot.slane %v1411_v49, %v6673_v54  ;;  %v1420_v55 = vrot.slane %v1411_v49, %v6667_v46 }
 0x4e6   :  { %v1293_v43 = vsel %vm1229_vm5, %v1207_v37, %v1289_v4  ;;  %v1294_v37 = vsel %vm1230_vm7, %v6781_v34, %v1290_v58  ;;  %v6829_v34 = vpop.f32.mrf.mxu1 }
 0x4e7   :  { %5576 = vmatmul.mubr.msk.f32.vlgmr.msra.gmra.mxu0 %vm37_vm0, %v1293_v43  ;;  %v1279_v32 = vsel %vm1278_vm6, %v1276_v6, %v1273_v14 }
 0x4e8   :  { %1391 = vmatprep.mubr.f32.mxu0 %v7869_v18  ;;  %1585 = vmatpush1.msra.mxu0 %v6760_v0  ;;  %v1291_v38 = vadd.f32 %v1279_v32, %v1227_v35  ;;  %v6831_v15 = vpop.f32.mrf.mxu1 }
 0x4e9   :  { %1586 = vmatprep.subr.mxu0 %v6763_v9  ;;  %v1292_v9 = vadd.f32 %v1288_v39, %v1228_v42 }
 0x4ea   :  { %1587 = vmatpush1.msra.mxu0 %v6766_v10  ;;  %v1295_v0 = vsel %vm1231_vm9, %v6786_v48, %v1291_v38  ;;  %v1527_v50 = vpop.f32.mrf.mxu1 }
 0x4eb   :  { %5577 = vmatmul.mubr.msk.f32.gmra.mxu0 %vm37_vm0, %v1294_v37  ;;  %1588 = vmatprep.subr.mxu0 %v6769_v13  ;;  %v1296_v10 = vsel %vm1232_vm10, %v6784_v44, %v1292_v9  ;;  %v1544_v13 = vmul.f32 %v1293_v43, %v6678_v5 }
 0x4ec   :  { %1397 = vmatprep.mubr.f32.mxu0 %v7869_v18  ;;  %1589 = vmatpush1.msra.mxu0 %v6772_v28  ;;  %v1545_v28 = vmul.f32 %v1294_v37, %v6680_v3  ;;  %v1529_v59 = vpop.f32.mrf.mxu1 }
 0x4ed   :  { %1590 = vmatprep.subr.mxu0 %v6774_v30  ;;  %v1546_v30 = vmul.f32 %v1295_v0, %v6686_v1 }
 0x4ee   :  { %1591 = vmatpush1.msra.mxu0 %v6776_v31  ;;  %v1547_v31 = vmul.f32 %v1296_v10, %v6688_v8  ;;  %v1533_v35 = vpop.f32.mrf.mxu1 }
 0x4ef   :  { %5578 = vmatmul.mubr.msk.f32.gmra.mxu0 %vm37_vm0, %v1295_v0 }
 0x4f0   :  { %1403 = vmatprep.mubr.f32.mxu0 %v7869_v18 }
 0x4f3   :  { %5579 = vmatmul.mubr.msk.f32.gmra.mxu0 %vm37_vm0, %v1296_v10  ;;  %v1535_v10 = vpop.f32.mrf.mxu1 }
 0x4f4   :  { %1624 = vmatprep.mubr.f32.mxu0 %v7869_v18 }
 0x4f7   :  { %5584 = vmatmul.mubr.msk.f32.vlgmr.msra.gmra.mxu0 %vm37_vm0, %v1544_v13 }
 0x4f8   :  { %1630 = vmatprep.mubr.f32.mxu0 %v7869_v18 }
 0x4fb   :  { %5585 = vmatmul.mubr.msk.f32.gmra.mxu0 %vm37_vm0, %v1545_v28 }
 0x4fc   :  { %1636 = vmatprep.mubr.f32.mxu0 %v7869_v18 }
 0x4ff   :  { %5586 = vmatmul.mubr.msk.f32.gmra.mxu0 %vm37_vm0, %v1546_v30 }
 0x500   :  { %1642 = vmatprep.mubr.f32.mxu0 %v7869_v18 }
 0x503   :  { %5587 = vmatmul.mubr.msk.f32.gmra.mxu0 %vm37_vm0, %v1547_v31  ;;  %v1539_v31 = vpop.f32.mrf.mxu1 }
 0x504   :  { %1850 = vmatprep.mubr.f32.mxu0 %v7869_v18 }
 0x5a7   :  { %v1387_v43 = vpop.f32.mrf.mxu0 }
 0x5a8   :  { %v1423_v62 = vmul.f32 %v1416_v52, %v1387_v43 }
 0x5a9   :  { %v1389_v44 = vpop.f32.mrf.mxu0 }
 0x5aa   :  { %v1424_v60 = vmul.f32 %v1420_v55, %v1389_v44  ;;  %v1431_v13 = vmul.f32 1.442695, %v1423_v62  ;;  %v6909_v62 = vpop.permute.xlu1 %1778 }
 0x5ab   :  { %v1393_v48 = vpop.f32.mrf.mxu0  ;;  %7886 = vst [vmem:[#allocation9_spill] sm:$0xff] %v6909_v62 }
 0x5ac   :  { %v1425_v6 = vmul.f32 %v1416_v52, %v1393_v48  ;;  %v1433_v9 = vmul.f32 1.442695, %v1424_v60  ;;  %v1541_v48 = vpop.f32.mrf.mxu1 }
 0x5ad   :  { %v1395_v47 = vpop.f32.mrf.mxu0 }
 0x5ae   :  { %v1426_v4 = vmul.f32 %v1420_v55, %v1395_v47  ;;  %v1435_v42 = vmul.f32 1.442695, %v1425_v6 }
 0x5af   :  { %v1399_v45 = vpop.f32.mrf.mxu0 }
 0x5b0   :  { %v1427_v61 = vmul.f32 %v1416_v52, %v1399_v45  ;;  %v1437_v39 = vmul.f32 1.442695, %v1426_v4 }
 0x5b1   :  { %v1401_v51 = vpop.f32.mrf.mxu0 }
 0x5b2   :  { %v1428_v56 = vmul.f32 %v1420_v55, %v1401_v51  ;;  %v1439_v37 = vmul.f32 1.442695, %v1427_v61 }
 0x5b3   :  { %v1405_v53 = vpop.f32.mrf.mxu0 }
 0x5b4   :  { %v1429_v57 = vmul.f32 %v1416_v52, %v1405_v53  ;;  %v1441_v32 = vmul.f32 1.442695, %v1428_v56 }
 0x5b5   :  { %v1407_v12 = vpop.f32.mrf.mxu0 }
 0x5b6   :  { %v1430_v14 = vmul.f32 %v1420_v55, %v1407_v12  ;;  %v1443_v36 = vmul.f32 1.442695, %v1429_v57 }
 0x5b7   :  { %v1626_v58 = vpop.f32.mrf.mxu0 }
 0x5b8   :  { %v1445_v33 = vmul.f32 1.442695, %v1430_v14 }
 0x5b9   :  { %v1628_v38 = vpop.f32.mrf.mxu0 }
 0x5ba   :  { %6306 = vpow2.f32 %v1445_v33  ;;  %v6868_v6 = vmul.f32 %v1628_v38, %v6831_v15 }
 0x5bb   :  { %6308 = vpow2.f32 %v1443_v36  ;;  %v1632_v0 = vpop.f32.mrf.mxu0  ;;  %v6875_v36 = vmul.f32 %v1626_v58, %v6829_v34 }
 0x5bc   :  { %6310 = vpow2.f32 %v1441_v32  ;;  %v6861_v4 = vmul.f32 %v1632_v0, %v1527_v50 }
 0x5bd   :  { %6312 = vpow2.f32 %v1439_v37  ;;  %v1634_v28 = vpop.f32.mrf.mxu0 }
 0x5be   :  { %6314 = vpow2.f32 %v1437_v39  ;;  %v6855_v61 = vmul.f32 %v1634_v28, %v1529_v59  ;;  %v6911_v39 = vpop.permute.xlu0 %1783 }
 0x5bf   :  { %6316 = vpow2.f32 %v1435_v42  ;;  %v1638_v30 = vpop.f32.mrf.mxu0  ;;  %7887 = vst [vmem:[#allocation10_spill] sm:$0xff] %v6911_v39 }
 0x5c0   :  { %6318 = vpow2.f32 %v1433_v9  ;;  %v6849_v56 = vmul.f32 %v1638_v30, %v1533_v35 }
 0x5c1   :  { %6320 = vpow2.f32 %v1431_v13  ;;  %v1640_v43 = vpop.f32.mrf.mxu0 }
 0x5c2   :  { %v6843_v55 = vmul.f32 %v1640_v43, %v1535_v10 }
 0x5c3   :  { %v1644_v44 = vpop.f32.mrf.mxu0 }
 0x5c4   :  { %v6839_v51 = vmul.f32 %v1644_v44, %v1539_v31  ;;  %v6919_v44 = vpop.permute.xlu1 %1773 }
 0x5c5   :  { %v1646_v47 = vpop.f32.mrf.mxu0  ;;  %7888 = vst [vmem:[#allocation11_spill] sm:$0xff] %v6919_v44 }
 0x5c6   :  { %v6835_v49 = vmul.f32 %v1646_v47, %v1541_v48 }
 0x5c7   :  { %v6837_v45 = vpop.eup %6306 }
 0x5c8   :  { %v6841_v52 = vpop.eup %6308  ;;  %1685 = vmatprep.subr.mxu1 %v6835_v49  ;;  %1810 = vmatprep.subr.mxu0 %v6837_v45 }
 0x5c9   :  { %v6847_v53 = vpop.eup %6310  ;;  %1686 = vmatpush1.msra.mxu1 %v6839_v51  ;;  %1811 = vmatpush1.msra.mxu0 %v6841_v52 }
 0x5ca   :  { %v6853_v57 = vpop.eup %6312  ;;  %1687 = vmatprep.subr.mxu1 %v6843_v55  ;;  %1812 = vmatprep.subr.mxu0 %v6847_v53 }
 0x5cb   :  { %v6859_v12 = vpop.eup %6314  ;;  %1688 = vmatpush1.msra.mxu1 %v6849_v56  ;;  %1813 = vmatpush1.msra.mxu0 %v6853_v57 }
 0x5cc   :  { %v6865_v14 = vpop.eup %6316  ;;  %1689 = vmatprep.subr.mxu1 %v6855_v61  ;;  %1814 = vmatprep.subr.mxu0 %v6859_v12 }
 0x5cd   :  { %v6872_v59 = vpop.eup %6318  ;;  %1690 = vmatpush1.msra.mxu1 %v6861_v4  ;;  %1815 = vmatpush1.msra.mxu0 %v6865_v14 }
 0x5ce   :  { %v6879_v50 = vpop.eup %6320  ;;  %1691 = vmatprep.subr.mxu1 %v6868_v6  ;;  %1816 = vmatprep.subr.mxu0 %v6872_v59 }
 0x5cf   :  { %1692 = vmatpush1.msra.mxu1 %v6875_v36  ;;  %1817 = vmatpush1.msra.mxu0 %v6879_v50 }
 0x5d0   :  { %5588 = vmatmul.mubr.msk.f32.vlgmr.msra.gmra.mxu1 %vm37_vm0, %v6602_v7  ;;  %5592 = vmatmul.mubr.msk.f32.vlgmr.msra.gmra.mxu0 %vm37_vm0, %v6602_v7 }
 0x5d1   :  { %1731 = vmatprep.mubr.f32.mxu1 %v7869_v18  ;;  %1856 = vmatprep.mubr.f32.mxu0 %v7869_v18 }
 0x5d4   :  { %5589 = vmatmul.mubr.msk.f32.gmra.mxu1 %vm37_vm0, %v6627_v17  ;;  %5593 = vmatmul.mubr.msk.f32.gmra.mxu0 %vm37_vm0, %v6627_v17 }
 0x5d5   :  { %1737 = vmatprep.mubr.f32.mxu1 %v7869_v18  ;;  %1862 = vmatprep.mubr.f32.mxu0 %v7869_v18 }
 0x5d8   :  { %5590 = vmatmul.mubr.msk.f32.gmra.mxu1 %vm37_vm0, %v6633_v19  ;;  %5594 = vmatmul.mubr.msk.f32.gmra.mxu0 %vm37_vm0, %v6633_v19 }
 0x5d9   :  { %1743 = vmatprep.mubr.f32.mxu1 %v7869_v18  ;;  %1868 = vmatprep.mubr.f32.mxu0 %v7869_v18 }
 0x5dc   :  { %5591 = vmatmul.mubr.msk.f32.gmra.mxu1 %vm37_vm0, %v6640_v29  ;;  %5595 = vmatmul.mubr.msk.f32.gmra.mxu0 %vm37_vm0, %v6640_v29 }
 0x5dd   :  { %1947 = vmatprep.mubr.f32.mxu1 %v7869_v18  ;;  %2068 = vmatprep.mubr.f32.mxu0 %v7869_v18 }
 0x690   :  { %v1727_v7 = vpop.f32.mrf.mxu1  ;;  %v1852_v17 = vpop.f32.mrf.mxu0 }
 0x691   :  { %v1750_v48 = vmul.f32 %v6879_v50, %v1727_v7 }
 0x692   :  { %v1729_v34 = vpop.f32.mrf.mxu1  ;;  %v1854_v15 = vpop.f32.mrf.mxu0 }
 0x693   :  { %v1751_v47 = vmul.f32 %v6872_v59, %v1729_v34 }
 0x694   :  { %v1733_v58 = vpop.f32.mrf.mxu1  ;;  %v1858_v19 = vpop.f32.mrf.mxu0 }
 0x695   :  { %v1752_v7 = vmul.f32 %v6865_v14, %v1733_v58  ;;  %v1859_v34 = vadd.f32 %v1858_v19, %v6919_v44 }
 0x696   :  { %v1735_v60 = vpop.f32.mrf.mxu1  ;;  %v1860_v32 = vpop.f32.mrf.mxu0 }
 0x697   :  { %v1753_v41 = vmul.f32 %v6859_v12, %v1735_v60 }
 0x698   :  { %v1739_v33 = vpop.f32.mrf.mxu1  ;;  %v1864_v35 = vpop.f32.mrf.mxu0 }
 0x69a   :  { %v1741_v37 = vpop.f32.mrf.mxu1  ;;  %v1866_v38 = vpop.f32.mrf.mxu0 }
 0x69b   :  { %v1755_v28 = vmul.f32 %v6847_v53, %v1741_v37  ;;  %v1867_v30 = vadd.f32 %v1866_v38, %v6909_v62  ;;  %v1861_v37 = vadd.f32 %v1860_v32, %v6919_v44 }
 0x69c   :  { %v1745_v29 = vpop.f32.mrf.mxu1  ;;  %v1870_v42 = vpop.f32.mrf.mxu0 }
 0x69d   :  { %v1756_v0 = vmul.f32 %v6841_v52, %v1745_v29  ;;  %v1871_v9 = vadd.f32 %v1870_v42, %v6911_v39  ;;  %v1754_v29 = vmul.f32 %v6853_v57, %v1739_v33  ;;  %v1865_v42 = vadd.f32 %v1864_v35, %v6909_v62 }
 0x69e   :  { %v1747_v10 = vpop.f32.mrf.mxu1  ;;  %v1872_v13 = vpop.f32.mrf.mxu0 }
 0x69f   :  { %v1757_v31 = vmul.f32 %v6837_v45, %v1747_v10  ;;  %v1873_v43 = vadd.f32 %v1872_v13, %v6911_v39  ;;  %v6933_v13 = vpop.permute.xlu0 %1768  ;;  %v6938_v33 = vadd.f32 %v1756_v0, %v6839_v51  ;;  %v6941_v35 = vmul.f32 %v6841_v52, %v1871_v9  ;;  %v7029_v9 = vpop.permute.xlu1 %2001 }
 0x6a0   :  { %7889 = vst [vmem:[#allocation12_spill] sm:$0xff] %v6933_v13  ;;  %v1855_v60 = vadd.f32 %v1854_v15, %v6933_v13  ;;  %v1853_v58 = vadd.f32 %v1852_v17, %v6933_v13  ;;  %v6954_v51 = vadd.f32 %v1754_v29, %v6849_v56  ;;  %v6957_v52 = vmul.f32 %v6853_v57, %v1865_v42 }
 0x6a1   :  { %v6928_v38 = vadd.f32 %v1757_v31, %v6835_v49  ;;  %v6931_v10 = vmul.f32 %v6837_v45, %v1873_v43  ;;  %v6945_v49 = vadd.f32 %v1755_v28, %v6843_v55  ;;  %v6948_v45 = vmul.f32 %v6847_v53, %v1867_v30 }
 0x6a2   :  { %v6962_v55 = vadd.f32 %v1753_v41, %v6855_v61  ;;  %v6965_v53 = vmul.f32 %v6859_v12, %v1861_v37  ;;  %v6970_v56 = vadd.f32 %v1752_v7, %v6861_v4  ;;  %v6973_v57 = vmul.f32 %v6865_v14, %v1859_v34  ;;  %v6997_v14 = vld [vmem:[#allocation2 + $0x40] sm:$0xff] }
 0x6a3   :  { %1907 = vmatprep.subr.mxu1 %v6928_v38  ;;  %2028 = vmatprep.subr.mxu0 %v6931_v10  ;;  %v6978_v41 = vadd.f32 %v1751_v47, %v6868_v6  ;;  %v6981_v61 = vmul.f32 %v6872_v59, %v1855_v60  ;;  %v6986_v12 = vadd.f32 %v1750_v48, %v6875_v36  ;;  %v7005_v6 = vld [vmem:[#allocation2 + $0x50] sm:$0xff]  ;;  %v7013_v59 = vld [vmem:[#allocation2 + $0x60] sm:$0xff]  ;;  %v7031_v29 = vpop.permute.xlu1 %1993  ;;  %v7033_v7 = vpop.permute.xlu0 %1997 }
 0x6a4   :  { %1908 = vmatpush1.msra.mxu1 %v6938_v33  ;;  %2029 = vmatpush1.msra.mxu0 %v6941_v35  ;;  %v6989_v4 = vmul.f32 %v6879_v50, %v1853_v58  ;;  %v7021_v36 = vld [vmem:[#allocation2 + $0x70] sm:$0xff] }
 0x6a5   :  { %1909 = vmatprep.subr.mxu1 %v6945_v49  ;;  %2030 = vmatprep.subr.mxu0 %v6948_v45 }
 0x6a6   :  { %1910 = vmatpush1.msra.mxu1 %v6954_v51  ;;  %2031 = vmatpush1.msra.mxu0 %v6957_v52 }
 0x6a7   :  { %1911 = vmatprep.subr.mxu1 %v6962_v55  ;;  %2032 = vmatprep.subr.mxu0 %v6965_v53 }
 0x6a8   :  { %1912 = vmatpush1.msra.mxu1 %v6970_v56  ;;  %2033 = vmatpush1.msra.mxu0 %v6973_v57 }
 0x6a9   :  { %1913 = vmatprep.subr.mxu1 %v6978_v41  ;;  %2034 = vmatprep.subr.mxu0 %v6981_v61 }
 0x6aa   :  { %1914 = vmatpush1.msra.mxu1 %v6986_v12  ;;  %2035 = vmatpush1.msra.mxu0 %v6989_v4 }
 0x6ab   :  { %5596 = vmatmul.mubr.msk.f32.vlgmr.msra.gmra.mxu1 %vm37_vm0, %v6997_v14  ;;  %5600 = vmatmul.mubr.msk.f32.vlgmr.msra.gmra.mxu0 %vm37_vm0, %v6997_v14 }
 0x6ac   :  { %1953 = vmatprep.mubr.f32.mxu1 %v7869_v18  ;;  %2074 = vmatprep.mubr.f32.mxu0 %v7869_v18 }
 0x6af   :  { %5597 = vmatmul.mubr.msk.f32.gmra.mxu1 %vm37_vm0, %v7005_v6  ;;  %5601 = vmatmul.mubr.msk.f32.gmra.mxu0 %vm37_vm0, %v7005_v6 }
 0x6b0   :  { %1959 = vmatprep.mubr.f32.mxu1 %v7869_v18  ;;  %2080 = vmatprep.mubr.f32.mxu0 %v7869_v18 }
 0x6b3   :  { %5598 = vmatmul.mubr.msk.f32.gmra.mxu1 %vm37_vm0, %v7013_v59  ;;  %5602 = vmatmul.mubr.msk.f32.gmra.mxu0 %vm37_vm0, %v7013_v59 }
 0x6b4   :  { %1965 = vmatprep.mubr.f32.mxu1 %v7869_v18  ;;  %2086 = vmatprep.mubr.f32.mxu0 %v7869_v18 }
 0x6b7   :  { %5599 = vmatmul.mubr.msk.f32.gmra.mxu1 %vm37_vm0, %v7021_v36  ;;  %5603 = vmatmul.mubr.msk.f32.gmra.mxu0 %vm37_vm0, %v7021_v36 }
 0x6b8   :  { %2181 = vmatprep.mubr.f32.mxu1 %v7869_v18  ;;  %2302 = vmatprep.mubr.f32.mxu0 %v7869_v18 }
 0x76b   :  { %v1949_v50 = vpop.f32.mrf.mxu1  ;;  %v2070_v17 = vpop.f32.mrf.mxu0 }
 0x76c   :  { %v1972_v13 = vmul.f32 %v1949_v50, %v6989_v4 }
 0x76d   :  { %v1951_v15 = vpop.f32.mrf.mxu1  ;;  %v2072_v19 = vpop.f32.mrf.mxu0 }
 0x76e   :  { %v1973_v44 = vmul.f32 %v1951_v15, %v6981_v61 }
 0x76f   :  { %v1955_v32 = vpop.f32.mrf.mxu1  ;;  %v2076_v0 = vpop.f32.mrf.mxu0 }
 0x770   :  { %v2077_v50 = vadd.f32 %v2076_v0, %v7031_v29 }
 0x771   :  { %v1957_v28 = vpop.f32.mrf.mxu1  ;;  %v2078_v30 = vpop.f32.mrf.mxu0 }
 0x772   :  { %v2079_v39 = vadd.f32 %v2078_v30, %v7031_v29 }
 0x773   :  { %v1961_v31 = vpop.f32.mrf.mxu1  ;;  %v2082_v43 = vpop.f32.mrf.mxu0 }
 0x774   :  { %v1976_v62 = vmul.f32 %v1961_v31, %v6957_v52 }
 0x775   :  { %v1963_v48 = vpop.f32.mrf.mxu1  ;;  %v2084_v47 = vpop.f32.mrf.mxu0 }
 0x776   :  { %v1977_v26 = vmul.f32 %v1963_v48, %v6948_v45  ;;  %v2085_v22 = vadd.f32 %v2084_v47, %v7033_v7 }
 0x777   :  { %v1967_v42 = vpop.f32.mrf.mxu1  ;;  %v2088_v37 = vpop.f32.mrf.mxu0 }
 0x778   :  { %v1978_v34 = vmul.f32 %v1967_v42, %v6941_v35  ;;  %v2089_v60 = vadd.f32 %v2088_v37, %v7029_v9  ;;  %v2083_v42 = vadd.f32 %v2082_v43, %v7033_v7  ;;  %v1975_v37 = vmul.f32 %v1957_v28, %v6965_v53 }
 0x779   :  { %v1969_v58 = vpop.f32.mrf.mxu1  ;;  %v2090_v18 = vpop.f32.mrf.mxu0 }
 0x77a   :  { %v1979_v24 = vmul.f32 %v1969_v58, %v6931_v10  ;;  %v2091_v20 = vadd.f32 %v2090_v18, %v7029_v9  ;;  %v7053_v58 = vpop.permute.xlu1 %1989  ;;  %v1974_v18 = vmul.f32 %v1955_v32, %v6973_v57  ;;  %v7058_v15 = vadd.f32 %v1978_v34, %v6938_v33 }
 0x77b   :  { %v7061_v31 = vmul.f32 %v2089_v60, %v6941_v35  ;;  %v2073_v28 = vadd.f32 %v2072_v19, %v7053_v58  ;;  %v7077_v33 = vmul.f32 %v2083_v42, %v6957_v52  ;;  %v7093_v35 = vmul.f32 %v2077_v50, %v6973_v57  ;;  %v2101_v52 = vld [vmem:[#allocation2 + $0xc0] sm:$0xff] }
 0x77c   :  { %v7048_v48 = vadd.f32 %v1979_v24, %v6928_v38  ;;  %v7051_v47 = vmul.f32 %v2091_v20, %v6931_v10  ;;  %v7065_v24 = vadd.f32 %v1977_v26, %v6945_v49  ;;  %v7068_v20 = vmul.f32 %v2085_v22, %v6948_v45 }
 0x77d   :  { %v2071_v38 = vadd.f32 %v2070_v17, %v7053_v58  ;;  %v7074_v10 = vadd.f32 %v1976_v62, %v6954_v51  ;;  %v7082_v26 = vadd.f32 %v1975_v37, %v6962_v55  ;;  %v7085_v22 = vmul.f32 %v2079_v39, %v6965_v53  ;;  %v2103_v55 = vld [vmem:[#allocation2 + $0xe0] sm:$0xff] }
 0x77e   :  { %2141 = vmatprep.subr.mxu1 %v7048_v48  ;;  %2262 = vmatprep.subr.mxu0 %v7051_v47  ;;  %v7090_v62 = vadd.f32 %v1974_v18, %v6970_v56  ;;  %v7098_v49 = vadd.f32 %v1973_v44, %v6978_v41  ;;  %v7101_v39 = vmul.f32 %v2073_v28, %v6981_v61  ;;  %v7890_v44 = vmov 0.0  }
 0x77f   :  { %2142 = vmatpush1.msra.mxu1 %v7058_v15  ;;  %2263 = vmatpush1.msra.mxu0 %v7061_v31  ;;  %v7106_v45 = vadd.f32 %v1972_v13, %v6986_v12  ;;  %v7109_v51 = vmul.f32 %v2071_v38, %v6989_v4  ;;  %v2102_v13 = vld [vmem:[#allocation2 + $0xd0] sm:$0xff] }
 0x780   :  { %2143 = vmatprep.subr.mxu1 %v7065_v24  ;;  %2264 = vmatprep.subr.mxu0 %v7068_v20 }
 0x781   :  { %2144 = vmatpush1.msra.mxu1 %v7074_v10  ;;  %2265 = vmatpush1.msra.mxu0 %v7077_v33 }
 0x782   :  { %2145 = vmatprep.subr.mxu1 %v7082_v26  ;;  %2266 = vmatprep.subr.mxu0 %v7085_v22 }
 0x783   :  { %2146 = vmatpush1.msra.mxu1 %v7090_v62  ;;  %2267 = vmatpush1.msra.mxu0 %v7093_v35 }
 0x784   :  { %2147 = vmatprep.subr.mxu1 %v7098_v49  ;;  %2268 = vmatprep.subr.mxu0 %v7101_v39 }
 0x785   :  { %2148 = vmatpush1.msra.mxu1 %v7106_v45  ;;  %2269 = vmatpush1.msra.mxu0 %v7109_v51 }
 0x786   :  { %5604 = vmatmul.mubr.msk.f32.vlgmr.msra.gmra.mxu1 %vm37_vm0, %v2101_v52  ;;  %5608 = vmatmul.mubr.msk.f32.vlgmr.msra.gmra.mxu0 %vm37_vm0, %v2101_v52  ;;  %v2335_v52 = vld [vmem:[#allocation2 + $0x100] sm:$0xff] }
 0x787   :  { %2187 = vmatprep.mubr.f32.mxu1 %v7890_v44  ;;  %2308 = vmatprep.mubr.f32.mxu0 %v7890_v44 }
 0x788   :  { %2500 = vmatprep.subr.mxu0 %v6694_v11  ;;  %v2104_v11 = vld [vmem:[#allocation2 + $0xf0] sm:$0xff] }
 0x789   :  { %2501 = vmatpush1.msra.mxu0 %v6735_v63  ;;  %v2457_v63 = vpop.permute.xlu0 %2456 }
 0x78a   :  { %5605 = vmatmul.mubr.msk.f32.gmra.mxu1 %vm37_vm0, %v2102_v13  ;;  %5609 = vmatmul.mubr.msk.f32.gmra.mxu0 %vm37_vm0, %v2102_v13  ;;  %v2584_v13 = vld [vmem:[#allocation2 + $0x600] sm:$0xff] }
 0x78b   :  { %2193 = vmatprep.mubr.f32.mxu1 %v7890_v44  ;;  %2314 = vmatprep.mubr.f32.mxu0 %v7890_v44 }
 0x78c   :  { %2502 = vmatprep.subr.mxu0 %v6737_v2  ;;  %v2459_v2 = vpop.permute.xlu1 %2458 }
 0x78d   :  { %2503 = vmatpush1.msra.mxu0 %v6740_v16  ;;  %v2461_v16 = vpop.permute.xlu0 %2460 }
 0x78e   :  { %5606 = vmatmul.mubr.msk.f32.gmra.mxu1 %vm37_vm0, %v2103_v55  ;;  %5610 = vmatmul.mubr.msk.f32.gmra.mxu0 %vm37_vm0, %v2103_v55  ;;  %v2336_v55 = vld [vmem:[#allocation2 + $0x110] sm:$0xff] }
 0x78f   :  { %2199 = vmatprep.mubr.f32.mxu1 %v7890_v44  ;;  %2320 = vmatprep.mubr.f32.mxu0 %v7890_v44 }
 0x790   :  { %v2463_v53 = vpop.permute.xlu1 %2462 }
 0x792   :  { %5607 = vmatmul.mubr.msk.f32.gmra.mxu1 %vm37_vm0, %v2104_v11  ;;  %5611 = vmatmul.mubr.msk.f32.gmra.mxu0 %vm37_vm0, %v2104_v11  ;;  %v2582_v11 = vld [vmem:[#allocation2 + $0x5e0] sm:$0xff] }
 0x793   :  { %2536 = vmatprep.mubr.f32.mxu0 %v7890_v44  ;;  %2415 = vmatprep.mubr.f32.mxu1 %v7890_v44 }
 0x796   :  { %5616 = vmatmul.mubr.msk.f32.vlgmr.msra.gmra.mxu0 %vm302_vm1, %v2457_v63  ;;  %v2597_v63 = vld [vmem:[#allocation2 + $0x6d0] sm:$0xff] }
 0x797   :  { %2542 = vmatprep.mubr.f32.mxu0 %v7890_v44 }
 0x79a   :  { %5617 = vmatmul.mubr.msk.f32.gmra.mxu0 %vm302_vm1, %v2459_v2  ;;  %v2581_v2 = vld [vmem:[#allocation2 + $0x5d0] sm:$0xff] }
 0x79b   :  { %2548 = vmatprep.mubr.f32.mxu0 %v7890_v44 }
 0x79e   :  { %5618 = vmatmul.mubr.msk.f32.gmra.mxu0 %vm302_vm1, %v2461_v16  ;;  %v2337_v16 = vld [vmem:[#allocation2 + $0x120] sm:$0xff] }
 0x79f   :  { %2554 = vmatprep.mubr.f32.mxu0 %v7890_v44 }
 0x7a2   :  { %5619 = vmatmul.mubr.msk.f32.gmra.mxu0 %vm302_vm1, %v2463_v53  ;;  %v2596_v53 = vld [vmem:[#allocation2 + $0x6c0] sm:$0xff] }
 0x846   :  { %v2183_v56 = vpop.f32.mrf.mxu1 }
 0x847   :  { %v2206_v28 = vmul.f32 %v2183_v56, %v7109_v51  ;;  %v2580_v56 = vld [vmem:[#allocation2 + $0x5c0] sm:$0xff] }
 0x848   :  { %v2185_v57 = vpop.f32.mrf.mxu1 }
 0x849   :  { %v2207_v18 = vmul.f32 %v2185_v57, %v7101_v39  ;;  %v2595_v57 = vld [vmem:[#allocation2 + $0x6b0] sm:$0xff] }
 0x84a   :  { %v2189_v41 = vpop.f32.mrf.mxu1 }
 0x84b   :  { %v2208_v42 = vmul.f32 %v2189_v41, %v7093_v35  ;;  %v2579_v41 = vld [vmem:[#allocation2 + $0x5b0] sm:$0xff] }
 0x84c   :  { %v2191_v61 = vpop.f32.mrf.mxu1 }
 0x84d   :  { %v2209_v34 = vmul.f32 %v2191_v61, %v7085_v22  ;;  %v2338_v61 = vld [vmem:[#allocation2 + $0x130] sm:$0xff] }
 0x84e   :  { %v2195_v12 = vpop.f32.mrf.mxu1 }
 0x84f   :  { %v2210_v43 = vmul.f32 %v2195_v12, %v7077_v33  ;;  %v2594_v12 = vld [vmem:[#allocation2 + $0x6a0] sm:$0xff] }
 0x850   :  { %v2197_v4 = vpop.f32.mrf.mxu1 }
 0x851   :  { %v2211_v0 = vmul.f32 %v2197_v4, %v7068_v20  ;;  %v7163_v38 = vadd.f32 %v2210_v43, %v7074_v10  ;;  %v7179_v10 = vadd.f32 %v2206_v28, %v7106_v45  ;;  %v2598_v45 = vld [vmem:[#allocation2 + $0x6e0] sm:$0xff]  ;;  %v2575_v43 = vld [vmem:[#allocation2 + $0x570] sm:$0xff] }
 0x852   :  { %v2201_v17 = vpop.f32.mrf.mxu1  ;;  %v2578_v4 = vld [vmem:[#allocation2 + $0x5a0] sm:$0xff]  ;;  %v2573_v28 = vld [vmem:[#allocation2 + $0x550] sm:$0xff] }
 0x853   :  { %v2212_v19 = vmul.f32 %v2201_v17, %v7061_v31  ;;  %v7158_v50 = vadd.f32 %v2211_v0, %v7065_v24  ;;  %v7175_v24 = vadd.f32 %v2207_v18, %v7098_v49  ;;  %v2583_v49 = vld [vmem:[#allocation2 + $0x5f0] sm:$0xff]  ;;  %v2576_v0 = vld [vmem:[#allocation2 + $0x580] sm:$0xff] }
 0x854   :  { %v2203_v32 = vpop.f32.mrf.mxu1  ;;  %v2593_v17 = vld [vmem:[#allocation2 + $0x690] sm:$0xff] }
 0x855   :  { %v2213_v30 = vmul.f32 %v2203_v32, %v7051_v47  ;;  %v7154_v37 = vadd.f32 %v2212_v19, %v7058_v15  ;;  %v7171_v15 = vadd.f32 %v2208_v42, %v7090_v62  ;;  %v2599_v62 = vld [vmem:[#allocation2 + $0x6f0] sm:$0xff]  ;;  %v2592_v32 = vld [vmem:[#allocation2 + $0x680] sm:$0xff] }
 0x856   :  { %v2577_v19 = vld [vmem:[#allocation2 + $0x590] sm:$0xff]  ;;  %v2574_v42 = vld [vmem:[#allocation2 + $0x560] sm:$0xff] }
 0x857   :  { %v7150_v60 = vadd.f32 %v2213_v30, %v7048_v48  ;;  %v7167_v48 = vadd.f32 %v2209_v34, %v7082_v26  ;;  %v2600_v26 = vld [vmem:[#allocation2 + $0x700] sm:$0xff]  ;;  %v2591_v30 = vld [vmem:[#allocation2 + $0x670] sm:$0xff] }
 0x858   :  { %v2590_v34 = vld [vmem:[#allocation2 + $0x660] sm:$0xff]  ;;  %v2589_v18 = vld [vmem:[#allocation2 + $0x650] sm:$0xff] }
 0x859   :  { %2375 = vmatprep.subr.mxu1 %v7150_v60 }
 0x85a   :  { %2376 = vmatpush1.msra.mxu1 %v7154_v37 }
 0x85b   :  { %2377 = vmatprep.subr.mxu1 %v7158_v50 }
 0x85c   :  { %2378 = vmatpush1.msra.mxu1 %v7163_v38 }
 0x85d   :  { %2379 = vmatprep.subr.mxu1 %v7167_v48 }
 0x85e   :  { %2380 = vmatpush1.msra.mxu1 %v7171_v15 }
 0x85f   :  { %2381 = vmatprep.subr.mxu1 %v7175_v24 }
 0x860   :  { %2382 = vmatpush1.msra.mxu1 %v7179_v10 }
 0x861   :  { %5612 = vmatmul.mubr.msk.f32.vlgmr.msra.gmra.mxu1 %vm37_vm0, %v2335_v52  ;;  %5795 = vmatprep.subr.mxu1 %v2600_v26  ;;  %v2588_v52 = vld [vmem:[#allocation2 + $0x640] sm:$0xff] }
 0x862   :  { %2421 = vmatprep.mubr.f32.mxu1 %v7890_v44  ;;  %5796 = vmatpush3.msra.mxu1 %v2584_v13  ;;  %v2572_v26 = vld [vmem:[#allocation2 + $0x540] sm:$0xff]  ;;  %v2587_v13 = vld [vmem:[#allocation2 + $0x630] sm:$0xff] }
 0x863   :  { %5797 = vmatprep.subr.mxu1 %v2599_v62  ;;  %v2571_v62 = vld [vmem:[#allocation2 + $0x530] sm:$0xff] }
 0x864   :  { %5798 = vmatpush3.msra.mxu1 %v2583_v49  ;;  %v2586_v49 = vld [vmem:[#allocation2 + $0x620] sm:$0xff] }
 0x865   :  { %5613 = vmatmul.mubr.msk.f32.gmra.mxu1 %vm37_vm0, %v2336_v55  ;;  %5799 = vmatprep.subr.mxu1 %v2598_v45  ;;  %v2570_v55 = vld [vmem:[#allocation2 + $0x520] sm:$0xff]  ;;  %v2585_v45 = vld [vmem:[#allocation2 + $0x610] sm:$0xff] }
 0x866   :  { %2427 = vmatprep.mubr.f32.mxu1 %v7890_v44  ;;  %5800 = vmatpush3.msra.mxu1 %v2582_v11  ;;  %v2569_v11 = vld [vmem:[#allocation2 + $0x510] sm:$0xff] }
 0x867   :  { %5801 = vmatprep.subr.mxu1 %v2597_v63  ;;  %v2304_v63 = vpop.f32.mrf.mxu0 }
 0x868   :  { %5802 = vmatpush3.msra.mxu1 %v2581_v2 }
 0x869   :  { %5614 = vmatmul.mubr.msk.f32.gmra.mxu1 %vm37_vm0, %v2337_v16  ;;  %5803 = vmatprep.subr.mxu1 %v2596_v53  ;;  %v2306_v2 = vpop.f32.mrf.mxu0 }
 0x86a   :  { %2433 = vmatprep.mubr.f32.mxu1 %v7890_v44  ;;  %5804 = vmatpush3.msra.mxu1 %v2580_v56 }
 0x86b   :  { %5805 = vmatprep.subr.mxu1 %v2595_v57  ;;  %v2310_v16 = vpop.f32.mrf.mxu0 }
 0x86c   :  { %5806 = vmatpush3.msra.mxu1 %v2579_v41 }
 0x86d   :  { %5615 = vmatmul.mubr.msk.f32.gmra.mxu1 %vm37_vm0, %v2338_v61  ;;  %5807 = vmatprep.subr.mxu1 %v2594_v12  ;;  %v2312_v53 = vpop.f32.mrf.mxu0 }
 0x86e   :  { %5808 = vmatpush3.msra.mxu1 %v2578_v4  ;;  %v7191_v4 = vpop.permute.xlu0 %2223 }
 0x86f   :  { %5809 = vmatprep.subr.mxu1 %v2593_v17  ;;  %v2316_v56 = vpop.f32.mrf.mxu0 }
 0x870   :  { %5810 = vmatpush3.msra.mxu1 %v2577_v19  ;;  %v7193_v19 = vpop.permute.xlu1 %2227 }
 0x871   :  { %5811 = vmatprep.subr.mxu1 %v2592_v32  ;;  %v2318_v57 = vpop.f32.mrf.mxu0  ;;  %v2305_v32 = vadd.f32 %v2304_v63, %v7191_v4 }
 0x872   :  { %5812 = vmatpush3.msra.mxu1 %v2576_v0  ;;  %v2307_v0 = vadd.f32 %v2306_v2, %v7191_v4  ;;  %v7206_v2 = vpop.permute.xlu0 %2235 }
 0x873   :  { %5813 = vmatprep.subr.mxu1 %v2591_v30  ;;  %v2322_v41 = vpop.f32.mrf.mxu0  ;;  %7891 = vst [vmem:[#allocation13_spill] sm:$0xff] %v7206_v2 }
 0x874   :  { %5814 = vmatpush3.msra.mxu1 %v2575_v43  ;;  %v2311_v43 = vadd.f32 %v2310_v16, %v7193_v19 }
 0x875   :  { %5815 = vmatprep.subr.mxu1 %v2590_v34  ;;  %v2324_v61 = vpop.f32.mrf.mxu0  ;;  %v2327_v34 = vmul.f32 %v2305_v32, %v7109_v51 }
 0x876   :  { %5816 = vmatpush3.msra.mxu1 %v2574_v42 }
 0x877   :  { %5817 = vmatprep.subr.mxu1 %v2589_v18  ;;  %v2538_v12 = vpop.f32.mrf.mxu0  ;;  %v7199_v18 = vpop.permute.xlu1 %2231 }
 0x878   :  { %5818 = vmatpush3.msra.mxu1 %v2573_v28  ;;  %v2313_v28 = vadd.f32 %v2312_v53, %v7193_v19  ;;  %v2319_v51 = vadd.f32 %v2318_v57, %v7199_v18 }
 0x879   :  { %5819 = vmatprep.subr.mxu1 %v2588_v52  ;;  %v2540_v17 = vpop.f32.mrf.mxu0 }
 0x87a   :  { %5820 = vmatpush3.msra.mxu1 %v2572_v26  ;;  %v2328_v26 = vmul.f32 %v2307_v0, %v7101_v39  ;;  %v2330_v32 = vmul.f32 %v2313_v28, %v7085_v22  ;;  %v2332_v22 = vmul.f32 %v2319_v51, %v7068_v20 }
 0x87b   :  { %5821 = vmatprep.subr.mxu1 %v2587_v13  ;;  %v2544_v30 = vpop.f32.mrf.mxu0 }
 0x87c   :  { %5822 = vmatpush3.msra.mxu1 %v2571_v62 }
 0x87d   :  { %5823 = vmatprep.subr.mxu1 %v2586_v49  ;;  %v2546_v13 = vpop.f32.mrf.mxu0  ;;  %v2317_v49 = vadd.f32 %v2316_v56, %v7199_v18 }
 0x87e   :  { %5824 = vmatpush3.msra.mxu1 %v2570_v55 }
 0x87f   :  { %5825 = vmatprep.subr.mxu1 %v2585_v45  ;;  %v2329_v45 = vmul.f32 %v2311_v43, %v7093_v35  ;;  %v2550_v39 = vpop.f32.mrf.mxu0 }
 0x880   :  { %5826 = vmatpush3.msra.mxu1 %v2569_v11 }
 0x881   :  { %v2552_v28 = vpop.f32.mrf.mxu0 }
 0x921   :  { %v2417_v42 = vpop.f32.mrf.mxu1 }
 0x922   :  { %v2440_v52 = vmul.f32 %v2417_v42, %v2327_v34  ;;  %v2323_v34 = vadd.f32 %v2322_v41, %v7206_v2  ;;  %v2331_v42 = vmul.f32 %v2317_v49, %v7077_v33 }
 0x923   :  { %v2419_v62 = vpop.f32.mrf.mxu1 }
 0x924   :  { %v2441_v55 = vmul.f32 %v2419_v62, %v2328_v26  ;;  %v2448_v11 = vadd.f32 %v2440_v52, %v7179_v10  ;;  %v2325_v26 = vadd.f32 %v2324_v61, %v7206_v2 }
 0x925   :  { %v2423_v63 = vpop.f32.mrf.mxu1 }
 0x926   :  { %v2449_v16 = vadd.f32 %v2441_v55, %v7175_v24  ;;  %v2442_v53 = vmul.f32 %v2423_v63, %v2329_v45  ;;  %v2561_v43 = vmul.f32 %v2538_v12, %v2448_v11  ;;  %v2333_v55 = vmul.f32 %v2323_v34, %v7061_v31  ;;  %v2556_v45 = vpop.f32.mrf.mxu0 }
 0x927   :  { %v2425_v0 = vpop.f32.mrf.mxu1 }
 0x928   :  { %v2443_v56 = vmul.f32 %v2425_v0, %v2330_v32  ;;  %v2562_v35 = vmul.f32 %v2540_v17, %v2449_v16  ;;  %v2450_v10 = vadd.f32 %v2442_v53, %v7171_v15  ;;  %v2740_v53 = vld [vmem:[#allocation2 + $0x470] sm:$0xff] }
 0x929   :  { %v2429_v52 = vpop.f32.mrf.mxu1  ;;  %v2601_v32 = vld [vmem:[#allocation2 + $0x450] ss:$0 sm:$0xff] }
 0x92a   :  { %v2451_v57 = vadd.f32 %v2443_v56, %v7167_v48  ;;  %v2444_v24 = vmul.f32 %v2429_v52, %v2331_v42  ;;  %2670 = vmatprep.mubr.f32.mxu1 %v2562_v35  ;;  %v2563_v15 = vmul.f32 %v2544_v30, %v2450_v10  ;;  %v2334_v48 = vmul.f32 %v2325_v26, %v7051_v47  ;;  %v2741_v47 = vld [vmem:[#allocation2 + $0x480] sm:$0xff]  ;;  %v2724_v35 = vpop.permute.xlu1 %2723 }
 0x92b   :  { %v2431_v62 = vpop.f32.mrf.mxu1  ;;  %2671 = vmatmul.mubr.f32.vlgmr.msra.gmra.mxu1 %v2561_v43  ;;  %v2602_v0 = vmul.f32 %v2601_v32, %v6678_v5  ;;  %v2603_v52 = vmul.f32 %v2601_v32, %v6680_v3  ;;  %v2605_v3 = vmul.f32 %v2601_v32, %v6688_v8 }
 0x92c   :  { %v2445_v41 = vmul.f32 %v2431_v62, %v2332_v22  ;;  %v2564_v33 = vmul.f32 %v2546_v13, %v2451_v57  ;;  %v2452_v12 = vadd.f32 %v2444_v24, %v7163_v38  ;;  %v2558_v38 = vpop.f32.mrf.mxu0  ;;  %v2726_v22 = vpop.permute.xlu0 %2725 }
 0x92d   :  { %v2435_v17 = vpop.f32.mrf.mxu1 }
 0x92e   :  { %v2453_v49 = vadd.f32 %v2445_v41, %v7158_v50  ;;  %v2446_v61 = vmul.f32 %v2435_v17, %v2333_v55  ;;  %2675 = vmatprep.mubr.f32.mxu1 %v2564_v33  ;;  %v2565_v16 = vmul.f32 %v2550_v39, %v2452_v12  ;;  %v2742_v50 = vld [vmem:[#allocation2 + $0x490] sm:$0xff]  ;;  %v2604_v41 = vmul.f32 %v2601_v32, %v6686_v1  ;;  %v2728_v12 = vpop.permute.xlu1 %2727  ;;  %v3076_v32 = vld [vmem:[#allocation2 + $0x760] sm:$0xff] }
 0x92f   :  { %v2437_v11 = vpop.f32.mrf.mxu1  ;;  %2676 = vmatmul.mubr.f32.gmra.mxu1 %v2563_v15  ;;  %6089 = vmatprep.subr.mxu0 %v2742_v50  ;;  %v2841_v1 = vld [vmem:[#allocation2 + $0x710] sm:$0xff] }
 0x930   :  { %v2447_v20 = vmul.f32 %v2437_v11, %v2334_v48  ;;  %v2566_v63 = vmul.f32 %v2552_v28, %v2453_v49  ;;  %v2454_v51 = vadd.f32 %v2446_v61, %v7154_v37  ;;  %6090 = vmatpush3.msra.mxu0 %v2742_v50  ;;  %v2739_v37 = vld [vmem:[#allocation2 + $0x460] sm:$0xff]  ;;  %v2730_v48 = vpop.permute.xlu0 %2729  ;;  %6123 = vmatprep.subr.mxu1 %v3076_v32 }
 0x931   :  { %6091 = vmatprep.subr.mxu0 %v2741_v47  ;;  %v2842_v11 = vld [vmem:[#allocation2 + $0x720] sm:$0xff]  ;;  %6124 = vmatpush3.msra.mxu1 %v3076_v32 }
 0x932   :  { %v2455_v31 = vadd.f32 %v2447_v20, %v7150_v60  ;;  %2680 = vmatprep.mubr.f32.mxu1 %v2566_v63  ;;  %v2567_v13 = vmul.f32 %v2556_v45, %v2454_v51  ;;  %6092 = vmatpush3.msra.mxu0 %v2741_v47  ;;  %v2743_v63 = vld [vmem:[#allocation2 + $0x4a0] ss:$0 sm:$0xff] }
 0x933   :  { %2681 = vmatmul.mubr.f32.gmra.mxu1 %v2565_v16  ;;  %6093 = vmatprep.subr.mxu0 %v2740_v53 }
 0x934   :  { %v2568_v30 = vmul.f32 %v2558_v38, %v2455_v31  ;;  %6094 = vmatpush3.msra.mxu0 %v2740_v53 }
 0x935   :  { %6095 = vmatprep.subr.mxu0 %v2739_v37 }
 0x936   :  { %2685 = vmatprep.mubr.f32.mxu1 %v2568_v30  ;;  %6096 = vmatpush3.msra.mxu0 %v2739_v37 }
 0x937   :  { %2686 = vmatmul.mubr.f32.gmra.mxu1 %v2567_v13  ;;  %6103 = vmatprep.subr.mxu0 %v2842_v11 }
 0x9eb   :  { %v5827_v60 = vpop.f32.mrf.mxu1 }
 0x9ed   :  { %v5828_v39 = vpop.f32.mrf.mxu1 }
 0x9ee   :  { %v5829_v34 = vadd.f32 %v5828_v39, %v5827_v60  ;;  %v6438_v60 = vld [vmem:[#allocation2] sm:$0xff]  ;;  %v3075_v39 = vld [vmem:[#allocation2 + $0x750] sm:$0xff] }
 0x9ef   :  { %v5830_v56 = vpop.f32.mrf.mxu1  ;;  %6125 = vmatprep.subr.mxu1 %v3075_v39 }
 0x9f0   :  { %v2673_v42 = vadd.f32 %v5829_v34, %v2602_v0  ;;  %6126 = vmatpush3.msra.mxu1 %v3075_v39 }
 0x9f1   :  { %v5831_v43 = vpop.f32.mrf.mxu1 }
 0x9f2   :  { %v2735_v10 = vmul.f32 %v2724_v35, %v2673_v42  ;;  %v5832_v26 = vadd.f32 %v5831_v43, %v5830_v56 }
 0x9f3   :  { %v5833_v57 = vpop.f32.mrf.mxu1 }
 0x9f4   :  { %v2678_v24 = vadd.f32 %v5832_v26, %v2603_v52  ;;  %6097 = vmatprep.mubr.msk.f32.mxu0 %vm37_vm0, %v2735_v10 }
 0x9f5   :  { %v5834_v28 = vpop.f32.mrf.mxu1 }
 0x9f6   :  { %v2736_v62 = vmul.f32 %v2726_v22, %v2678_v24  ;;  %v5835_v55 = vadd.f32 %v5834_v28, %v5833_v57 }
 0x9f7   :  { %v5836_v5 = vpop.f32.mrf.mxu1 }
 0x9f8   :  { %v2683_v33 = vadd.f32 %v5835_v55, %v2604_v41  ;;  %6098 = vmatmul.mubr.msk.f32.vlgmr.msra.gmra.mxu0 %vm37_vm0, %v2736_v62 }
 0x9f9   :  { %v5837_v17 = vpop.f32.mrf.mxu1  ;;  %6104 = vmatpush3.msra.mxu0 %v2842_v11 }
 0x9fa   :  { %v2737_v15 = vmul.f32 %v2728_v12, %v2683_v33  ;;  %v5838_v49 = vadd.f32 %v5837_v17, %v5836_v5  ;;  %6105 = vmatprep.subr.mxu0 %v2841_v1 }
 0x9fb   :  { %6106 = vmatpush3.msra.mxu0 %v2841_v1 }
 0x9fc   :  { %v2688_v61 = vadd.f32 %v5838_v49, %v2605_v3  ;;  %6100 = vmatprep.mubr.msk.f32.mxu0 %vm37_vm0, %v2737_v15  ;;  %6113 = vmatprep.subr.mxu0 %v2842_v11 }
 0x9fe   :  { %v2738_v45 = vmul.f32 %v2730_v48, %v2688_v61  ;;  %v3065_v48 = vld [vmem:[#allocation2 + $0x730] ss:$0 sm:$0xff] }
 0xa00   :  { %6101 = vmatmul.mubr.msk.f32.gmra.mxu0 %vm37_vm0, %v2738_v45 }
 0xab8   :  { %v6099_v20 = vpop.f32.mrf.mxu0 }
 0xab9   :  { %v2828_v8 = vadd.f32 %v6099_v20, %v2743_v63 }
 0xaba   :  { %v2822_v51 = vpop.f32.mrf.mxu0 }
 0xabb   :  { %v2823_v16 = vadd.f32 %v2822_v51, %v2743_v63  ;;  %v2941_v47 = vmul.f32 %v2828_v8, %v2828_v8 }
 0xabd   :  { %6107 = vmatprep.mubr.msk.f32.mxu0 %vm302_vm1, %v2823_v16  ;;  %v2940_v50 = vmul.f32 %v2823_v16, %v2823_v16 }
 0xabe   :  { %6108 = vmatmul.mubr.msk.f32.vlgmr.msra.gmra.mxu0 %vm302_vm1, %v2828_v8 }
 0xabf   :  { %6114 = vmatpush3.msra.mxu0 %v2842_v11 }
 0xac0   :  { %v6102_v31 = vpop.f32.mrf.mxu0  ;;  %6115 = vmatprep.subr.mxu0 %v2841_v1 }
 0xac1   :  { %6116 = vmatpush3.msra.mxu0 %v2841_v1  ;;  %v2838_v13 = vadd.f32 %v6102_v31, %v2743_v63 }
 0xac2   :  { %v2832_v38 = vpop.f32.mrf.mxu0 }
 0xac3   :  { %v2833_v30 = vadd.f32 %v2832_v38, %v2743_v63  ;;  %v2943_v37 = vmul.f32 %v2838_v13, %v2838_v13  ;;  %v3070_v38 = vld [vmem:[#allocation2 + $0x740] ss:$0 sm:$0xff] }
 0xac5   :  { %6110 = vmatprep.mubr.msk.f32.mxu0 %vm302_vm1, %v2833_v30  ;;  %v2942_v53 = vmul.f32 %v2833_v30, %v2833_v30 }
 0xac6   :  { %6111 = vmatmul.mubr.msk.f32.gmra.mxu0 %vm302_vm1, %v2838_v13 }
 0xac7   :  { %6117 = vmatprep.mubr.msk.f32.mxu0 %vm302_vm1, %v2940_v50 }
 0xaca   :  { %6118 = vmatmul.mubr.msk.f32.vlgmr.msra.gmra.mxu0 %vm302_vm1, %v2941_v47 }
 0xacb   :  { %6120 = vmatprep.mubr.msk.f32.mxu0 %vm302_vm1, %v2942_v53 }
 0xace   :  { %6121 = vmatmul.mubr.msk.f32.gmra.mxu0 %vm302_vm1, %v2943_v37 }
 0xacf   :  { %6141 = vmatprep.mubr.msk.f32.mxu0 %vm37_vm0, %v6438_v60 }
 0xb7e   :  { %v6109_v0 = vpop.f32.mrf.mxu0 }
 0xb7f   :  { %v3042_v35 = vmul.f32 %v6109_v0, %v6109_v0  ;;  %v3050_v15 = vsub.f32 %v2828_v8, %v6109_v0  ;;  %v3077_v0 = vld [vmem:[#allocation2 + $0x770] ss:$0 sm:$0xff] }
 0xb80   :  { %v2921_v34 = vpop.f32.mrf.mxu0 }
 0xb81   :  { %v3041_v10 = vmul.f32 %v2921_v34, %v2921_v34  ;;  %v3049_v49 = vsub.f32 %v2823_v16, %v2921_v34 }
 0xb86   :  { %v6112_v56 = vpop.f32.mrf.mxu0 }
 0xb87   :  { %v3044_v57 = vmul.f32 %v6112_v56, %v6112_v56  ;;  %v3052_v11 = vsub.f32 %v2838_v13, %v6112_v56 }
 0xb88   :  { %v2931_v42 = vpop.f32.mrf.mxu0 }
 0xb89   :  { %v3043_v62 = vmul.f32 %v2931_v42, %v2931_v42  ;;  %v3051_v51 = vsub.f32 %v2833_v30, %v2931_v42 }
 0xb8a   :  { %v6119_v43 = vpop.f32.mrf.mxu0 }
 0xb8b   :  { %v3046_v52 = vsub.f32 %v6119_v43, %v3042_v35 }
 0xb8c   :  { %v3022_v26 = vpop.f32.mrf.mxu0 }
 0xb8d   :  { %v3054_v24 = vadd.f32 1e-05, %v3046_v52  ;;  %v3045_v22 = vsub.f32 %v3022_v26, %v3041_v10  ;;  %v7270_v10 = vld [vmem:[#allocation2 + $0x10] sm:$0xff]  ;;  %v7279_v52 = vld [vmem:[#allocation2 + $0x20] sm:$0xff] }
 0xb8e   :  { %v6122_v28 = vpop.f32.mrf.mxu0  ;;  %v7286_v26 = vld [vmem:[#allocation2 + $0x30] sm:$0xff] }
 0xb8f   :  { %6322 = vrsqrt.f32 %v3054_v24  ;;  %v3053_v41 = vadd.f32 1e-05, %v3045_v22  ;;  %v3048_v55 = vsub.f32 %v6122_v28, %v3044_v57  ;;  %v6444_v57 = vld [vmem:[#allocation2 + $0xa0] sm:$0xff]  ;;  %v6445_v24 = vld [vmem:[#allocation2 + $0xb0] sm:$0xff] }
 0xb90   :  { %v3032_v5 = vpop.f32.mrf.mxu0  ;;  %v3511_v22 = vld [vmem:[#allocation2 + $0x7d0] sm:$0xff] }
 0xb91   :  { %6324 = vrsqrt.f32 %v3053_v41  ;;  %v3056_v33 = vadd.f32 1e-05, %v3048_v55  ;;  %v3047_v12 = vsub.f32 %v3032_v5, %v3043_v62  ;;  %v3509_v28 = vld [vmem:[#allocation2 + $0x7b0] sm:$0xff]  ;;  %v3508_v62 = vld [vmem:[#allocation2 + $0x7a0] sm:$0xff]  ;;  %v7892_v55 = vsub.s32 3, %v6658_v40 }
 0xb92   :  { %v3175_v41 = vld [vmem:[#allocation2 + $0x780] sm:$0xf] }
 0xb93   :  { %6326 = vrsqrt.f32 %v3056_v33  ;;  %v3055_v17 = vadd.f32 1e-05, %v3047_v12  ;;  %v3180_v5 = vrot.slane %v3175_v41, %v7892_v55  ;;  %v7893_v33 = vsub.s32 2, %v6658_v40 }
 0xb95   :  { %6328 = vrsqrt.f32 %v3055_v17  ;;  %v3277_v12 = vrot.slane %v3175_v41, %v7893_v33 }
 0xb9c   :  { %v6323_v3 = vpop.eup %6322 }
 0xb9d   :  { %v3062_v61 = vmul.f32 %v6323_v3, %v3050_v15  ;;  %v3176_v15 = vld [vmem:[#allocation2 + $0x790] ss:$0 sm:$0xff] }
 0xb9e   :  { %v6325_v45 = vpop.eup %6324 }
 0xb9f   :  { %v3061_v1 = vmul.f32 %v6325_v45, %v3049_v49  ;;  %v3067_v63 = vmul.f32 %v3065_v48, %v3062_v61  ;;  %v3374_v45 = vrot.slane %v3175_v41, %v6667_v46 }
 0xba0   :  { %v6327_v20 = vpop.eup %6326 }
 0xba1   :  { %v3066_v31 = vmul.f32 %v3065_v48, %v3061_v1  ;;  %v3064_v50 = vmul.f32 %v6327_v20, %v3052_v11  ;;  %v3072_v60 = vadd.f32 %v3070_v38, %v3067_v63 }
 0xba2   :  { %v6329_v47 = vpop.eup %6328 }
 0xba3   :  { %v3071_v53 = vadd.f32 %v3070_v38, %v3066_v31  ;;  %v3063_v37 = vmul.f32 %v6329_v47, %v3051_v51  ;;  %v3069_v32 = vmul.f32 %v3065_v48, %v3064_v50 }
 0xba5   :  { %6127 = vmatprep.mubr.msk.f32.mxu1 %vm302_vm1, %v3071_v53  ;;  %v3068_v8 = vmul.f32 %v3065_v48, %v3063_v37  ;;  %v3074_v39 = vadd.f32 %v3070_v38, %v3069_v32 }
 0xba6   :  { %6128 = vmatmul.mubr.msk.f32.vlgmr.msra.gmra.mxu1 %vm302_vm1, %v3072_v60  ;;  %v3471_v60 = vrot.slane %v3175_v41, %v6673_v54 }
 0xba7   :  { %v3073_v16 = vadd.f32 %v3070_v38, %v3068_v8 }
 0xba9   :  { %6130 = vmatprep.mubr.msk.f32.mxu1 %vm302_vm1, %v3073_v16 }
 0xbaa   :  { %6131 = vmatmul.mubr.msk.f32.gmra.mxu1 %vm302_vm1, %v3074_v39 }
 0xbab   :  { %6155 = vmatprep.mubr.msk.f32.mxu1 %vm37_vm0, %v6997_v14 }
 0xc66   :  { %v6129_v30 = vpop.f32.mrf.mxu1 }
 0xc67   :  { %v7254_v43 = vadd.f32 %v6129_v30, %v3077_v0 }
 0xc68   :  { %v3156_v13 = vpop.f32.mrf.mxu1 }
 0xc69   :  { %v7260_v14 = vadd.f32 %v3156_v13, %v3077_v0  ;;  %v3182_v17 = vmul.f32 %v3180_v5, %v7254_v43 }
 0xc6a   :  { %v6132_v34 = vpop.f32.mrf.mxu1 }
 0xc6b   :  { %v7246_v56 = vadd.f32 %v6132_v34, %v3077_v0  ;;  %v3181_v49 = vmul.f32 %v3180_v5, %v7260_v14  ;;  %v3186_v1 = vadd.f32 %v3182_v17, %v3176_v15 }
 0xc6c   :  { %v3166_v42 = vpop.f32.mrf.mxu1 }
 0xc6d   :  { %v7248_v35 = vadd.f32 %v3166_v42, %v3077_v0  ;;  %6133 = vmatprep.subr.mxu0 %v7246_v56  ;;  %6147 = vmatprep.subr.mxu1 %v7246_v56  ;;  %v3184_v63 = vmul.f32 %v3180_v5, %v7246_v56  ;;  %v3185_v31 = vadd.f32 %v3181_v49, %v3176_v15 }
 0xc6e   :  { %6134 = vmatpush3.msra.mxu0 %v7246_v56  ;;  %6148 = vmatpush3.msra.mxu1 %v7246_v56 }
 0xc6f   :  { %6135 = vmatprep.subr.mxu0 %v7248_v35  ;;  %6149 = vmatprep.subr.mxu1 %v7248_v35  ;;  %v3183_v40 = vmul.f32 %v3180_v5, %v7248_v35  ;;  %v3188_v16 = vadd.f32 %v3184_v63, %v3176_v15 }
 0xc70   :  { %6136 = vmatpush3.msra.mxu0 %v7248_v35  ;;  %6150 = vmatpush3.msra.mxu1 %v7248_v35 }
 0xc71   :  { %6137 = vmatprep.subr.mxu0 %v7254_v43  ;;  %6151 = vmatprep.subr.mxu1 %v7254_v43  ;;  %v3187_v0 = vadd.f32 %v3183_v40, %v3176_v15 }
 0xc72   :  { %6138 = vmatpush3.msra.mxu0 %v7254_v43  ;;  %6152 = vmatpush3.msra.mxu1 %v7254_v43 }
 0xc73   :  { %6139 = vmatprep.subr.mxu0 %v7260_v14  ;;  %6153 = vmatprep.subr.mxu1 %v7260_v14 }
 0xc74   :  { %6140 = vmatpush3.msra.mxu0 %v7260_v14  ;;  %6154 = vmatpush3.msra.mxu1 %v7260_v14 }
 0xc75   :  { %6142 = vmatmul.mubr.msk.f32.vlgmr.msra.gmra.mxu0 %vm37_vm0, %v7270_v10  ;;  %6161 = vmatprep.subr.mxu0 %v7246_v56 }
 0xc76   :  { %6162 = vmatpush3.msra.mxu0 %v7246_v56  ;;  %6156 = vmatmul.mubr.msk.f32.vlgmr.msra.gmra.mxu1 %vm37_vm0, %v7005_v6  ;;  %v6442_v6 = vld [vmem:[#allocation2 + $0x80] sm:$0xff] }
 0xc77   :  { %6163 = vmatprep.subr.mxu0 %v7248_v35  ;;  %6144 = vmatprep.mubr.msk.f32.mxu0 %vm37_vm0, %v7279_v52 }
 0xc78   :  { %6164 = vmatpush3.msra.mxu0 %v7248_v35  ;;  %6158 = vmatprep.mubr.msk.f32.mxu1 %vm37_vm0, %v7013_v59  ;;  %v6443_v59 = vld [vmem:[#allocation2 + $0x90] sm:$0xff] }
 0xc79   :  { %6145 = vmatmul.mubr.msk.f32.gmra.mxu0 %vm37_vm0, %v7286_v26  ;;  %6165 = vmatprep.subr.mxu0 %v7254_v43 }
 0xc7a   :  { %6166 = vmatpush3.msra.mxu0 %v7254_v43  ;;  %6159 = vmatmul.mubr.msk.f32.gmra.mxu1 %vm37_vm0, %v7021_v36  ;;  %v3510_v36 = vld [vmem:[#allocation2 + $0x7c0] sm:$0xff] }
 0xc7b   :  { %6167 = vmatprep.subr.mxu0 %v7260_v14  ;;  %6169 = vmatprep.mubr.msk.f32.mxu0 %vm37_vm0, %v6442_v6 }
 0xc7c   :  { %6168 = vmatpush3.msra.mxu0 %v7260_v14  ;;  %6175 = vmatprep.subr.mxu1 %v3511_v22 }
 0xc7d   :  { %6170 = vmatmul.mubr.msk.f32.vlgmr.msra.gmra.mxu0 %vm37_vm0, %v6443_v59  ;;  %6176 = vmatpush3.msra.mxu1 %v3511_v22 }
 0xc7e   :  { %6172 = vmatprep.mubr.msk.f32.mxu0 %vm37_vm0, %v6444_v57  ;;  %6177 = vmatprep.subr.mxu1 %v3510_v36 }
 0xc7f   :  { %6178 = vmatpush3.msra.mxu1 %v3510_v36 }
 0xc80   :  { %6179 = vmatprep.subr.mxu1 %v3509_v28 }
 0xc81   :  { %6173 = vmatmul.mubr.msk.f32.gmra.mxu0 %vm37_vm0, %v6445_v24  ;;  %6180 = vmatpush3.msra.mxu1 %v3509_v28 }
 0xc82   :  { %6181 = vmatprep.subr.mxu1 %v3508_v62 }
 0xc83   :  { %6182 = vmatpush3.msra.mxu1 %v3508_v62 }
 0xd35   :  { %v6143_v3 = vpop.f32.mrf.mxu0 }
 0xd36   :  { %v3279_v61 = vmul.f32 %v6143_v3, %v3277_v12  ;;  %v6157_v48 = vpop.f32.mrf.mxu1 }
 0xd37   :  { %v3255_v11 = vpop.f32.mrf.mxu0  ;;  %v3376_v47 = vmul.f32 %v6157_v48, %v3374_v45 }
 0xd38   :  { %v3278_v20 = vmul.f32 %v3277_v12, %v3255_v11  ;;  %v3352_v51 = vpop.f32.mrf.mxu1  ;;  %v3283_v50 = vadd.f32 %v3279_v61, %v3186_v1 }
 0xd39   :  { %v6146_v38 = vpop.f32.mrf.mxu0  ;;  %v3375_v39 = vmul.f32 %v3374_v45, %v3352_v51 }
 0xd3a   :  { %v3281_v53 = vmul.f32 %v6146_v38, %v3277_v12  ;;  %v6160_v37 = vpop.f32.mrf.mxu1  ;;  %v3282_v8 = vadd.f32 %v3278_v20, %v3185_v31  ;;  %v3380_v42 = vadd.f32 %v3376_v47, %v3283_v50 }
 0xd3b   :  { %v3265_v32 = vpop.f32.mrf.mxu0  ;;  %v3378_v59 = vmul.f32 %v6160_v37, %v3374_v45 }
 0xd3c   :  { %v3280_v30 = vmul.f32 %v3277_v12, %v3265_v32  ;;  %v3362_v13 = vpop.f32.mrf.mxu1  ;;  %v3285_v6 = vadd.f32 %v3281_v53, %v3188_v16  ;;  %v3379_v28 = vadd.f32 %v3375_v39, %v3282_v8 }
 0xd3d   :  { %v6171_v34 = vpop.f32.mrf.mxu0  ;;  %v3377_v22 = vmul.f32 %v3374_v45, %v3362_v13  ;;  %v5709_v13 = vmul.f32 -1.442695, %v7254_v43 }
 0xd3e   :  { %v3473_v57 = vmul.f32 %v6171_v34, %v3471_v60  ;;  %v3284_v24 = vadd.f32 %v3280_v30, %v3187_v0  ;;  %v3382_v41 = vadd.f32 %v3378_v59, %v3285_v6  ;;  %v5708_v0 = vmul.f32 -1.442695, %v7260_v14  ;;  %v3609_v6 = vld [vmem:[#allocation2 + $0x7e0] sm:$0xff] }
 0xd3f   :  { %v3449_v36 = vpop.f32.mrf.mxu0  ;;  %v5711_v34 = vmul.f32 -1.442695, %v7246_v56  ;;  %6189 = vmatprep.subr.mxu0 %v3609_v6 }
 0xd40   :  { %v3477_v62 = vadd.f32 %v3473_v57, %v3380_v42  ;;  %v3472_v55 = vmul.f32 %v3471_v60, %v3449_v36  ;;  %v3381_v49 = vadd.f32 %v3377_v22, %v3284_v24  ;;  %v5710_v42 = vmul.f32 -1.442695, %v7248_v35  ;;  %6190 = vmatpush3.msra.mxu0 %v3609_v6  ;;  %v7331_v24 = vld [vmem:[#allocation2 + $0x888] sm:$0xff] }
 0xd41   :  { %v6174_v5 = vpop.f32.mrf.mxu0  ;;  %3974 = vmatprep.subr.mxu0 %v7331_v24 }
 0xd42   :  { %v5653_v33 = vmul.f32 -1.442695, %v3477_v62  ;;  %v3476_v17 = vadd.f32 %v3472_v55, %v3379_v28  ;;  %v3475_v3 = vmul.f32 %v6174_v5, %v3471_v60 }
 0xd43   :  { %v3459_v12 = vpop.f32.mrf.mxu0 }
 0xd44   :  { %6330 = vpow2.f32 %v5653_v33  ;;  %v5652_v15 = vmul.f32 -1.442695, %v3476_v17  ;;  %v3479_v61 = vadd.f32 %v3475_v3, %v3382_v41  ;;  %v3474_v48 = vmul.f32 %v3471_v60, %v3459_v12 }
 0xd46   :  { %6332 = vpow2.f32 %v5652_v15  ;;  %v5655_v11 = vmul.f32 -1.442695, %v3479_v61  ;;  %v3478_v1 = vadd.f32 %v3474_v48, %v3381_v49 }
 0xd48   :  { %6334 = vpow2.f32 %v5655_v11  ;;  %v5654_v45 = vmul.f32 -1.442695, %v3478_v1 }
 0xd4a   :  { %6336 = vpow2.f32 %v5654_v45 }
 0xd51   :  { %v6331_v20 = vpop.eup %6330 }
 0xd52   :  { %v3493_v63 = vadd.f32 1.0, %v6331_v20  ;;  %v31_v20 = vld [vmem:[#allocation2 + $0x260] sm:$0xff] }
 0xd53   :  { %v6333_v51 = vpop.eup %6332 }
 0xd54   :  { %v3492_v31 = vadd.f32 1.0, %v6333_v51  ;;  %6338 = vrcp.f32 %v3493_v63  ;;  %v29_v63 = vld [vmem:[#allocation2 + $0x240] sm:$0xff] }
 0xd55   :  { %v6335_v38 = vpop.eup %6334 }
 0xd56   :  { %6340 = vrcp.f32 %v3492_v31  ;;  %v3495_v40 = vadd.f32 1.0, %v6335_v38  ;;  %v7354_v31 = vld [vmem:[#allocation2 + $0x880] sm:$0xff] }
 0xd57   :  { %v6337_v50 = vpop.eup %6336 }
 0xd58   :  { %v3494_v47 = vadd.f32 1.0, %v6337_v50  ;;  %6342 = vrcp.f32 %v3495_v40  ;;  %v7360_v40 = vld [vmem:[#allocation2 + $0x870] sm:$0xff] }
 0xd5a   :  { %6344 = vrcp.f32 %v3494_v47 }
 0xd5b   :  { %6346 = vpow2.f32 %v5709_v13 }
 0xd5c   :  { %6348 = vpow2.f32 %v5708_v0 }
 0xd5d   :  { %6350 = vpow2.f32 %v5711_v34 }
 0xd5e   :  { %6352 = vpow2.f32 %v5710_v42 }
 0xd61   :  { %v6339_v53 = vpop.eup %6338 }
 0xd62   :  { %v7312_v32 = vmul.f32 %v6339_v53, %v3477_v62 }
 0xd63   :  { %v6341_v37 = vpop.eup %6340 }
 0xd64   :  { %v7310_v60 = vmul.f32 %v6341_v37, %v3476_v17 }
 0xd65   :  { %v6343_v8 = vpop.eup %6342 }
 0xd66   :  { %6183 = vmatprep.mubr.msk.f32.mxu1 %vm37_vm0, %v7310_v60  ;;  %v7320_v30 = vmul.f32 %v6343_v8, %v3479_v61 }
 0xd67   :  { %v6345_v16 = vpop.eup %6344  ;;  %6184 = vmatmul.mubr.msk.f32.vlgmr.msra.gmra.mxu1 %vm37_vm0, %v7312_v32 }
 0xd68   :  { %v7318_v39 = vmul.f32 %v6345_v16, %v3478_v1  ;;  %7894 = vst [vmem:[#allocation14_spill] sm:$0xff] %v7320_v30  ;;  %v6347_v59 = vpop.eup %6346 }
 0xd69   :  { %v6349_v57 = vpop.eup %6348  ;;  %v5107_v22 = vadd.f32 1.0, %v6347_v59 }
 0xd6a   :  { %6186 = vmatprep.mubr.msk.f32.mxu1 %vm37_vm0, %v7318_v39  ;;  %v6351_v36 = vpop.eup %6350  ;;  %v5106_v28 = vadd.f32 1.0, %v6349_v57 }
 0xd6b   :  { %6187 = vmatmul.mubr.msk.f32.gmra.mxu1 %vm37_vm0, %v7320_v30  ;;  %v6353_v62 = vpop.eup %6352  ;;  %6354 = vrcp.f32 %v5107_v22  ;;  %v5109_v55 = vadd.f32 1.0, %v6351_v36 }
 0xd6c   :  { %3876 = vmatprep.mubr.f32.mxu1 %v7890_v44  ;;  %6356 = vrcp.f32 %v5106_v28  ;;  %v5108_v41 = vadd.f32 1.0, %v6353_v62 }
 0xd6d   :  { %6358 = vrcp.f32 %v5109_v55 }
 0xd6e   :  { %6360 = vrcp.f32 %v5108_v41 }
 0xd78   :  { %v6355_v49 = vpop.eup %6354 }
 0xd79   :  { %v6357_v12 = vpop.eup %6356  ;;  %v5119_v15 = vmul.f32 %v6355_v49, %v7254_v43  ;;  %v32_v43 = vld [vmem:[#allocation2 + $0x270] sm:$0xff] }
 0xd7a   :  { %v6359_v61 = vpop.eup %6358  ;;  %v5118_v48 = vmul.f32 %v6357_v12, %v7260_v14  ;;  %v30_v14 = vld [vmem:[#allocation2 + $0x250] sm:$0xff] }
 0xd7b   :  { %v6361_v11 = vpop.eup %6360  ;;  %v5121_v1 = vmul.f32 %v6359_v61, %v7246_v56 }
 0xd7c   :  { %v5120_v45 = vmul.f32 %v6361_v11, %v7248_v35  ;;  %v7357_v35 = vld [vmem:[#allocation2 + $0x878] sm:$0xff] }
 0xe27   :  { %v6185_v5 = vpop.f32.mrf.mxu1 }
 0xe28   :  { %3617 = vrot.lane.b32.xlu0 %v6185_v5, %s6490_s0 }
 0xe29   :  { %v3590_v33 = vpop.f32.mrf.mxu1 }
 0xe2a   :  { %3615 = vrot.lane.b32.xlu1 %v3590_v33, %s6490_s0 }
 0xe2b   :  { %v6188_v17 = vpop.f32.mrf.mxu1 }
 0xe2c   :  { %3621 = vrot.lane.b32.xlu0 %v6188_v17, %s6490_s0 }
 0xe2d   :  { %v3600_v3 = vpop.f32.mrf.mxu1 }
 0xe2e   :  { %3619 = vrot.lane.b32.xlu1 %v3600_v3, %s6490_s0 }
 0xe30   :  { %4861 = vrot.lane.b32.xlu0 %v6185_v5, %s6492_s23 }
 0xe32   :  { %4859 = vrot.lane.b32.xlu1 %v3590_v33, %s6492_s23 }
 0xe34   :  { %4865 = vrot.lane.b32.xlu0 %v6188_v17, %s6492_s23 }
 0xe36   :  { %4863 = vrot.lane.b32.xlu1 %v3600_v3, %s6492_s23 }
 0xe38   :  { %5128 = vrot.lane.b32.xlu0 %v5119_v15, %s6490_s0 }
 0xe3a   :  { %5126 = vrot.lane.b32.xlu1 %v5118_v48, %s6490_s0 }
 0xe3c   :  { %5132 = vrot.lane.b32.xlu0 %v5121_v1, %s6490_s0  ;;  %v3795_v1 = vld [vmem:[#allocation2 + $0x8c8] sm:$0xff] }
 0xe3d   :  { %3836 = vmatprep.subr.mxu1 %v3795_v1 }
 0xe3e   :  { %5130 = vrot.lane.b32.xlu1 %v5120_v45, %s6490_s0  ;;  %v7396_v45 = vld [vmem:[#allocation2 + $0x8c0] sm:$0xff] }
 0xe3f   :  { %3837 = vmatpush1.msra.mxu1 %v7396_v45 }
 0xe40   :  { %171 = vrot.lane.b32.xlu0 %v31_v20, %s6494_s24  ;;  %v7399_v20 = vld [vmem:[#allocation2 + $0x8b8] sm:$0xff] }
 0xe41   :  { %3838 = vmatprep.subr.mxu1 %v7399_v20 }
 0xe42   :  { %173 = vrot.lane.b32.xlu1 %v32_v43, %s6494_s24  ;;  %v7402_v43 = vld [vmem:[#allocation2 + $0x8b0] sm:$0xff] }
 0xe43   :  { %3839 = vmatpush1.msra.mxu1 %v7402_v43 }
 0xe44   :  { %167 = vrot.lane.b32.xlu0 %v29_v63, %s6494_s24  ;;  %v7405_v63 = vld [vmem:[#allocation2 + $0x8a8] sm:$0xff] }
 0xe45   :  { %3840 = vmatprep.subr.mxu1 %v7405_v63 }
 0xe46   :  { %169 = vrot.lane.b32.xlu1 %v30_v14, %s6494_s24  ;;  %v7408_v14 = vld [vmem:[#allocation2 + $0x8a0] sm:$0xff] }
 0xe47   :  { %3841 = vmatpush1.msra.mxu1 %v7408_v14 }
 0xe9a   :  { %v3618_v56 = vpop.permute.xlu0 %3617 }
 0xe9c   :  { %v3616_v51 = vpop.permute.xlu1 %3615 }
 0xe9d   :  { %6191 = vmatprep.mubr.msk.f32.mxu0 %vm1131_vm2, %v3616_v51  ;;  %v7412_v51 = vld [vmem:[#allocation2 + $0x890] sm:$0xff] }
 0xe9e   :  { %6192 = vmatmul.mubr.msk.f32.vlgmr.msra.gmra.mxu0 %vm1131_vm2, %v3618_v56  ;;  %v3622_v38 = vpop.permute.xlu0 %3621  ;;  %v7410_v56 = vld [vmem:[#allocation2 + $0x898] sm:$0xff] }
 0xe9f   :  { %3975 = vmatpush1.msra.mxu0 %v7354_v31  ;;  %3842 = vmatprep.subr.mxu1 %v7410_v56 }
 0xea0   :  { %v3620_v50 = vpop.permute.xlu1 %3619  ;;  %3976 = vmatprep.subr.mxu0 %v7357_v35  ;;  %3843 = vmatpush1.msra.mxu1 %v7412_v51 }
 0xea1   :  { %6194 = vmatprep.mubr.msk.f32.mxu0 %vm1131_vm2, %v3620_v50  ;;  %3977 = vmatpush1.msra.mxu0 %v7360_v40 }
 0xea2   :  { %v7366_v47 = vpop.permute.xlu0 %4861  ;;  %6195 = vmatmul.mubr.msk.f32.gmra.mxu0 %vm1131_vm2, %v3622_v38  ;;  %4075 = vmatprep.subr.mxu1 %v3795_v1  ;;  %v3610_v38 = vld [vmem:[#allocation2 + $0x7f0] ss:$0 sm:$0xff] }
 0xea3   :  { %4010 = vmatprep.mubr.f32.mxu0 %v7890_v44 }
 0xea4   :  { %v7370_v53 = vpop.permute.xlu1 %4859 }
 0xea6   :  { %v7372_v37 = vpop.permute.xlu0 %4865  ;;  %5668 = vmatmul.mubr.msk.f32.vlgmr.msra.gmra.mxu0 %vm302_vm1, %v3590_v33 }
 0xea7   :  { %4016 = vmatprep.mubr.f32.mxu0 %v7890_v44 }
 0xea8   :  { %v7376_v8 = vpop.permute.xlu1 %4863 }
 0xeaa   :  { %v7378_v16 = vpop.permute.xlu0 %5128  ;;  %5669 = vmatmul.mubr.msk.f32.gmra.mxu0 %vm302_vm1, %v6185_v5 }
 0xeab   :  { %7895 = vst [vmem:[#allocation15_spill] sm:$0xff] %v7378_v16  ;;  %4022 = vmatprep.mubr.f32.mxu0 %v7890_v44 }
 0xeac   :  { %v7382_v13 = vpop.permute.xlu1 %5126 }
 0xead   :  { %7896 = vst [vmem:[#allocation16_spill] sm:$0xff] %v7382_v13 }
 0xeae   :  { %v7384_v0 = vpop.permute.xlu0 %5132  ;;  %5670 = vmatmul.mubr.msk.f32.gmra.mxu0 %vm302_vm1, %v3600_v3 }
 0xeaf   :  { %7897 = vst [vmem:[#allocation17_spill] sm:$0xff] %v7384_v0  ;;  %4028 = vmatprep.mubr.f32.mxu0 %v7890_v44 }
 0xeb0   :  { %v7388_v34 = vpop.permute.xlu1 %5130 }
 0xeb1   :  { %7898 = vst [vmem:[#allocation18_spill] sm:$0xff] %v7388_v34 }
 0xeb2   :  { %v172_v42 = vpop.permute.xlu0 %171  ;;  %5671 = vmatmul.mubr.msk.f32.gmra.mxu0 %vm302_vm1, %v6188_v17 }
 0xeb3   :  { %v268_v6 = vadd.f32 %v6592_v27, %v172_v42  ;;  %4212 = vmatprep.mubr.f32.mxu0 %v7890_v44 }
 0xeb4   :  { %v174_v59 = vpop.permute.xlu1 %173 }
 0xeb5   :  { %v5538_v57 = vmul.f32 -1.442695, %v268_v6  ;;  %v273_v22 = vadd.f32 %v6588_v25, %v174_v59 }
 0xeb6   :  { %v168_v36 = vpop.permute.xlu0 %167 }
 0xeb7   :  { %6362 = vpow2.f32 %v5538_v57  ;;  %v5539_v28 = vmul.f32 -1.442695, %v273_v22  ;;  %v258_v62 = vadd.f32 %v6584_v23, %v168_v36 }
 0xeb8   :  { %v170_v55 = vpop.permute.xlu1 %169 }
 0xeb9   :  { %6364 = vpow2.f32 %v5539_v28  ;;  %v5536_v5 = vmul.f32 -1.442695, %v258_v62  ;;  %v263_v41 = vadd.f32 %v6580_v21, %v170_v55 }
 0xebb   :  { %6366 = vpow2.f32 %v5536_v5  ;;  %v5537_v33 = vmul.f32 -1.442695, %v263_v41 }
 0xebd   :  { %6368 = vpow2.f32 %v5537_v33 }
 0xec4   :  { %v6363_v27 = vpop.eup %6362 }
 0xec5   :  { %v290_v17 = vadd.f32 1.0, %v6363_v27 }
 0xec6   :  { %v6365_v3 = vpop.eup %6364 }
 0xec7   :  { %6370 = vrcp.f32 %v290_v17  ;;  %v291_v49 = vadd.f32 1.0, %v6365_v3 }
 0xec8   :  { %v6367_v12 = vpop.eup %6366 }
 0xec9   :  { %6372 = vrcp.f32 %v291_v49  ;;  %v288_v25 = vadd.f32 1.0, %v6367_v12 }
 0xeca   :  { %v6369_v15 = vpop.eup %6368 }
 0xecb   :  { %6374 = vrcp.f32 %v288_v25  ;;  %v289_v61 = vadd.f32 1.0, %v6369_v15 }
 0xecd   :  { %6376 = vrcp.f32 %v289_v61 }
 0xed4   :  { %v6371_v23 = vpop.eup %6370 }
 0xed5   :  { %5284 = vrot.lane.b32.xlu0 %v6371_v23, %s6495_s25 }
 0xed6   :  { %v6373_v48 = vpop.eup %6372 }
 0xed7   :  { %5286 = vrot.lane.b32.xlu1 %v6373_v48, %s6495_s25 }
 0xed8   :  { %v6375_v21 = vpop.eup %6374 }
 0xed9   :  { %5280 = vrot.lane.b32.xlu0 %v6375_v21, %s6495_s25 }
 0xeda   :  { %v6377_v11 = vpop.eup %6376 }
 0xedb   :  { %5282 = vrot.lane.b32.xlu1 %v6377_v11, %s6495_s25 }
 0xf5e   :  { %v6193_v50 = vpop.f32.mrf.mxu0 }
 0xf5f   :  { %v7417_v42 = vadd.f32 %v6193_v50, %v3610_v38 }
 0xf60   :  { %v3697_v6 = vpop.f32.mrf.mxu0 }
 0xf61   :  { %v3729_v59 = vand.u32 2147483647, %v7417_v42  ;;  %v3698_v57 = vadd.f32 %v3697_v6, %v3610_v38  ;;  %vm3721_vm15 = vcmp.ne.f32.partialorder %v7417_v42, %v7417_v42 }
 0xf62   :  { %v6196_v22 = vpop.f32.mrf.mxu0 }
 0xf63   :  { %v3733_v36 = vsub.f32 0.0, %v3729_v59  ;;  %v3728_v28 = vand.u32 2147483647, %v3698_v57  ;;  %v7420_v62 = vadd.f32 %v6196_v22, %v3610_v38  ;;  %vm3720_vm13 = vcmp.ne.f32.partialorder %v3698_v57, %v3698_v57 }
 0xf64   :  { %v3707_v55 = vpop.f32.mrf.mxu0 }
 0xf65   :  { %v3738_v5 = vmul.f32 1.442695, %v3733_v36  ;;  %v3732_v41 = vsub.f32 0.0, %v3728_v28  ;;  %v7422_v33 = vadd.f32 %v3707_v55, %v3610_v38  ;;  %v3731_v27 = vand.u32 2147483647, %v7420_v62 }
 0xf66   :  { %vm3723_vm5 = vcmp.ne.f32.partialorder %v7420_v62, %v7420_v62 }
 0xf67   :  { %6378 = vpow2.f32 %v3738_v5  ;;  %v3736_v17 = vmul.f32 1.442695, %v3732_v41  ;;  %v3730_v3 = vand.u32 2147483647, %v7422_v33  ;;  %v3735_v49 = vsub.f32 0.0, %v3731_v27 }
 0xf68   :  { %vm3722_vm4 = vcmp.ne.f32.partialorder %v7422_v33, %v7422_v33 }
 0xf69   :  { %6380 = vpow2.f32 %v3736_v17  ;;  %v3734_v12 = vsub.f32 0.0, %v3730_v3  ;;  %v3742_v25 = vmul.f32 1.442695, %v3735_v49  ;;  %v3716_v3 = vmax.f32 %v3698_v57, 0.0 }
 0xf6b   :  { %v3740_v15 = vmul.f32 1.442695, %v3734_v12  ;;  %6382 = vpow2.f32 %v3742_v25 }
 0xf6d   :  { %6384 = vpow2.f32 %v3740_v15 }
 0xf74   :  { %v6379_v61 = vpop.eup %6378 }
 0xf75   :  { %v3753_v23 = vadd.f32 1.0, %v6379_v61  ;;  %v3756_v6 = vmul.f32 -0.5, %v6379_v61  ;;  %v3759_v41 = vand.u32 2147483647, %v6379_v61 }
 0xf76   :  { %v6381_v48 = vpop.eup %6380 }
 0xf77   :  { %v3744_v21 = vadd.f32 1.0, %v6381_v48  ;;  %6386 = vlog2.f32 %v3753_v23  ;;  %v3747_v59 = vmul.f32 -0.5, %v6381_v48  ;;  %v3757_v22 = vadd.f32 1.0, %v3756_v6 }
 0xf78   :  { %v6383_v11 = vpop.eup %6382  ;;  %v3750_v5 = vand.u32 2147483647, %v6381_v48  ;;  %vm3760_vm12 = vcmp.lt.f32.partialorder %v3759_v41, 0.0004427343 }
 0xf79   :  { %6388 = vlog2.f32 %v3744_v21  ;;  %v3771_v38 = vadd.f32 1.0, %v6383_v11  ;;  %v3748_v36 = vadd.f32 1.0, %v3747_v59  ;;  %v3758_v49 = vmul.f32 %v6379_v61, %v3757_v22 }
 0xf7a   :  { %v6385_v1 = vpop.eup %6384  ;;  %v3774_v23 = vmul.f32 -0.5, %v6383_v11  ;;  %vm3751_vm11 = vcmp.lt.f32.partialorder %v3750_v5, 0.0004427343  ;;  %v3717_v59 = vmax.f32 %v7417_v42, 0.0 }
 0xf7b   :  { %v3762_v50 = vadd.f32 1.0, %v6385_v1  ;;  %6390 = vlog2.f32 %v3771_v38  ;;  %v3765_v28 = vmul.f32 -0.5, %v6385_v1  ;;  %v3749_v25 = vmul.f32 %v6381_v48, %v3748_v36  ;;  %v3902_v5 = vld [vmem:[#allocation2 + $0x800] ss:$8 sm:$0x3] }
 0xf7c   :  { %v3768_v21 = vand.u32 2147483647, %v6385_v1  ;;  %v3775_v13 = vadd.f32 1.0, %v3774_v23  ;;  %v3777_v48 = vand.u32 2147483647, %v6383_v11 }
 0xf7d   :  { %6392 = vlog2.f32 %v3762_v50  ;;  %v3766_v15 = vadd.f32 1.0, %v3765_v28  ;;  %v3718_v28 = vmax.f32 %v7422_v33, 0.0 }
 0xf7e   :  { %vm3769_vm14 = vcmp.lt.f32.partialorder %v3768_v21, 0.0004427343  ;;  %vm3778_vm3 = vcmp.lt.f32.partialorder %v3777_v48, 0.0004427343 }
 0xf84   :  { %v6387_v55 = vpop.eup %6386 }
 0xf85   :  { %v3755_v27 = vmul.f32 0.6931472, %v6387_v55  ;;  %v3767_v55 = vmul.f32 %v6385_v1, %v3766_v15  ;;  %v3776_v1 = vmul.f32 %v6383_v11, %v3775_v13 }
 0xf86   :  { %v6389_v17 = vpop.eup %6388 }
 0xf87   :  { %v3746_v12 = vmul.f32 0.6931472, %v6389_v17  ;;  %v3761_v0 = vsel %vm3760_vm12, %v3758_v49, %v3755_v27  ;;  %v3911_v49 = vrot.slane %v3902_v5, %v6667_v46 }
 0xf88   :  { %v6391_v38 = vpop.eup %6390  ;;  %v3781_v61 = vadd.f32 %v3761_v0, %v3717_v59 }
 0xf89   :  { %v3752_v50 = vsel %vm3751_vm11, %v3749_v25, %v3746_v12  ;;  %v3773_v36 = vmul.f32 0.6931472, %v6391_v38 }
 0xf8a   :  { %v6393_v6 = vpop.eup %6392  ;;  %v3780_v34 = vadd.f32 %v3752_v50, %v3716_v3  ;;  %v3785_v0 = vsel %vm3721_vm15, %v7417_v42, %v3781_v61  ;;  %v3907_v3 = vrot.slane %v3902_v5, %v6673_v54 }
 0xf8b   :  { %v3764_v16 = vmul.f32 0.6931472, %v6393_v6 }
 0xf8c   :  { %v3784_v2 = vsel %vm3720_vm13, %v3698_v57, %v3780_v34  ;;  %v3719_v57 = vmax.f32 %v7420_v62, 0.0 }
 0xf8d   :  { %5664 = vmatmul.mubr.msk.f32.vlgmr.msra.gmra.mxu1 %vm37_vm0, %v3784_v2  ;;  %v3770_v22 = vsel %vm3769_vm14, %v3767_v55, %v3764_v16  ;;  %v3779_v16 = vsel %vm3778_vm3, %v3776_v1, %v3773_v36 }
 0xf8e   :  { %3882 = vmatprep.mubr.f32.mxu1 %v7890_v44  ;;  %4076 = vmatpush1.msra.mxu1 %v7396_v45  ;;  %v3782_v34 = vadd.f32 %v3770_v22, %v3718_v28  ;;  %v3783_v45 = vadd.f32 %v3779_v16, %v3719_v57 }
 0xf8f   :  { %4077 = vmatprep.subr.mxu1 %v7399_v20 }
 0xf90   :  { %4078 = vmatpush1.msra.mxu1 %v7402_v43  ;;  %v3786_v13 = vsel %vm3722_vm4, %v7422_v33, %v3782_v34  ;;  %v3787_v20 = vsel %vm3723_vm5, %v7420_v62, %v3783_v45  ;;  %v4035_v43 = vmul.f32 %v3784_v2, %v7310_v60 }
 0xf91   :  { %5665 = vmatmul.mubr.msk.f32.gmra.mxu1 %vm37_vm0, %v3785_v0  ;;  %4079 = vmatprep.subr.mxu1 %v7405_v63  ;;  %v4036_v63 = vmul.f32 %v3785_v0, %v7312_v32 }
 0xf92   :  { %3888 = vmatprep.mubr.f32.mxu1 %v7890_v44  ;;  %4080 = vmatpush1.msra.mxu1 %v7408_v14  ;;  %v4037_v14 = vmul.f32 %v3786_v13, %v7318_v39 }
 0xf93   :  { %4081 = vmatprep.subr.mxu1 %v7410_v56  ;;  %v4038_v56 = vmul.f32 %v3787_v20, %v7320_v30 }
 0xf94   :  { %4082 = vmatpush1.msra.mxu1 %v7412_v51  ;;  %v7465_v51 = vpop.f32.mrf.mxu0 }
 0xf95   :  { %5666 = vmatmul.mubr.msk.f32.gmra.mxu1 %vm37_vm0, %v3786_v13 }
 0xf96   :  { %3894 = vmatprep.mubr.f32.mxu1 %v7890_v44  ;;  %v7467_v33 = vpop.f32.mrf.mxu0 }
 0xf98   :  { %v4018_v27 = vpop.f32.mrf.mxu0 }
 0xf99   :  { %5667 = vmatmul.mubr.msk.f32.gmra.mxu1 %vm37_vm0, %v3787_v20 }
 0xf9a   :  { %4115 = vmatprep.mubr.f32.mxu1 %v7890_v44  ;;  %v4020_v23 = vpop.f32.mrf.mxu0 }
 0xf9c   :  { %v4024_v28 = vpop.f32.mrf.mxu0 }
 0xf9d   :  { %5672 = vmatmul.mubr.msk.f32.vlgmr.msra.gmra.mxu1 %vm37_vm0, %v4035_v43 }
 0xf9e   :  { %4121 = vmatprep.mubr.f32.mxu1 %v7890_v44  ;;  %v4026_v13 = vpop.f32.mrf.mxu0 }
 0xfa1   :  { %5673 = vmatmul.mubr.msk.f32.gmra.mxu1 %vm37_vm0, %v4036_v63  ;;  %v4030_v63 = vpop.f32.mrf.mxu0 }
 0xfa2   :  { %4127 = vmatprep.mubr.f32.mxu1 %v7890_v44 }
 0xfa5   :  { %5674 = vmatmul.mubr.msk.f32.gmra.mxu1 %vm37_vm0, %v4037_v14 }
 0xfa6   :  { %4133 = vmatprep.mubr.f32.mxu1 %v7890_v44 }
 0xfa9   :  { %5675 = vmatmul.mubr.msk.f32.gmra.mxu1 %vm37_vm0, %v4038_v56 }
 0xfaa   :  { %4317 = vmatprep.mubr.f32.mxu1 %v7890_v44 }
0x104d   :  { %v3878_v2 = vpop.f32.mrf.mxu1 }
0x104e   :  { %v3914_v1 = vmul.f32 %v3907_v3, %v3878_v2  ;;  %v4032_v2 = vpop.f32.mrf.mxu0 }
0x104f   :  { %v3880_v42 = vpop.f32.mrf.mxu1 }
0x1050   :  { %v3915_v48 = vmul.f32 %v3911_v49, %v3880_v42  ;;  %v3922_v45 = vmul.f32 1.442695, %v3914_v1 }
0x1051   :  { %v3884_v62 = vpop.f32.mrf.mxu1 }
0x1052   :  { %v3916_v59 = vmul.f32 %v3907_v3, %v3884_v62  ;;  %v3924_v57 = vmul.f32 1.442695, %v3915_v48 }
0x1053   :  { %v3886_v11 = vpop.f32.mrf.mxu1 }
0x1054   :  { %v3917_v50 = vmul.f32 %v3911_v49, %v3886_v11  ;;  %v3926_v46 = vmul.f32 1.442695, %v3916_v59 }
0x1055   :  { %v3890_v41 = vpop.f32.mrf.mxu1 }
0x1056   :  { %v3918_v21 = vmul.f32 %v3907_v3, %v3890_v41  ;;  %v3928_v34 = vmul.f32 1.442695, %v3917_v50 }
0x1057   :  { %v3892_v17 = vpop.f32.mrf.mxu1 }
0x1058   :  { %v3919_v25 = vmul.f32 %v3911_v49, %v3892_v17  ;;  %v3930_v0 = vmul.f32 1.442695, %v3918_v21 }
0x1059   :  { %v3896_v12 = vpop.f32.mrf.mxu1 }
0x105a   :  { %v3920_v15 = vmul.f32 %v3907_v3, %v3896_v12  ;;  %v3932_v22 = vmul.f32 1.442695, %v3919_v25 }
0x105b   :  { %v3898_v38 = vpop.f32.mrf.mxu1 }
0x105c   :  { %v3921_v6 = vmul.f32 %v3911_v49, %v3898_v38  ;;  %v3934_v55 = vmul.f32 1.442695, %v3920_v15 }
0x105d   :  { %v4117_v61 = vpop.f32.mrf.mxu1 }
0x105e   :  { %v3936_v36 = vmul.f32 1.442695, %v3921_v6  ;;  %v7511_v6 = vmul.f32 %v4117_v61, %v7465_v51 }
0x105f   :  { %v4119_v54 = vpop.f32.mrf.mxu1 }
0x1060   :  { %6394 = vpow2.f32 %v3936_v36  ;;  %v7504_v50 = vmul.f32 %v4119_v54, %v7467_v33  ;;  %v6446_v33 = vld [vmem:[#allocation2] sm:$0xff] }
0x1061   :  { %6396 = vpow2.f32 %v3934_v55  ;;  %v4123_v16 = vpop.f32.mrf.mxu1 }
0x1062   :  { %6398 = vpow2.f32 %v3932_v22  ;;  %v7497_v21 = vmul.f32 %v4123_v16, %v4018_v27 }
0x1063   :  { %6400 = vpow2.f32 %v3930_v0  ;;  %v4125_v20 = vpop.f32.mrf.mxu1 }
0x1064   :  { %6402 = vpow2.f32 %v3928_v34  ;;  %v7491_v25 = vmul.f32 %v4125_v20, %v4020_v23  ;;  %v7900_v20 = vld [vmem:[#allocation9_spill] sm:$0xff] }
0x1065   :  { %6404 = vpow2.f32 %v3926_v46  ;;  %v4129_v43 = vpop.f32.mrf.mxu1  ;;  %v7899_v46 = vld [vmem:[#allocation10_spill] sm:$0xff] }
0x1066   :  { %6406 = vpow2.f32 %v3924_v57  ;;  %v7485_v49 = vmul.f32 %v4129_v43, %v4024_v28 }
0x1067   :  { %6408 = vpow2.f32 %v3922_v45  ;;  %v4131_v14 = vpop.f32.mrf.mxu1 }
0x1068   :  { %v7479_v17 = vmul.f32 %v4131_v14, %v4026_v13 }
0x1069   :  { %v4135_v56 = vpop.f32.mrf.mxu1 }
0x106a   :  { %v7475_v5 = vmul.f32 %v4135_v56, %v4030_v63 }
0x106b   :  { %v4137_v42 = vpop.f32.mrf.mxu1 }
0x106c   :  { %v7471_v62 = vmul.f32 %v4137_v42, %v4032_v2 }
0x106d   :  { %v7473_v11 = vpop.eup %6394 }
0x106e   :  { %v7477_v41 = vpop.eup %6396  ;;  %4172 = vmatprep.subr.mxu0 %v7471_v62  ;;  %4277 = vmatprep.subr.mxu1 %v7473_v11 }
0x106f   :  { %v7483_v3 = vpop.eup %6398  ;;  %4173 = vmatpush1.msra.mxu0 %v7475_v5  ;;  %4278 = vmatpush1.msra.mxu1 %v7477_v41 }
0x1070   :  { %v7489_v12 = vpop.eup %6400  ;;  %4174 = vmatprep.subr.mxu0 %v7479_v17  ;;  %4279 = vmatprep.subr.mxu1 %v7483_v3 }
0x1071   :  { %v7495_v15 = vpop.eup %6402  ;;  %4175 = vmatpush1.msra.mxu0 %v7485_v49  ;;  %4280 = vmatpush1.msra.mxu1 %v7489_v12 }
0x1072   :  { %v7501_v38 = vpop.eup %6404  ;;  %4176 = vmatprep.subr.mxu0 %v7491_v25  ;;  %4281 = vmatprep.subr.mxu1 %v7495_v15 }
0x1073   :  { %v7508_v23 = vpop.eup %6406  ;;  %4177 = vmatpush1.msra.mxu0 %v7497_v21  ;;  %4282 = vmatpush1.msra.mxu1 %v7501_v38 }
0x1074   :  { %v7515_v27 = vpop.eup %6408  ;;  %4178 = vmatprep.subr.mxu0 %v7504_v50  ;;  %4283 = vmatprep.subr.mxu1 %v7508_v23 }
0x1075   :  { %4179 = vmatpush1.msra.mxu0 %v7511_v6  ;;  %4284 = vmatpush1.msra.mxu1 %v7515_v27 }
0x1076   :  { %5676 = vmatmul.mubr.msk.f32.vlgmr.msra.gmra.mxu0 %vm37_vm0, %v6446_v33  ;;  %5680 = vmatmul.mubr.msk.f32.vlgmr.msra.gmra.mxu1 %vm37_vm0, %v6446_v33 }
0x1077   :  { %4218 = vmatprep.mubr.f32.mxu0 %v7890_v44  ;;  %4323 = vmatprep.mubr.f32.mxu1 %v7890_v44 }
0x107a   :  { %5677 = vmatmul.mubr.msk.f32.gmra.mxu0 %vm37_vm0, %v7270_v10  ;;  %5681 = vmatmul.mubr.msk.f32.gmra.mxu1 %vm37_vm0, %v7270_v10 }
0x107b   :  { %4224 = vmatprep.mubr.f32.mxu0 %v7890_v44  ;;  %4329 = vmatprep.mubr.f32.mxu1 %v7890_v44 }
0x107e   :  { %5678 = vmatmul.mubr.msk.f32.gmra.mxu0 %vm37_vm0, %v7279_v52  ;;  %5682 = vmatmul.mubr.msk.f32.gmra.mxu1 %vm37_vm0, %v7279_v52 }
0x107f   :  { %4230 = vmatprep.mubr.f32.mxu0 %v7890_v44  ;;  %4335 = vmatprep.mubr.f32.mxu1 %v7890_v44 }
0x1082   :  { %5679 = vmatmul.mubr.msk.f32.gmra.mxu0 %vm37_vm0, %v7286_v26  ;;  %5683 = vmatmul.mubr.msk.f32.gmra.mxu1 %vm37_vm0, %v7286_v26 }
0x1083   :  { %4414 = vmatprep.mubr.f32.mxu0 %v7890_v44  ;;  %4519 = vmatprep.mubr.f32.mxu1 %v7890_v44 }
0x1136   :  { %v4214_v10 = vpop.f32.mrf.mxu0  ;;  %v4319_v51 = vpop.f32.mrf.mxu1 }
0x1137   :  { %v4237_v56 = vmul.f32 %v7515_v27, %v4214_v10 }
0x1138   :  { %v4216_v59 = vpop.f32.mrf.mxu0  ;;  %v4321_v55 = vpop.f32.mrf.mxu1 }
0x1139   :  { %v4238_v2 = vmul.f32 %v7508_v23, %v4216_v59 }
0x113a   :  { %v4220_v61 = vpop.f32.mrf.mxu0  ;;  %v4325_v52 = vpop.f32.mrf.mxu1 }
0x113c   :  { %v4222_v48 = vpop.f32.mrf.mxu0  ;;  %v4327_v22 = vpop.f32.mrf.mxu1 }
0x113e   :  { %v4226_v36 = vpop.f32.mrf.mxu0  ;;  %v4331_v28 = vpop.f32.mrf.mxu1 }
0x113f   :  { %v4241_v42 = vmul.f32 %v7489_v12, %v4226_v36  ;;  %v4332_v33 = vadd.f32 %v4331_v28, %v7900_v20  ;;  %v7902_v28 = vld [vmem:[#allocation12_spill] sm:$0xff] }
0x1140   :  { %v4228_v1 = vpop.f32.mrf.mxu0  ;;  %v4333_v0 = vpop.f32.mrf.mxu1 }
0x1141   :  { %v4242_v45 = vmul.f32 %v7483_v3, %v4228_v1  ;;  %v4334_v43 = vadd.f32 %v4333_v0, %v7900_v20 }
0x1142   :  { %v4232_v54 = vpop.f32.mrf.mxu0  ;;  %v4337_v34 = vpop.f32.mrf.mxu1 }
0x1143   :  { %v4243_v26 = vmul.f32 %v7477_v41, %v4232_v54  ;;  %v4338_v16 = vadd.f32 %v4337_v34, %v7899_v46  ;;  %v4240_v54 = vmul.f32 %v7495_v15, %v4222_v48  ;;  %v7901_v34 = vld [vmem:[#allocation11_spill] sm:$0xff]  ;;  %v4322_v48 = vadd.f32 %v4321_v55, %v7902_v28 }
0x1144   :  { %v4234_v57 = vpop.f32.mrf.mxu0  ;;  %v4339_v13 = vpop.f32.mrf.mxu1  ;;  %v4328_v30 = vadd.f32 %v4327_v22, %v7901_v34  ;;  %v4326_v10 = vadd.f32 %v4325_v52, %v7901_v34  ;;  %v7571_v22 = vadd.f32 %v4242_v45, %v7479_v17 }
0x1145   :  { %v4244_v63 = vmul.f32 %v7473_v11, %v4234_v57  ;;  %v4340_v14 = vadd.f32 %v4339_v13, %v7899_v46  ;;  %v4239_v46 = vmul.f32 %v7501_v38, %v4220_v61  ;;  %v7564_v59 = vadd.f32 %v4243_v26, %v7475_v5 }
0x1146   :  { %v7567_v36 = vmul.f32 %v7477_v41, %v4338_v16  ;;  %v7580_v5 = vadd.f32 %v4241_v42, %v7485_v49  ;;  %v7583_v41 = vmul.f32 %v7489_v12, %v4332_v33  ;;  %v7588_v17 = vadd.f32 %v4240_v54, %v7491_v25 }
0x1147   :  { %v7556_v1 = vadd.f32 %v4244_v63, %v7471_v62  ;;  %v7559_v0 = vmul.f32 %v7473_v11, %v4340_v14  ;;  %v7574_v62 = vmul.f32 %v7483_v3, %v4334_v43  ;;  %v4320_v11 = vadd.f32 %v4319_v51, %v7902_v28 }
0x1148   :  { %v7591_v3 = vmul.f32 %v7495_v15, %v4328_v30  ;;  %v7596_v49 = vadd.f32 %v4239_v46, %v7497_v21  ;;  %v7599_v12 = vmul.f32 %v7501_v38, %v4326_v10  ;;  %v7604_v25 = vadd.f32 %v4238_v2, %v7504_v50  ;;  %v6447_v38 = vld [vmem:[#allocation2 + $0x40] sm:$0xff]  ;;  %v6448_v50 = vld [vmem:[#allocation2 + $0x50] sm:$0xff] }
0x1149   :  { %4374 = vmatprep.subr.mxu0 %v7556_v1  ;;  %4479 = vmatprep.subr.mxu1 %v7559_v0  ;;  %v7607_v30 = vmul.f32 %v7508_v23, %v4322_v48  ;;  %v7612_v15 = vadd.f32 %v4237_v56, %v7511_v6  ;;  %v7615_v21 = vmul.f32 %v7515_v27, %v4320_v11  ;;  %v6449_v23 = vld [vmem:[#allocation2 + $0x60] sm:$0xff]  ;;  %v6450_v6 = vld [vmem:[#allocation2 + $0x70] sm:$0xff] }
0x114a   :  { %4375 = vmatpush1.msra.mxu0 %v7564_v59  ;;  %4480 = vmatpush1.msra.mxu1 %v7567_v36 }
0x114b   :  { %4376 = vmatprep.subr.mxu0 %v7571_v22  ;;  %4481 = vmatprep.subr.mxu1 %v7574_v62 }
0x114c   :  { %4377 = vmatpush1.msra.mxu0 %v7580_v5  ;;  %4482 = vmatpush1.msra.mxu1 %v7583_v41 }
0x114d   :  { %4378 = vmatprep.subr.mxu0 %v7588_v17  ;;  %4483 = vmatprep.subr.mxu1 %v7591_v3 }
0x114e   :  { %4379 = vmatpush1.msra.mxu0 %v7596_v49  ;;  %4484 = vmatpush1.msra.mxu1 %v7599_v12 }
0x114f   :  { %4380 = vmatprep.subr.mxu0 %v7604_v25  ;;  %4485 = vmatprep.subr.mxu1 %v7607_v30 }
0x1150   :  { %4381 = vmatpush1.msra.mxu0 %v7612_v15  ;;  %4486 = vmatpush1.msra.mxu1 %v7615_v21 }
0x1151   :  { %5684 = vmatmul.mubr.msk.f32.vlgmr.msra.gmra.mxu0 %vm37_vm0, %v6447_v38  ;;  %5688 = vmatmul.mubr.msk.f32.vlgmr.msra.gmra.mxu1 %vm37_vm0, %v6447_v38 }
0x1152   :  { %4420 = vmatprep.mubr.f32.mxu0 %v7890_v44  ;;  %4525 = vmatprep.mubr.f32.mxu1 %v7890_v44 }
0x1155   :  { %5685 = vmatmul.mubr.msk.f32.gmra.mxu0 %vm37_vm0, %v6448_v50  ;;  %5689 = vmatmul.mubr.msk.f32.gmra.mxu1 %vm37_vm0, %v6448_v50 }
0x1156   :  { %4426 = vmatprep.mubr.f32.mxu0 %v7890_v44  ;;  %4531 = vmatprep.mubr.f32.mxu1 %v7890_v44 }
0x1159   :  { %5686 = vmatmul.mubr.msk.f32.gmra.mxu0 %vm37_vm0, %v6449_v23  ;;  %5690 = vmatmul.mubr.msk.f32.gmra.mxu1 %vm37_vm0, %v6449_v23 }
0x115a   :  { %4432 = vmatprep.mubr.f32.mxu0 %v7890_v44  ;;  %4537 = vmatprep.mubr.f32.mxu1 %v7890_v44 }
0x115d   :  { %5687 = vmatmul.mubr.msk.f32.gmra.mxu0 %vm37_vm0, %v6450_v6  ;;  %5691 = vmatmul.mubr.msk.f32.gmra.mxu1 %vm37_vm0, %v6450_v6 }
0x115e   :  { %4616 = vmatprep.mubr.f32.mxu0 %v7890_v44  ;;  %4721 = vmatprep.mubr.f32.mxu1 %v7890_v44 }
0x1211   :  { %v4416_v27 = vpop.f32.mrf.mxu0  ;;  %v4521_v51 = vpop.f32.mrf.mxu1 }
0x1212   :  { %v4439_v28 = vmul.f32 %v4416_v27, %v7615_v21 }
0x1213   :  { %v4418_v55 = vpop.f32.mrf.mxu0  ;;  %v4523_v61 = vpop.f32.mrf.mxu1 }
0x1214   :  { %v4440_v48 = vmul.f32 %v4418_v55, %v7607_v30 }
0x1215   :  { %v4422_v52 = vpop.f32.mrf.mxu0  ;;  %v4527_v26 = vpop.f32.mrf.mxu1 }
0x1216   :  { %v4528_v27 = vadd.f32 %v4527_v26, %v7031_v29 }
0x1217   :  { %v4424_v16 = vpop.f32.mrf.mxu0  ;;  %v4529_v57 = vpop.f32.mrf.mxu1 }
0x1218   :  { %v4442_v50 = vmul.f32 %v4424_v16, %v7591_v3  ;;  %v4530_v23 = vadd.f32 %v4529_v57, %v7031_v29  ;;  %v4522_v29 = vadd.f32 %v4521_v51, %v7053_v58 }
0x1219   :  { %v4428_v13 = vpop.f32.mrf.mxu0  ;;  %v4533_v45 = vpop.f32.mrf.mxu1 }
0x121a   :  { %v4443_v11 = vmul.f32 %v4428_v13, %v7583_v41  ;;  %v4534_v38 = vadd.f32 %v4533_v45, %v7033_v7 }
0x121b   :  { %v4430_v20 = vpop.f32.mrf.mxu0  ;;  %v4535_v43 = vpop.f32.mrf.mxu1 }
0x121c   :  { %v4444_v54 = vmul.f32 %v4430_v20, %v7574_v62  ;;  %v4536_v34 = vadd.f32 %v4535_v43, %v7033_v7  ;;  %v4524_v7 = vadd.f32 %v4523_v61, %v7053_v58 }
0x121d   :  { %v4434_v63 = vpop.f32.mrf.mxu0  ;;  %v4539_v14 = vpop.f32.mrf.mxu1 }
0x121e   :  { %v4445_v56 = vmul.f32 %v4434_v63, %v7567_v36  ;;  %v4540_v2 = vadd.f32 %v4539_v14, %v7029_v9  ;;  %v7667_v16 = vadd.f32 %v4444_v54, %v7571_v22  ;;  %v7687_v22 = vmul.f32 %v4530_v23, %v7591_v3  ;;  %v6456_v23 = vld [vmem:[#allocation2 + $0x110] sm:$0xff] }
0x121f   :  { %v4436_v42 = vpop.f32.mrf.mxu0  ;;  %v4541_v33 = vpop.f32.mrf.mxu1  ;;  %v7711_v3 = vmul.f32 %v4522_v29, %v7615_v21  ;;  %v4997_v29 = vld [vmem:[#allocation2 + $0xa60] sm:$0xff] }
0x1220   :  { %v4446_v46 = vmul.f32 %v4436_v42, %v7559_v0  ;;  %v4542_v10 = vadd.f32 %v4541_v33, %v7029_v9  ;;  %v4441_v9 = vmul.f32 %v4422_v52, %v7599_v12  ;;  %v7660_v55 = vadd.f32 %v4445_v56, %v7564_v59 }
0x1221   :  { %v7663_v13 = vmul.f32 %v4540_v2, %v7567_v36  ;;  %v7679_v59 = vmul.f32 %v4534_v38, %v7583_v41  ;;  %v7684_v36 = vadd.f32 %v4442_v50, %v7588_v17  ;;  %v7703_v41 = vmul.f32 %v4524_v7, %v7607_v30  ;;  %v4985_v38 = vld [vmem:[#allocation2 + $0x9a0] sm:$0xff]  ;;  %v5000_v50 = vld [vmem:[#allocation2 + $0xa90] sm:$0xff] }
0x1222   :  { %v7652_v6 = vadd.f32 %v4446_v46, %v7556_v1  ;;  %v7655_v20 = vmul.f32 %v4542_v10, %v7559_v0  ;;  %v7670_v1 = vmul.f32 %v4536_v34, %v7574_v62  ;;  %v7676_v0 = vadd.f32 %v4443_v11, %v7580_v5  ;;  %v5003_v34 = vld [vmem:[#allocation2 + $0xac0] sm:$0xff]  ;;  %v5002_v10 = vld [vmem:[#allocation2 + $0xab0] sm:$0xff] }
0x1223   :  { %v7692_v58 = vadd.f32 %v4441_v9, %v7596_v49  ;;  %v7695_v62 = vmul.f32 %v4528_v27, %v7599_v12  ;;  %v7700_v5 = vadd.f32 %v4440_v48, %v7604_v25  ;;  %v7708_v17 = vadd.f32 %v4439_v28, %v7612_v15  ;;  %v6451_v49 = vld [vmem:[#allocation2 + $0xc0] sm:$0xff]  ;;  %v6452_v12 = vld [vmem:[#allocation2 + $0xd0] sm:$0xff] }
0x1224   :  { %4576 = vmatprep.subr.mxu0 %v7652_v6  ;;  %4681 = vmatprep.subr.mxu1 %v7655_v20  ;;  %v6453_v25 = vld [vmem:[#allocation2 + $0xe0] sm:$0xff]  ;;  %v4986_v48 = vld [vmem:[#allocation2 + $0x9b0] sm:$0xff] }
0x1225   :  { %4577 = vmatpush1.msra.mxu0 %v7660_v55  ;;  %4682 = vmatpush1.msra.mxu1 %v7663_v13  ;;  %v4987_v46 = vld [vmem:[#allocation2 + $0x9c0] sm:$0xff] }
0x1226   :  { %4578 = vmatprep.subr.mxu0 %v7667_v16  ;;  %4683 = vmatprep.subr.mxu1 %v7670_v1  ;;  %v6455_v28 = vld [vmem:[#allocation2 + $0x100] sm:$0xff] }
0x1227   :  { %4579 = vmatpush1.msra.mxu0 %v7676_v0  ;;  %4684 = vmatpush1.msra.mxu1 %v7679_v59  ;;  %v5001_v11 = vld [vmem:[#allocation2 + $0xaa0] sm:$0xff] }
0x1228   :  { %4580 = vmatprep.subr.mxu0 %v7684_v36  ;;  %4685 = vmatprep.subr.mxu1 %v7687_v22  ;;  %v4999_v9 = vld [vmem:[#allocation2 + $0xa80] sm:$0xff] }
0x1229   :  { %4581 = vmatpush1.msra.mxu0 %v7692_v58  ;;  %4686 = vmatpush1.msra.mxu1 %v7695_v62  ;;  %v4983_v27 = vld [vmem:[#allocation2 + $0x980] sm:$0xff] }
0x122a   :  { %4582 = vmatprep.subr.mxu0 %v7700_v5  ;;  %4687 = vmatprep.subr.mxu1 %v7703_v41  ;;  %v6457_v7 = vld [vmem:[#allocation2 + $0x120] sm:$0xff] }
0x122b   :  { %4583 = vmatpush1.msra.mxu0 %v7708_v17  ;;  %4688 = vmatpush1.msra.mxu1 %v7711_v3 }
0x122c   :  { %5692 = vmatmul.mubr.msk.f32.vlgmr.msra.gmra.mxu0 %vm37_vm0, %v6451_v49  ;;  %5696 = vmatmul.mubr.msk.f32.vlgmr.msra.gmra.mxu1 %vm37_vm0, %v6451_v49  ;;  %v4979_v49 = vld [vmem:[#allocation2 + $0x940] sm:$0xff] }
0x122d   :  { %4622 = vmatprep.mubr.f32.mxu0 %v7890_v44  ;;  %4727 = vmatprep.mubr.f32.mxu1 %v7890_v44 }
0x122e   :  { %4903 = vmatprep.subr.mxu1 %v7331_v24  ;;  %v6454_v24 = vld [vmem:[#allocation2 + $0xf0] sm:$0xff] }
0x122f   :  { %4904 = vmatpush1.msra.mxu1 %v7354_v31 }
0x1230   :  { %5693 = vmatmul.mubr.msk.f32.gmra.mxu0 %vm37_vm0, %v6452_v12  ;;  %5697 = vmatmul.mubr.msk.f32.gmra.mxu1 %vm37_vm0, %v6452_v12  ;;  %v4994_v12 = vld [vmem:[#allocation2 + $0xa30] sm:$0xff] }
0x1231   :  { %4628 = vmatprep.mubr.f32.mxu0 %v7890_v44  ;;  %4733 = vmatprep.mubr.f32.mxu1 %v7890_v44 }
0x1232   :  { %4905 = vmatprep.subr.mxu1 %v7357_v35 }
0x1233   :  { %4906 = vmatpush1.msra.mxu1 %v7360_v40 }
0x1234   :  { %5694 = vmatmul.mubr.msk.f32.gmra.mxu0 %vm37_vm0, %v6453_v25  ;;  %5698 = vmatmul.mubr.msk.f32.gmra.mxu1 %vm37_vm0, %v6453_v25  ;;  %v4978_v25 = vld [vmem:[#allocation2 + $0x930] sm:$0xff] }
0x1235   :  { %4634 = vmatprep.mubr.f32.mxu0 %v7890_v44  ;;  %4739 = vmatprep.mubr.f32.mxu1 %v7890_v44 }
0x1238   :  { %5695 = vmatmul.mubr.msk.f32.gmra.mxu0 %vm37_vm0, %v6454_v24  ;;  %5699 = vmatmul.mubr.msk.f32.gmra.mxu1 %vm37_vm0, %v6454_v24  ;;  %v4977_v24 = vld [vmem:[#allocation2 + $0x920] sm:$0xff] }
0x1239   :  { %4939 = vmatprep.mubr.f32.mxu1 %v7890_v44  ;;  %4818 = vmatprep.mubr.f32.mxu0 %v7890_v44 }
0x123c   :  { %5704 = vmatmul.mubr.msk.f32.vlgmr.msra.gmra.mxu1 %vm302_vm1, %v7370_v53 }
0x123d   :  { %4945 = vmatprep.mubr.f32.mxu1 %v7890_v44 }
0x1240   :  { %5705 = vmatmul.mubr.msk.f32.gmra.mxu1 %vm302_vm1, %v7366_v47 }
0x1241   :  { %4951 = vmatprep.mubr.f32.mxu1 %v7890_v44 }
0x1244   :  { %5706 = vmatmul.mubr.msk.f32.gmra.mxu1 %vm302_vm1, %v7376_v8 }
0x1245   :  { %4957 = vmatprep.mubr.f32.mxu1 %v7890_v44 }
0x1248   :  { %5707 = vmatmul.mubr.msk.f32.gmra.mxu1 %vm302_vm1, %v7372_v37 }
0x12ec   :  { %v4618_v31 = vpop.f32.mrf.mxu0 }
0x12ed   :  { %v4641_v14 = vmul.f32 %v4618_v31, %v7711_v3  ;;  %v4992_v31 = vld [vmem:[#allocation2 + $0xa10] sm:$0xff] }
0x12ee   :  { %v4620_v35 = vpop.f32.mrf.mxu0 }
0x12ef   :  { %v4642_v43 = vmul.f32 %v4620_v35, %v7703_v41  ;;  %v7785_v54 = vadd.f32 %v4641_v14, %v7708_v17  ;;  %v4995_v17 = vld [vmem:[#allocation2 + $0xa40] sm:$0xff]  ;;  %v4976_v35 = vld [vmem:[#allocation2 + $0x910] sm:$0xff] }
0x12f0   :  { %v4624_v40 = vpop.f32.mrf.mxu0 }
0x12f1   :  { %v4643_v57 = vmul.f32 %v4624_v40, %v7695_v62  ;;  %v7781_v33 = vadd.f32 %v4642_v43, %v7700_v5  ;;  %v4980_v5 = vld [vmem:[#allocation2 + $0x950] sm:$0xff]  ;;  %v4991_v40 = vld [vmem:[#allocation2 + $0xa00] sm:$0xff] }
0x12f2   :  { %v4626_v30 = vpop.f32.mrf.mxu0 }
0x12f3   :  { %v4644_v26 = vmul.f32 %v4626_v30, %v7687_v22  ;;  %v7777_v42 = vadd.f32 %v4643_v57, %v7692_v58  ;;  %v6458_v58 = vld [vmem:[#allocation2 + $0x130] sm:$0xff]  ;;  %v4975_v30 = vld [vmem:[#allocation2 + $0x900] sm:$0xff] }
0x12f4   :  { %v4630_v53 = vpop.f32.mrf.mxu0 }
0x12f5   :  { %v4645_v8 = vmul.f32 %v4630_v53, %v7679_v59  ;;  %v7773_v2 = vadd.f32 %v4644_v26, %v7684_v36  ;;  %v4996_v36 = vld [vmem:[#allocation2 + $0xa50] sm:$0xff] }
0x12f6   :  { %v4632_v15 = vpop.f32.mrf.mxu0  ;;  %v4990_v53 = vld [vmem:[#allocation2 + $0x9f0] sm:$0xff] }
0x12f7   :  { %v4646_v61 = vmul.f32 %v4632_v15, %v7670_v1  ;;  %v7769_v56 = vadd.f32 %v4645_v8, %v7676_v0  ;;  %v4981_v0 = vld [vmem:[#allocation2 + $0x960] sm:$0xff]  ;;  %v4974_v15 = vld [vmem:[#allocation2 + $0x8f0] sm:$0xff] }
0x12f8   :  { %v4636_v21 = vpop.f32.mrf.mxu0 }
0x12f9   :  { %v4647_v51 = vmul.f32 %v4636_v21, %v7663_v13  ;;  %v7764_v63 = vadd.f32 %v4646_v61, %v7667_v16  ;;  %v4982_v16 = vld [vmem:[#allocation2 + $0x970] sm:$0xff]  ;;  %v4989_v21 = vld [vmem:[#allocation2 + $0x9e0] sm:$0xff] }
0x12fa   :  { %v4638_v47 = vpop.f32.mrf.mxu0  ;;  %v4972_v61 = vld [vmem:[#allocation2 + $0x8d0] sm:$0xff] }
0x12fb   :  { %v4648_v52 = vmul.f32 %v4638_v47, %v7655_v20  ;;  %v7760_v45 = vadd.f32 %v4647_v51, %v7660_v55  ;;  %v4998_v55 = vld [vmem:[#allocation2 + $0xa70] sm:$0xff]  ;;  %v4973_v51 = vld [vmem:[#allocation2 + $0x8e0] sm:$0xff] }
0x12fc   :  { %v4988_v47 = vld [vmem:[#allocation2 + $0x9d0] sm:$0xff] }
0x12fd   :  { %v7756_v37 = vadd.f32 %v4648_v52, %v7652_v6  ;;  %v4984_v6 = vld [vmem:[#allocation2 + $0x990] sm:$0xff]  ;;  %v4723_v52 = vpop.f32.mrf.mxu1 }
0x12ff   :  { %4778 = vmatprep.subr.mxu0 %v7756_v37  ;;  %v4725_v8 = vpop.f32.mrf.mxu1 }
0x1300   :  { %4779 = vmatpush1.msra.mxu0 %v7760_v45 }
0x1301   :  { %4780 = vmatprep.subr.mxu0 %v7764_v63  ;;  %v4729_v26 = vpop.f32.mrf.mxu1 }
0x1302   :  { %4781 = vmatpush1.msra.mxu0 %v7769_v56 }
0x1303   :  { %4782 = vmatprep.subr.mxu0 %v7773_v2  ;;  %v4731_v57 = vpop.f32.mrf.mxu1 }
0x1304   :  { %4783 = vmatpush1.msra.mxu0 %v7777_v42 }
0x1305   :  { %4784 = vmatprep.subr.mxu0 %v7781_v33  ;;  %v4735_v43 = vpop.f32.mrf.mxu1 }
0x1306   :  { %4785 = vmatpush1.msra.mxu0 %v7785_v54 }
0x1307   :  { %5700 = vmatmul.mubr.msk.f32.vlgmr.msra.gmra.mxu0 %vm37_vm0, %v6455_v28  ;;  %5902 = vmatprep.subr.mxu0 %v5003_v34  ;;  %v4737_v14 = vpop.f32.mrf.mxu1 }
0x1308   :  { %4824 = vmatprep.mubr.f32.mxu0 %v7890_v44  ;;  %5903 = vmatpush3.msra.mxu0 %v4987_v46 }
0x1309   :  { %5904 = vmatprep.subr.mxu0 %v5002_v10  ;;  %v4741_v34 = vpop.f32.mrf.mxu1 }
0x130a   :  { %5905 = vmatpush3.msra.mxu0 %v4986_v48  ;;  %v4724_v48 = vadd.f32 %v4723_v52, %v7191_v4 }
0x130b   :  { %5701 = vmatmul.mubr.msk.f32.gmra.mxu0 %vm37_vm0, %v6456_v23  ;;  %5906 = vmatprep.subr.mxu0 %v5001_v11  ;;  %v4743_v46 = vpop.f32.mrf.mxu1  ;;  %v4726_v11 = vadd.f32 %v4725_v8, %v7191_v4 }
0x130c   :  { %4830 = vmatprep.mubr.f32.mxu0 %v7890_v44  ;;  %5907 = vmatpush3.msra.mxu0 %v4985_v38  ;;  %v4746_v23 = vmul.f32 %v4724_v48, %v7711_v3 }
0x130d   :  { %5908 = vmatprep.subr.mxu0 %v5000_v50  ;;  %v4941_v10 = vpop.f32.mrf.mxu1  ;;  %v4730_v50 = vadd.f32 %v4729_v26, %v7193_v19 }
0x130e   :  { %5909 = vmatpush3.msra.mxu0 %v4984_v6 }
0x130f   :  { %5702 = vmatmul.mubr.msk.f32.gmra.mxu0 %vm37_vm0, %v6457_v7  ;;  %5910 = vmatprep.subr.mxu0 %v4999_v9  ;;  %v4943_v28 = vpop.f32.mrf.mxu1  ;;  %v4732_v9 = vadd.f32 %v4731_v57, %v7193_v19 }
0x1310   :  { %4836 = vmatprep.mubr.f32.mxu0 %v7890_v44  ;;  %5911 = vmatpush3.msra.mxu0 %v4983_v27  ;;  %v4993_v44 = vld [vmem:[#allocation2 + $0xa20] sm:$0xff] }
0x1311   :  { %5912 = vmatprep.subr.mxu0 %v4998_v55  ;;  %v4947_v38 = vpop.f32.mrf.mxu1  ;;  %v4747_v55 = vmul.f32 %v4726_v11, %v7703_v41  ;;  %v4749_v19 = vmul.f32 %v4732_v9, %v7687_v22  ;;  %v7903_v41 = vld [vmem:[#allocation13_spill] sm:$0xff]  ;;  %v7904_v9 = vld [vmem:[#allocation16_spill] sm:$0xff] }
0x1312   :  { %5913 = vmatpush3.msra.mxu0 %v4982_v16 }
0x1313   :  { %5703 = vmatmul.mubr.msk.f32.gmra.mxu0 %vm37_vm0, %v6458_v58  ;;  %5914 = vmatprep.subr.mxu0 %v4997_v29  ;;  %v4949_v7 = vpop.f32.mrf.mxu1  ;;  %v4736_v29 = vadd.f32 %v4735_v43, %v7199_v18 }
0x1314   :  { %5915 = vmatpush3.msra.mxu0 %v4981_v0 }
0x1315   :  { %5916 = vmatprep.subr.mxu0 %v4996_v36  ;;  %v4748_v36 = vmul.f32 %v4730_v50, %v7695_v62 }
0x1316   :  { %5917 = vmatpush3.msra.mxu0 %v4980_v5  ;;  %v4738_v5 = vadd.f32 %v4737_v14, %v7199_v18 }
0x1317   :  { %5918 = vmatprep.subr.mxu0 %v4995_v17 }
0x1318   :  { %5919 = vmatpush3.msra.mxu0 %v4979_v49  ;;  %v4953_v49 = vpop.f32.mrf.mxu1  ;;  %v4751_v22 = vmul.f32 %v4738_v5, %v7670_v1 }
0x1319   :  { %5920 = vmatprep.subr.mxu0 %v4994_v12 }
0x131a   :  { %5921 = vmatpush3.msra.mxu0 %v4978_v25  ;;  %v4742_v25 = vadd.f32 %v4741_v34, %v7903_v41 }
0x131b   :  { %5922 = vmatprep.subr.mxu0 %v4993_v44 }
0x131c   :  { %5923 = vmatpush3.msra.mxu0 %v4977_v24  ;;  %v4750_v24 = vmul.f32 %v4736_v29, %v7679_v59 }
0x131d   :  { %5924 = vmatprep.subr.mxu0 %v4992_v31 }
0x131e   :  { %5925 = vmatpush3.msra.mxu0 %v4976_v35 }
0x131f   :  { %5926 = vmatprep.subr.mxu0 %v4991_v40  ;;  %v4744_v40 = vadd.f32 %v4743_v46, %v7903_v41 }
0x1320   :  { %5927 = vmatpush3.msra.mxu0 %v4975_v30  ;;  %v4955_v30 = vpop.f32.mrf.mxu1 }
0x1321   :  { %5928 = vmatprep.subr.mxu0 %v4990_v53 }
0x1322   :  { %5929 = vmatpush3.msra.mxu0 %v4974_v15  ;;  %v4959_v8 = vpop.f32.mrf.mxu1 }
0x1323   :  { %5930 = vmatprep.subr.mxu0 %v4989_v21  ;;  %v4752_v21 = vmul.f32 %v4742_v25, %v7663_v13 }
0x1324   :  { %5931 = vmatpush3.msra.mxu0 %v4973_v51  ;;  %v4961_v34 = vpop.f32.mrf.mxu1 }
0x1325   :  { %5932 = vmatprep.subr.mxu0 %v4988_v47 }
0x1326   :  { %5933 = vmatpush3.msra.mxu0 %v4972_v61 }
0x13c7   :  { %v4820_v6 = vpop.f32.mrf.mxu0 }
0x13c8   :  { %v4843_v27 = vmul.f32 %v4820_v6, %v4746_v23 }
0x13c9   :  { %v4822_v16 = vpop.f32.mrf.mxu0 }
0x13ca   :  { %v4844_v0 = vmul.f32 %v4822_v16, %v4747_v55  ;;  %v4851_v4 = vadd.f32 %v4843_v27, %v7785_v54 }
0x13cb   :  { %v4826_v58 = vpop.f32.mrf.mxu0 }
0x13cc   :  { %v4852_v3 = vadd.f32 %v4844_v0, %v7781_v33  ;;  %v4845_v17 = vmul.f32 %v4826_v58, %v4748_v36  ;;  %v4964_v35 = vmul.f32 %v4941_v10, %v4851_v4  ;;  %v5143_v10 = vld [vmem:[#allocation2 + $0x830] sm:$0xff]  ;;  %v7905_v36 = vld [vmem:[#allocation15_spill] sm:$0xff] }
0x13cd   :  { %v4828_v12 = vpop.f32.mrf.mxu0 }
0x13ce   :  { %v4846_v44 = vmul.f32 %v4828_v12, %v4749_v19  ;;  %v4965_v31 = vmul.f32 %v4943_v28, %v4852_v3  ;;  %v4853_v62 = vadd.f32 %v4845_v17, %v7777_v42  ;;  %v5142_v28 = vld [vmem:[#allocation2 + $0x820] sm:$0xff]  ;;  %v7906_v19 = vld [vmem:[#allocation18_spill] sm:$0xff] }
0x13cf   :  { %v4832_v54 = vpop.f32.mrf.mxu0  ;;  %v7907_v12 = vld [vmem:[#allocation14_spill] sm:$0xff] }
0x13d0   :  { %v4854_v18 = vadd.f32 %v4846_v44, %v7773_v2  ;;  %v4847_v33 = vmul.f32 %v4832_v54, %v4750_v24  ;;  %5073 = vmatprep.mubr.f32.mxu0 %v4965_v31  ;;  %v4966_v51 = vmul.f32 %v4947_v38, %v4853_v62  ;;  %v4753_v2 = vmul.f32 %v4744_v40, %v7655_v20  ;;  %v5144_v20 = vld [vmem:[#allocation2 + $0x840] sm:$0xff]  ;;  %v7908_v44 = vld [vmem:[#allocation17_spill] sm:$0xff] }
0x13d1   :  { %v4834_v53 = vpop.f32.mrf.mxu0  ;;  %5074 = vmatmul.mubr.f32.vlgmr.msra.gmra.mxu0 %v4964_v35  ;;  %v6459_v31 = vld [vmem:[#allocation2 + $0x250] sm:$0xff]  ;;  %v7910_v40 = vld [vmem:[#allocation7_spill] sm:$0xff] }
0x13d2   :  { %v4848_v15 = vmul.f32 %v4834_v53, %v4751_v22  ;;  %v4967_v59 = vmul.f32 %v4949_v7, %v4854_v18  ;;  %v4855_v47 = vadd.f32 %v4847_v33, %v7769_v56  ;;  %v6460_v54 = vld [vmem:[#allocation2 + $0x270] sm:$0xff]  ;;  %v5146_v22 = vld [vmem:[#allocation2 + $0x860] ss:$0 sm:$0xff] }
0x13d3   :  { %v4838_v42 = vpop.f32.mrf.mxu0  ;;  %v132_v18 = vadd.f32 %v6460_v54, %v7910_v40  ;;  %v5245_v53 = vld [vmem:[#allocation2 + $0x290] sm:$0xff]  ;;  %v5417_v40 = vld [vmem:[#allocation2 + $0x340] sm:$0xff] }
0x13d4   :  { %v4856_v61 = vadd.f32 %v4848_v15, %v7764_v63  ;;  %v4849_v52 = vmul.f32 %v4838_v42, %v4752_v21  ;;  %5078 = vmatprep.mubr.f32.mxu0 %v4967_v59  ;;  %v4968_v43 = vmul.f32 %v4953_v49, %v4855_v47  ;;  %v5145_v63 = vld [vmem:[#allocation2 + $0x850] sm:$0xff] }
0x13d5   :  { %v4840_v26 = vpop.f32.mrf.mxu0  ;;  %5079 = vmatmul.mubr.f32.gmra.mxu0 %v4966_v51  ;;  %6197 = vmatprep.subr.mxu1 %v5145_v63  ;;  %v5531_v33 = vmul.f32 -1.442695, %v132_v18  ;;  %v5299_v54 = vld [vmem:[#allocation2 + $0x1b0] sm:$0xff]  ;;  %v6461_v18 = vld [vmem:[#allocation2 + $0x240] sm:$0xff] }
0x13d6   :  { %v4850_v1 = vmul.f32 %v4840_v26, %v4753_v2  ;;  %v4969_v57 = vmul.f32 %v4955_v30, %v4856_v61  ;;  %v4857_v14 = vadd.f32 %v4849_v52, %v7760_v45  ;;  %6198 = vmatpush3.msra.mxu1 %v5145_v63  ;;  %v5004_v45 = vld [vmem:[#allocation2 + $0x810] ss:$0 sm:$0xff]  ;;  %v5244_v61 = vld [vmem:[#allocation2 + $0x280] sm:$0xff] }
0x13d7   :  { %6199 = vmatprep.subr.mxu1 %v5144_v20  ;;  %v5005_v11 = vmul.f32 %v5004_v45, %v7310_v60  ;;  %v5006_v55 = vmul.f32 %v5004_v45, %v7312_v32  ;;  %v5007_v58 = vmul.f32 %v5004_v45, %v7318_v39  ;;  %v5008_v32 = vmul.f32 %v5004_v45, %v7907_v12  ;;  %v7909_v39 = vld [vmem:[#allocation5_spill] sm:$0xff] }
0x13d8   :  { %v4858_v13 = vadd.f32 %v4850_v1, %v7756_v37  ;;  %5083 = vmatprep.mubr.f32.mxu0 %v4969_v57  ;;  %v4970_v46 = vmul.f32 %v4959_v8, %v4857_v14  ;;  %6200 = vmatpush3.msra.mxu1 %v5144_v20  ;;  %v122_v35 = vadd.f32 %v6459_v31, %v7909_v39  ;;  %v5247_v8 = vld [vmem:[#allocation2 + $0x2b0] sm:$0xff] }
0x13d9   :  { %5084 = vmatmul.mubr.f32.gmra.mxu0 %v4968_v43  ;;  %6201 = vmatprep.subr.mxu1 %v5143_v10  ;;  %v5246_v43 = vld [vmem:[#allocation2 + $0x2a0] sm:$0xff]  ;;  %v5265_v20 = vld [vmem:[#allocation2 + $0x310] sm:$0xff] }
0x13da   :  { %v4971_v56 = vmul.f32 %v4961_v34, %v4858_v13  ;;  %6202 = vmatpush3.msra.mxu1 %v5143_v10  ;;  %v5529_v62 = vmul.f32 -1.442695, %v122_v35  ;;  %v5297_v35 = vld [vmem:[#allocation2 + $0x190] sm:$0xff] }
0x13db   :  { %6203 = vmatprep.subr.mxu1 %v5142_v28 }
0x13dc   :  { %5088 = vmatprep.mubr.f32.mxu0 %v4971_v56  ;;  %6204 = vmatpush3.msra.mxu1 %v5142_v28  ;;  %6410 = vpow2.f32 %v5529_v62  ;;  %v5298_v62 = vld [vmem:[#allocation2 + $0x1a0] sm:$0xff] }
0x13dd   :  { %5089 = vmatmul.mubr.f32.gmra.mxu0 %v4970_v46  ;;  %6412 = vpow2.f32 %v5531_v33  ;;  %v5257_v46 = vld [vmem:[#allocation2 + $0x2d0] sm:$0xff]  ;;  %v7911_v33 = vld [vmem:[#allocation6_spill] sm:$0xff] }
0x13e9   :  { %v6411_v21 = vpop.eup %6410 }
0x13ea   :  { %v148_v42 = vadd.f32 1.0, %v6411_v21  ;;  %v6413_v1 = vpop.eup %6412 }
0x13eb   :  { %v150_v34 = vadd.f32 1.0, %v6413_v1 }
0x1491   :  { %v5934_v37 = vpop.f32.mrf.mxu0 }
0x1493   :  { %v5935_v48 = vpop.f32.mrf.mxu0 }
0x1494   :  { %v5936_v38 = vadd.f32 %v5935_v48, %v5934_v37  ;;  %v5259_v48 = vld [vmem:[#allocation2 + $0x2f0] sm:$0xff] }
0x1495   :  { %v5937_v50 = vpop.f32.mrf.mxu0 }
0x1496   :  { %v5076_v23 = vadd.f32 %v5936_v38, %v5005_v11 }
0x1497   :  { %v5938_v6 = vpop.f32.mrf.mxu0 }
0x1498   :  { %v5138_v27 = vmul.f32 %v7904_v9, %v5076_v23  ;;  %v5939_v7 = vadd.f32 %v5938_v6, %v5937_v50  ;;  %v5267_v50 = vld [vmem:[#allocation2 + $0x330] sm:$0xff]  ;;  %v5258_v23 = vld [vmem:[#allocation2 + $0x2e0] sm:$0xff] }
0x1499   :  { %v5940_v16 = vpop.f32.mrf.mxu0  ;;  %v5256_v6 = vld [vmem:[#allocation2 + $0x2c0] sm:$0xff] }
0x149a   :  { %v5081_v29 = vadd.f32 %v5939_v7, %v5006_v55  ;;  %6205 = vmatprep.mubr.msk.f32.mxu1 %vm37_vm0, %v5138_v27  ;;  %v5296_v27 = vld [vmem:[#allocation2 + $0x180] sm:$0xff]  ;;  %v5287_v7 = vpop.permute.xlu1 %5286 }
0x149b   :  { %v5941_v0 = vpop.f32.mrf.mxu0 }
0x149c   :  { %v5139_v4 = vmul.f32 %v7905_v36, %v5081_v29  ;;  %v5942_v5 = vadd.f32 %v5941_v0, %v5940_v16  ;;  %v5266_v16 = vld [vmem:[#allocation2 + $0x320] sm:$0xff] }
0x149d   :  { %v5943_v60 = vpop.f32.mrf.mxu0 }
0x149e   :  { %v5086_v3 = vadd.f32 %v5942_v5, %v5007_v58  ;;  %6206 = vmatmul.mubr.msk.f32.vlgmr.msra.gmra.mxu1 %vm37_vm0, %v5139_v4  ;;  %v5285_v58 = vpop.permute.xlu0 %5284  ;;  %v5264_v5 = vld [vmem:[#allocation2 + $0x300] sm:$0xff]  ;;  %v5283_v12 = vpop.permute.xlu1 %5282 }
0x149f   :  { %v5944_v17 = vpop.f32.mrf.mxu0 }
0x14a0   :  { %v5140_v49 = vmul.f32 %v7906_v19, %v5086_v3  ;;  %v5945_v41 = vadd.f32 %v5944_v17, %v5943_v60 }
0x14a2   :  { %v5091_v25 = vadd.f32 %v5945_v41, %v5008_v32  ;;  %6208 = vmatprep.mubr.msk.f32.mxu1 %vm37_vm0, %v5140_v49  ;;  %v5281_v41 = vpop.permute.xlu0 %5280 }
0x14a4   :  { %v5141_v24 = vmul.f32 %v7908_v44, %v5091_v25 }
0x14a6   :  { %6209 = vmatmul.mubr.msk.f32.gmra.mxu1 %vm37_vm0, %v5141_v24 }
0x14a7   :  { %6219 = vmatprep.mubr.msk.f32.mxu1 %vm37_vm0, %v5296_v27 }
0x155e   :  { %v6207_v30 = vpop.f32.mrf.mxu1 }
0x155f   :  { %v5231_v15 = vadd.f32 %v6207_v30, %v5146_v22 }
0x1560   :  { %v5225_v59 = vpop.f32.mrf.mxu1 }
0x1561   :  { %v5249_v51 = vmul.f32 %v5245_v53, %v5231_v15  ;;  %v5226_v47 = vadd.f32 %v5225_v59, %v5146_v22  ;;  %v6462_v53 = vld [vmem:[#allocation2 + $0x260] sm:$0xff]  ;;  %v7912_v15 = vld [vmem:[#allocation8_spill] sm:$0xff] }
0x1562   :  { %v127_v21 = vadd.f32 %v6462_v53, %v7912_v15 }
0x1563   :  { %6414 = vtanh.f32 %v5249_v51  ;;  %v5248_v52 = vmul.f32 %v5244_v61, %v5226_v47 }
0x1564   :  { %6416 = vrcp.f32 %v148_v42  ;;  %v5530_v59 = vmul.f32 -1.442695, %v127_v21 }
0x1565   :  { %6418 = vtanh.f32 %v5248_v52 }
0x1566   :  { %v6210_v2 = vpop.f32.mrf.mxu1 }
0x1567   :  { %v5241_v26 = vadd.f32 %v6210_v2, %v5146_v22 }
0x1568   :  { %v5235_v57 = vpop.f32.mrf.mxu1 }
0x1569   :  { %v5251_v14 = vmul.f32 %v5247_v8, %v5241_v26  ;;  %v5236_v13 = vadd.f32 %v5235_v57, %v5146_v22  ;;  %v117_v22 = vadd.f32 %v6461_v18, %v7911_v33 }
0x156b   :  { %6420 = vtanh.f32 %v5251_v14  ;;  %v5250_v56 = vmul.f32 %v5246_v43, %v5236_v13  ;;  %v5528_v30 = vmul.f32 -1.442695, %v117_v22 }
0x156d   :  { %6422 = vtanh.f32 %v5250_v56 }
0x156e   :  { %6424 = vrcp.f32 %v150_v34 }
0x156f   :  { %6426 = vpow2.f32 %v5528_v30 }
0x1570   :  { %v6415_v63 = vpop.eup %6414  ;;  %6428 = vpow2.f32 %v5530_v59 }
0x1571   :  { %v5261_v10 = vmul.f32 %v6415_v63, %v5257_v46  ;;  %v6417_v37 = vpop.eup %6416 }
0x1572   :  { %v6419_v11 = vpop.eup %6418 }
0x1573   :  { %v5269_v28 = vadd.f32 %v5265_v20, %v5261_v10  ;;  %v5260_v36 = vmul.f32 %v6419_v11, %v5256_v6 }
0x1575   :  { %v7835_v45 = vmul.f32 %v6417_v37, %v5269_v28  ;;  %v5268_v49 = vadd.f32 %v5264_v5, %v5260_v36  ;;  %v5293_v32 = vmul.f32 %v5283_v12, %v5269_v28 }
0x1577   :  { %v5292_v25 = vmul.f32 %v5281_v41, %v5268_v49 }
0x1578   :  { %v6421_v38 = vpop.eup %6420 }
0x1579   :  { %v5263_v9 = vmul.f32 %v6421_v38, %v5259_v48 }
0x157a   :  { %v6423_v55 = vpop.eup %6422 }
0x157b   :  { %v5271_v29 = vadd.f32 %v5267_v50, %v5263_v9  ;;  %v5262_v0 = vmul.f32 %v6423_v55, %v5258_v23  ;;  %v6425_v4 = vpop.eup %6424 }
0x157c   :  { %v6427_v51 = vpop.eup %6426 }
0x157d   :  { %v5295_v60 = vmul.f32 %v5287_v7, %v5271_v29  ;;  %v5270_v3 = vadd.f32 %v5266_v16, %v5262_v0  ;;  %v5275_v17 = vmul.f32 %v6425_v4, %v5271_v29  ;;  %v147_v47 = vadd.f32 1.0, %v6427_v51  ;;  %v6429_v42 = vpop.eup %6428 }
0x157e   :  { %v149_v61 = vadd.f32 1.0, %v6429_v42 }
0x157f   :  { %5310 = vrot.lane.b32.xlu1 %v5295_v60, %s6494_s24  ;;  %v5294_v19 = vmul.f32 %v5285_v58, %v5270_v3  ;;  %6430 = vrcp.f32 %v147_v47 }
0x1580   :  { %6432 = vrcp.f32 %v149_v61 }
0x1581   :  { %5308 = vrot.lane.b32.xlu0 %v5294_v19, %s6494_s24 }
0x1583   :  { %5306 = vrot.lane.b32.xlu1 %v5293_v32, %s6494_s24 }
0x1585   :  { %5304 = vrot.lane.b32.xlu0 %v5292_v25, %s6494_s24 }
0x158c   :  { %v6431_v52 = vpop.eup %6430 }
0x158d   :  { %v5272_v8 = vmul.f32 %v6431_v52, %v5268_v49  ;;  %v6433_v57 = vpop.eup %6432 }
0x158e   :  { %v5274_v13 = vmul.f32 %v6433_v57, %v5270_v3 }
0x15f1   :  { %v5311_v44 = vpop.permute.xlu1 %5310 }
0x15f2   :  { %6211 = vmatprep.subr.mxu1 %v5311_v44 }
0x15f3   :  { %6212 = vmatpush3.msra.mxu1 %v5311_v44  ;;  %v5309_v24 = vpop.permute.xlu0 %5308 }
0x15f4   :  { %6213 = vmatprep.subr.mxu1 %v5309_v24 }
0x15f5   :  { %v5307_v31 = vpop.permute.xlu1 %5306  ;;  %6214 = vmatpush3.msra.mxu1 %v5309_v24 }
0x15f6   :  { %6215 = vmatprep.subr.mxu1 %v5307_v31 }
0x15f7   :  { %6216 = vmatpush3.msra.mxu1 %v5307_v31  ;;  %v5305_v39 = vpop.permute.xlu0 %5304 }
0x15f8   :  { %6217 = vmatprep.subr.mxu1 %v5305_v39 }
0x15f9   :  { %6218 = vmatpush3.msra.mxu1 %v5305_v39 }
0x15fa   :  { %6220 = vmatmul.mubr.msk.f32.vlgmr.msra.gmra.mxu1 %vm37_vm0, %v5297_v35  ;;  %6225 = vmatprep.subr.mxu1 %v5417_v40 }
0x15fb   :  { %6222 = vmatprep.mubr.msk.f32.mxu1 %vm37_vm0, %v5298_v62  ;;  %6226 = vmatpush3.msra.mxu1 %v5417_v40 }
0x15fe   :  { %6223 = vmatmul.mubr.msk.f32.gmra.mxu1 %vm37_vm0, %v5299_v54 }
0x16ba   :  { %v6221_v2 = vpop.f32.mrf.mxu1 }
0x16bb   :  { %v5414_v43 = vadd.f32 %v6221_v2, %v7835_v45 }
0x16bc   :  { %v5394_v26 = vpop.f32.mrf.mxu1 }
0x16bd   :  { %v5413_v1 = vadd.f32 %v5394_v26, %v5272_v8 }
0x16be   :  { %v6224_v14 = vpop.f32.mrf.mxu1 }
0x16bf   :  { %6227 = vmatprep.mubr.msk.f32.mxu1 %vm1131_vm2, %v5413_v1  ;;  %v5416_v46 = vadd.f32 %v6224_v14, %v5275_v17 }
0x16c0   :  { %v5404_v34 = vpop.f32.mrf.mxu1  ;;  %6228 = vmatmul.mubr.msk.f32.vlgmr.msra.gmra.mxu1 %vm1131_vm2, %v5414_v43 }
0x16c1   :  { %v5415_v56 = vadd.f32 %v5404_v34, %v5274_v13 }
0x16c3   :  { %6230 = vmatprep.mubr.msk.f32.mxu1 %vm1131_vm2, %v5415_v56 }
0x16c4   :  { %6231 = vmatmul.mubr.msk.f32.gmra.mxu1 %vm1131_vm2, %v5416_v46 }
0x1780   :  { %v6229_v63 = vpop.f32.mrf.mxu1 }
0x1781   :  { %5516 = vst [vmem:[%s7866_s2 + $0x8] sm:$0xff] %v6229_v63 }
0x1782   :  { %v5496_v20 = vpop.f32.mrf.mxu1 }
0x1783   :  { %5515 = vst [vmem:[%s7866_s2] sm:$0xff] %v5496_v20 }
0x1784   :  { %v6232_v10 = vpop.f32.mrf.mxu1 }
0x1785   :  { %5518 = vst [vmem:[%s7866_s2 + $0x18] sm:$0xff] %v6232_v10 }
0x1786   :  { %v5506_v28 = vpop.f32.mrf.mxu1 }
0x1787   :  { %5517 = vst [vmem:[%s7866_s2 + $0x10] sm:$0xff] %v5506_v28 }
0x1788   :  { %5523 = vsyncpa [#allocation3], 1 }

</bundles_post_ra>
